<compile_context>
chip_gen: v7x
topology: tpu7x:2x2x1
jax: 0.10.0
libtpu: 0.0.40
codegen_flags: <defaults>
</compile_context>

<pallas_src>
import functools

import jax
import jax.numpy as jnp
from jax.experimental import pallas as pl
from jax.experimental.pallas import tpu as pltpu


# ------------------------------------------------------------------ fused NAFBlock kernel
def _nafblock_kernel(x_ref,
                     n1w_ref, n1b_ref,          # LayerNorm2d #1     (1, C) each
                     w1_ref, b1_ref,            # conv1 1x1          (C, 2C), (1, 2C)
                     wdw_ref, bdw_ref,          # depthwise 3x3      (9, 2C), (1, 2C)
                     wsca_ref, bsca_ref,        # SCA 1x1            (C, C), (1, C)
                     w3_ref, b3_ref,            # conv3 1x1          (C, C), (1, C)
                     beta_ref,                  # (1, C)
                     n2w_ref, n2b_ref,          # LayerNorm2d #2     (1, C) each
                     w4_ref, b4_ref,            # conv4 1x1          (C, 2C), (1, 2C)
                     w5_ref, b5_ref,            # conv5 1x1          (C, C), (1, C)
                     gamma_ref,                 # (1, C)
                     o_ref,                     # output block (1, H, W, C)
                     pad_ref,                   # VMEM scratch (H+2, W+2, 2C) for dw halo
                     *, eps):
    _, H, W, C = x_ref.shape
    dw = 2 * C
    HW = H * W

    # pixels -> sublanes, channels -> lanes (free reshape when W % 8 == 0)
    inp = x_ref[0].astype(jnp.float32).reshape(HW, C)

    def layernorm(v, w_r, b_r):
        mu = jnp.mean(v, axis=-1, keepdims=True)
        vc = v - mu
        var = jnp.mean(vc * vc, axis=-1, keepdims=True)
        return vc * jax.lax.rsqrt(var + eps) * w_r[...] + b_r[...]

    # ---- first branch -------------------------------------------------------------
    h = layernorm(inp, n1w_ref, n1b_ref)
    h = jnp.dot(h, w1_ref[...], preferred_element_type=jnp.float32) + b1_ref[...]   # (HW, 2C)

    # depthwise 3x3, padding=1: build halo once in a zero-padded VMEM scratch,
    # accumulate 9 statically-sliced taps (no HBM patch copies).
    pad_ref[...] = jnp.zeros_like(pad_ref)
    pad_ref[1:H + 1, 1:W + 1, :] = h.reshape(H, W, dw)
    wdw = wdw_ref[...].astype(jnp.float32)                       # (9, 2C)
    acc = jnp.zeros((H, W, dw), jnp.float32)
    for k in range(9):                                           # unrolled, static slices
        kh, kw = k // 3, k % 3
        acc = acc + pad_ref[kh:kh + H, kw:kw + W, :] * wdw[k][None, None, :]
    h = acc.reshape(HW, dw) + bdw_ref[...]

    g = h[:, :C] * h[:, C:]                                      # SimpleGate  (HW, C)

    # Simplified Channel Attention: per-image global average pool + 1x1 conv + scale.
    pooled = jnp.mean(g, axis=0, keepdims=True)                  # (1, C)
    s = jnp.dot(pooled, wsca_ref[...], preferred_element_type=jnp.float32) + bsca_ref[...]
    h = g * s

    h = jnp.dot(h, w3_ref[...], preferred_element_type=jnp.float32) + b3_ref[...]   # (HW, C)
    y = inp + h * beta_ref[...]                                  # first residual

    # ---- second branch (FFN) ------------------------------------------------------
    h = layernorm(y, n2w_ref, n2b_ref)
    h = jnp.dot(h, w4_ref[...], preferred_element_type=jnp.float32) + b4_ref[...]   # (HW, 2C)
    h = h[:, :C] * h[:, C:]                                      # SimpleGate
    h = jnp.dot(h, w5_ref[...], preferred_element_type=jnp.float32) + b5_ref[...]   # (HW, C)

    out = y + h * gamma_ref[...]                                 # second residual
    o_ref[0] = out.reshape(H, W, C).astype(o_ref.dtype)


# --------------------------------------------------------------------------- host wrappers
def nafblock_nhwc(x, p, *, eps=1e-6):
    """Fused NAFBlock forward on channels-last input (B, H, W, C)."""
    B, H, W, C = x.shape
    dw = 2 * C

    def wspec(shape):
        return pl.BlockSpec(shape, lambda b: (0, 0))             # all params are 2-D

    operands = (x,
                p["n1_w"], p["n1_b"], p["w1"], p["b1"], p["wdw"], p["bdw"],
                p["wsca"], p["bsca"], p["w3"], p["b3"], p["beta"],
                p["n2_w"], p["n2_b"], p["w4"], p["b4"], p["w5"], p["b5"], p["gamma"])

    in_specs = [pl.BlockSpec((1, H, W, C), lambda b: (b, 0, 0, 0))]
    in_specs += [wspec(tuple(op.shape)) for op in operands[1:]]

    return pl.pallas_call(
        functools.partial(_nafblock_kernel, eps=eps),
        out_shape=jax.ShapeDtypeStruct((B, H, W, C), x.dtype),
        grid=(B,),
        in_specs=in_specs,
        out_specs=pl.BlockSpec((1, H, W, C), lambda b: (b, 0, 0, 0)),
        scratch_shapes=[pltpu.VMEM((H + 2, W + 2, dw), jnp.float32)],
        compiler_params=pltpu.CompilerParams(dimension_semantics=("parallel",)),
    )(*operands)


def nafblock_nchw(x_nchw, p, *, eps=1e-6):
    """PyTorch-interface adapter: NCHW in / NCHW out."""
    x = jnp.transpose(x_nchw, (0, 2, 3, 1))
    y = nafblock_nhwc(x, p, eps=eps)
    return jnp.transpose(y, (0, 3, 1, 2))


# --------------------------------------------------------------------- pure-JAX reference
def nafblock_reference(x_nchw, p, eps=1e-6):
    hp = jax.lax.Precision.HIGHEST
    x = jnp.transpose(x_nchw, (0, 2, 3, 1)).astype(jnp.float32)  # NHWC
    C = x.shape[-1]

    def ln(v, w, b):
        mu = jnp.mean(v, axis=-1, keepdims=True)
        vc = v - mu
        var = jnp.mean(vc * vc, axis=-1, keepdims=True)
        return vc * jax.lax.rsqrt(var + eps) * w[0] + b[0]

    def c1x1(v, w, b):
        return jnp.einsum("bhwc,cd->bhwd", v, w, precision=hp) + b[0]

    h = ln(x, p["n1_w"], p["n1_b"])
    h = c1x1(h, p["w1"], p["b1"])
    wdw = p["wdw"].reshape(3, 3, 1, 2 * C)                       # HWIO, grouped
    h = jax.lax.conv_general_dilated(
        h, wdw, window_strides=(1, 1), padding="SAME",
        dimension_numbers=("NHWC", "HWIO", "NHWC"),
        feature_group_count=2 * C, precision=hp) + p["bdw"][0]
    g = h[..., :C] * h[..., C:]
    pooled = jnp.mean(g, axis=(1, 2), keepdims=True)
    s = c1x1(pooled, p["wsca"], p["bsca"])
    h = g * s
    h = c1x1(h, p["w3"], p["b3"])
    y = x + h * p["beta"][0]
    h = ln(y, p["n2_w"], p["n2_b"])
    h = c1x1(h, p["w4"], p["b4"])
    h = h[..., :C] * h[..., C:]
    h = c1x1(h, p["w5"], p["b5"])
    out = y + h * p["gamma"][0]
    return jnp.transpose(out, (0, 3, 1, 2))


# ------------------------------------------------------------------------------ parameters
def init_nafblock_params(rng, c, dtype=jnp.float32):
    """Channels-last parameter layout.

    Torch correspondence:
      1x1 conv weight (Cout, Cin, 1, 1)  ->  (Cin, Cout) here (x @ W)
      depthwise 3x3 weight (2C, 1, 3, 3) ->  (9, 2C) here, row index = kh*3 + kw
    """
    dw = 2 * c
    ks = jax.random.split(rng, 8)

    def dense(k, cin, cout):
        kw_, kb_ = jax.random.split(k)
        w = jax.random.normal(kw_, (cin, cout), dtype) / jnp.sqrt(float(cin))
        b = 0.02 * jax.random.normal(kb_, (1, cout), dtype)
        return w, b

    w1, b1 = dense(ks[0], c, dw)
    kdw_w, kdw_b = jax.random.split(ks[1])
    wdw = jax.random.normal(kdw_w, (9, dw), dtype) / 3.0
    bdw = 0.02 * jax.random.normal(kdw_b, (1, dw), dtype)
    wsca, bsca = dense(ks[2], c, c)
    w3, b3 = dense(ks[3], c, c)
    w4, b4 = dense(ks[4], c, dw)
    w5, b5 = dense(ks[5], c, c)
    return {
        "n1_w": jnp.ones((1, c), dtype), "n1_b": jnp.zeros((1, c), dtype),
        "n2_w": jnp.ones((1, c), dtype), "n2_b": jnp.zeros((1, c), dtype),
        "w1": w1, "b1": b1, "wdw": wdw, "bdw": bdw,
        "wsca": wsca, "bsca": bsca, "w3": w3, "b3": b3,
        "w4": w4, "b4": b4, "w5": w5, "b5": b5,
        # NOTE: PyTorch zero-initializes beta/gamma (an untrained NAFBlock is then an
        # identity map); small nonzero values are used here so the test exercises both
        # residual branches.  The kernel handles arbitrary beta/gamma.
        "beta": 0.1 * jax.random.normal(ks[6], (1, c), dtype),
        "gamma": 0.1 * jax.random.normal(ks[7], (1, c), dtype),
    }


# ------------------------------------------------------------------------------------ main
if __name__ == "__main__":
    B, C, H, W = 2, 16, 16, 16
    key = jax.random.PRNGKey(0)
    kp, kx = jax.random.split(key)
    params = init_nafblock_params(kp, C)
    x = jax.random.normal(kx, (B, C, H, W), jnp.float32)

    fwd = jax.jit(lambda a: nafblock_nchw(a, params))
    out = jax.block_until_ready(fwd(x))

    ref = jax.block_until_ready(jax.jit(lambda a: nafblock_reference(a, params))(x))

    assert out.shape == (B, C, H, W), out.shape
    assert bool(jnp.all(jnp.isfinite(out)))
    max_err = float(jnp.max(jnp.abs(out - ref)))
    assert max_err < 5e-3, f"mismatch vs reference: max abs err = {max_err}"
    print("KERNEL_OK")
</pallas_src>

<mosaic_0001>
module attributes {stable_mosaic.version = 11 : i64} {
  func.func @_nafblock_kernel(%arg0: i32, %arg1: memref<1x16x16x16xf32, #tpu.memory_space<vmem>>, %arg2: memref<1x16xf32, #tpu.memory_space<vmem>>, %arg3: memref<1x16xf32, #tpu.memory_space<vmem>>, %arg4: memref<16x32xf32, #tpu.memory_space<vmem>>, %arg5: memref<1x32xf32, #tpu.memory_space<vmem>>, %arg6: memref<9x32xf32, #tpu.memory_space<vmem>>, %arg7: memref<1x32xf32, #tpu.memory_space<vmem>>, %arg8: memref<16x16xf32, #tpu.memory_space<vmem>>, %arg9: memref<1x16xf32, #tpu.memory_space<vmem>>, %arg10: memref<16x16xf32, #tpu.memory_space<vmem>>, %arg11: memref<1x16xf32, #tpu.memory_space<vmem>>, %arg12: memref<1x16xf32, #tpu.memory_space<vmem>>, %arg13: memref<1x16xf32, #tpu.memory_space<vmem>>, %arg14: memref<1x16xf32, #tpu.memory_space<vmem>>, %arg15: memref<16x32xf32, #tpu.memory_space<vmem>>, %arg16: memref<1x32xf32, #tpu.memory_space<vmem>>, %arg17: memref<16x16xf32, #tpu.memory_space<vmem>>, %arg18: memref<1x16xf32, #tpu.memory_space<vmem>>, %arg19: memref<1x16xf32, #tpu.memory_space<vmem>>, %arg20: memref<1x16x16x16xf32, #tpu.memory_space<vmem>>, %arg21: memref<18x18x32xf32, #tpu.memory_space<vmem>>) attributes {dimension_semantics = [#tpu.dimension_semantics<parallel>], iteration_bounds = array<i64: 2>, scalar_prefetch = 0 : i64, scratch_operands = 1 : i64, tpu.core_type = #tpu.core_type<tc>, window_params = [{transform_indices = @transform_0, window_bounds = array<i64: 1, 16, 16, 16>}, {pipeline_mode = #tpu.pipeline_mode<synchronous>, transform_indices = @transform_1, window_bounds = array<i64: 1, 16>}, {pipeline_mode = #tpu.pipeline_mode<synchronous>, transform_indices = @transform_2, window_bounds = array<i64: 1, 16>}, {pipeline_mode = #tpu.pipeline_mode<synchronous>, transform_indices = @transform_3, window_bounds = array<i64: 16, 32>}, {pipeline_mode = #tpu.pipeline_mode<synchronous>, transform_indices = @transform_4, window_bounds = array<i64: 1, 32>}, {pipeline_mode = #tpu.pipeline_mode<synchronous>, transform_indices = @transform_5, window_bounds = array<i64: 9, 32>}, {pipeline_mode = #tpu.pipeline_mode<synchronous>, transform_indices = @transform_6, window_bounds = array<i64: 1, 32>}, {pipeline_mode = #tpu.pipeline_mode<synchronous>, transform_indices = @transform_7, window_bounds = array<i64: 16, 16>}, {pipeline_mode = #tpu.pipeline_mode<synchronous>, transform_indices = @transform_8, window_bounds = array<i64: 1, 16>}, {pipeline_mode = #tpu.pipeline_mode<synchronous>, transform_indices = @transform_9, window_bounds = array<i64: 16, 16>}, {pipeline_mode = #tpu.pipeline_mode<synchronous>, transform_indices = @transform_10, window_bounds = array<i64: 1, 16>}, {pipeline_mode = #tpu.pipeline_mode<synchronous>, transform_indices = @transform_11, window_bounds = array<i64: 1, 16>}, {pipeline_mode = #tpu.pipeline_mode<synchronous>, transform_indices = @transform_12, window_bounds = array<i64: 1, 16>}, {pipeline_mode = #tpu.pipeline_mode<synchronous>, transform_indices = @transform_13, window_bounds = array<i64: 1, 16>}, {pipeline_mode = #tpu.pipeline_mode<synchronous>, transform_indices = @transform_14, window_bounds = array<i64: 16, 32>}, {pipeline_mode = #tpu.pipeline_mode<synchronous>, transform_indices = @transform_15, window_bounds = array<i64: 1, 32>}, {pipeline_mode = #tpu.pipeline_mode<synchronous>, transform_indices = @transform_16, window_bounds = array<i64: 16, 16>}, {pipeline_mode = #tpu.pipeline_mode<synchronous>, transform_indices = @transform_17, window_bounds = array<i64: 1, 16>}, {pipeline_mode = #tpu.pipeline_mode<synchronous>, transform_indices = @transform_18, window_bounds = array<i64: 1, 16>}, {transform_indices = @transform_19, window_bounds = array<i64: 1, 16, 16, 16>}]} {
    %c0 = arith.constant 0 : index
    %c0_0 = arith.constant 0 : index
    %c0_1 = arith.constant 0 : index
    %c0_2 = arith.constant 0 : index
    %0 = vector.load %arg1[%c0, %c0_0, %c0_1, %c0_2] : memref<1x16x16x16xf32, #tpu.memory_space<vmem>>, vector<1x16x16x16xf32>
    %1 = vector.shape_cast %0 : vector<1x16x16x16xf32> to vector<16x16x16xf32>
    %2 = vector.shape_cast %1 : vector<16x16x16xf32> to vector<256x16xf32>
    %cst = arith.constant dense<0.000000e+00> : vector<256xf32>
    %3 = vector.multi_reduction <add>, %2, %cst [1] : vector<256x16xf32> to vector<256xf32>
    %4 = vector.shape_cast %3 : vector<256xf32> to vector<256x1xf32>
    %cst_3 = arith.constant 1.600000e+01 : f32
    %5 = vector.broadcast %cst_3 : f32 to vector<256x1xf32>
    %6 = arith.divf %4, %5 : vector<256x1xf32>
    %7 = vector.broadcast %6 : vector<256x1xf32> to vector<256x16xf32>
    %8 = arith.subf %2, %7 : vector<256x16xf32>
    %9 = arith.mulf %8, %8 : vector<256x16xf32>
    %cst_4 = arith.constant dense<0.000000e+00> : vector<256xf32>
    %10 = vector.multi_reduction <add>, %9, %cst_4 [1] : vector<256x16xf32> to vector<256xf32>
    %11 = vector.shape_cast %10 : vector<256xf32> to vector<256x1xf32>
    %cst_5 = arith.constant 1.600000e+01 : f32
    %12 = vector.broadcast %cst_5 : f32 to vector<256x1xf32>
    %13 = arith.divf %11, %12 : vector<256x1xf32>
    %cst_6 = arith.constant 9.99999997E-7 : f32
    %14 = vector.broadcast %cst_6 : f32 to vector<256x1xf32>
    %15 = arith.addf %13, %14 : vector<256x1xf32>
    %16 = math.rsqrt %15 : vector<256x1xf32>
    %17 = vector.broadcast %16 : vector<256x1xf32> to vector<256x16xf32>
    %18 = arith.mulf %8, %17 : vector<256x16xf32>
    %c0_7 = arith.constant 0 : index
    %c0_8 = arith.constant 0 : index
    %19 = vector.load %arg2[%c0_7, %c0_8] : memref<1x16xf32, #tpu.memory_space<vmem>>, vector<1x16xf32>
    %20 = vector.broadcast %19 : vector<1x16xf32> to vector<256x16xf32>
    %21 = arith.mulf %18, %20 : vector<256x16xf32>
    %c0_9 = arith.constant 0 : index
    %c0_10 = arith.constant 0 : index
    %22 = vector.load %arg3[%c0_9, %c0_10] : memref<1x16xf32, #tpu.memory_space<vmem>>, vector<1x16xf32>
    %23 = vector.broadcast %22 : vector<1x16xf32> to vector<256x16xf32>
    %24 = arith.addf %21, %23 : vector<256x16xf32>
    %c0_11 = arith.constant 0 : index
    %c0_12 = arith.constant 0 : index
    %25 = vector.load %arg4[%c0_11, %c0_12] : memref<16x32xf32, #tpu.memory_space<vmem>>, vector<16x32xf32>
    %cst_13 = arith.constant dense<0.000000e+00> : vector<256x32xf32>
    %26 = tpu.matmul %24, %25, %cst_13 {dimension_numbers = #tpu.dot_dimension_numbers<[1], [0], [0], [1], [0, 0, 1, 1], [], []>} : vector<256x16xf32>, vector<16x32xf32>, vector<256x32xf32> -> vector<256x32xf32>
    %c0_14 = arith.constant 0 : index
    %c0_15 = arith.constant 0 : index
    %27 = vector.load %arg5[%c0_14, %c0_15] : memref<1x32xf32, #tpu.memory_space<vmem>>, vector<1x32xf32>
    %28 = vector.broadcast %27 : vector<1x32xf32> to vector<256x32xf32>
    %29 = arith.addf %26, %28 : vector<256x32xf32>
    %cst_16 = arith.constant 0.000000e+00 : f32
    %30 = vector.broadcast %cst_16 : f32 to vector<18x18x32xf32>
    %c0_17 = arith.constant 0 : index
    %c0_18 = arith.constant 0 : index
    %c0_19 = arith.constant 0 : index
    %31 = vector.load %arg21[%c0_17, %c0_18, %c0_19] : memref<18x18x32xf32, #tpu.memory_space<vmem>>, vector<18x18x32xf32>
    tpu.vector_store %arg21[%c0_17, %c0_18, %c0_19], %30 {strides = array<i32>} : memref<18x18x32xf32, #tpu.memory_space<vmem>>, vector<18x18x32xf32>,
    %32 = vector.shape_cast %29 : vector<256x32xf32> to vector<16x16x32xf32>
    %c1 = arith.constant 1 : index
    %c1_20 = arith.constant 1 : index
    %c0_21 = arith.constant 0 : index
    %33 = vector.load %arg21[%c1, %c1_20, %c0_21] : memref<18x18x32xf32, #tpu.memory_space<vmem>>, vector<16x16x32xf32>
    tpu.vector_store %arg21[%c1, %c1_20, %c0_21], %32 {strides = array<i32>} : memref<18x18x32xf32, #tpu.memory_space<vmem>>, vector<16x16x32xf32>,
    %c0_22 = arith.constant 0 : index
    %c0_23 = arith.constant 0 : index
    %34 = vector.load %arg6[%c0_22, %c0_23] : memref<9x32xf32, #tpu.memory_space<vmem>>, vector<9x32xf32>
    %cst_24 = arith.constant 0.000000e+00 : f32
    %35 = vector.broadcast %cst_24 : f32 to vector<16x16x32xf32>
    %c0_25 = arith.constant 0 : index
    %c0_26 = arith.constant 0 : index
    %c0_27 = arith.constant 0 : index
    %36 = vector.load %arg21[%c0_25, %c0_26, %c0_27] : memref<18x18x32xf32, #tpu.memory_space<vmem>>, vector<16x16x32xf32>
    %37 = vector.extract_strided_slice %34 {offsets = [0, 0], sizes = [1, 32], strides = [1, 1]} : vector<9x32xf32> to vector<1x32xf32>
    %38 = vector.shape_cast %37 : vector<1x32xf32> to vector<32xf32>
    %39 = vector.shape_cast %38 : vector<32xf32> to vector<1x1x32xf32>
    %40 = vector.broadcast %39 : vector<1x1x32xf32> to vector<16x16x32xf32>
    %41 = arith.mulf %36, %40 : vector<16x16x32xf32>
    %42 = arith.addf %35, %41 : vector<16x16x32xf32>
    %c0_28 = arith.constant 0 : index
    %c1_29 = arith.constant 1 : index
    %c0_30 = arith.constant 0 : index
    %43 = vector.load %arg21[%c0_28, %c1_29, %c0_30] : memref<18x18x32xf32, #tpu.memory_space<vmem>>, vector<16x16x32xf32>
    %44 = vector.extract_strided_slice %34 {offsets = [1, 0], sizes = [1, 32], strides = [1, 1]} : vector<9x32xf32> to vector<1x32xf32>
    %45 = vector.shape_cast %44 : vector<1x32xf32> to vector<32xf32>
    %46 = vector.shape_cast %45 : vector<32xf32> to vector<1x1x32xf32>
    %47 = vector.broadcast %46 : vector<1x1x32xf32> to vector<16x16x32xf32>
    %48 = arith.mulf %43, %47 : vector<16x16x32xf32>
    %49 = arith.addf %42, %48 : vector<16x16x32xf32>
    %c0_31 = arith.constant 0 : index
    %c2 = arith.constant 2 : index
    %c0_32 = arith.constant 0 : index
    %50 = vector.load %arg21[%c0_31, %c2, %c0_32] : memref<18x18x32xf32, #tpu.memory_space<vmem>>, vector<16x16x32xf32>
    %51 = vector.extract_strided_slice %34 {offsets = [2, 0], sizes = [1, 32], strides = [1, 1]} : vector<9x32xf32> to vector<1x32xf32>
    %52 = vector.shape_cast %51 : vector<1x32xf32> to vector<32xf32>
    %53 = vector.shape_cast %52 : vector<32xf32> to vector<1x1x32xf32>
    %54 = vector.broadcast %53 : vector<1x1x32xf32> to vector<16x16x32xf32>
    %55 = arith.mulf %50, %54 : vector<16x16x32xf32>
    %56 = arith.addf %49, %55 : vector<16x16x32xf32>
    %c1_33 = arith.constant 1 : index
    %c0_34 = arith.constant 0 : index
    %c0_35 = arith.constant 0 : index
    %57 = vector.load %arg21[%c1_33, %c0_34, %c0_35] : memref<18x18x32xf32, #tpu.memory_space<vmem>>, vector<16x16x32xf32>
    %58 = vector.extract_strided_slice %34 {offsets = [3, 0], sizes = [1, 32], strides = [1, 1]} : vector<9x32xf32> to vector<1x32xf32>
    %59 = vector.shape_cast %58 : vector<1x32xf32> to vector<32xf32>
    %60 = vector.shape_cast %59 : vector<32xf32> to vector<1x1x32xf32>
    %61 = vector.broadcast %60 : vector<1x1x32xf32> to vector<16x16x32xf32>
    %62 = arith.mulf %57, %61 : vector<16x16x32xf32>
    %63 = arith.addf %56, %62 : vector<16x16x32xf32>
    %c1_36 = arith.constant 1 : index
    %c1_37 = arith.constant 1 : index
    %c0_38 = arith.constant 0 : index
    %64 = vector.load %arg21[%c1_36, %c1_37, %c0_38] : memref<18x18x32xf32, #tpu.memory_space<vmem>>, vector<16x16x32xf32>
    %65 = vector.extract_strided_slice %34 {offsets = [4, 0], sizes = [1, 32], strides = [1, 1]} : vector<9x32xf32> to vector<1x32xf32>
    %66 = vector.shape_cast %65 : vector<1x32xf32> to vector<32xf32>
    %67 = vector.shape_cast %66 : vector<32xf32> to vector<1x1x32xf32>
    %68 = vector.broadcast %67 : vector<1x1x32xf32> to vector<16x16x32xf32>
    %69 = arith.mulf %64, %68 : vector<16x16x32xf32>
    %70 = arith.addf %63, %69 : vector<16x16x32xf32>
    %c1_39 = arith.constant 1 : index
    %c2_40 = arith.constant 2 : index
    %c0_41 = arith.constant 0 : index
    %71 = vector.load %arg21[%c1_39, %c2_40, %c0_41] : memref<18x18x32xf32, #tpu.memory_space<vmem>>, vector<16x16x32xf32>
    %72 = vector.extract_strided_slice %34 {offsets = [5, 0], sizes = [1, 32], strides = [1, 1]} : vector<9x32xf32> to vector<1x32xf32>
    %73 = vector.shape_cast %72 : vector<1x32xf32> to vector<32xf32>
    %74 = vector.shape_cast %73 : vector<32xf32> to vector<1x1x32xf32>
    %75 = vector.broadcast %74 : vector<1x1x32xf32> to vector<16x16x32xf32>
    %76 = arith.mulf %71, %75 : vector<16x16x32xf32>
    %77 = arith.addf %70, %76 : vector<16x16x32xf32>
    %c2_42 = arith.constant 2 : index
    %c0_43 = arith.constant 0 : index
    %c0_44 = arith.constant 0 : index
    %78 = vector.load %arg21[%c2_42, %c0_43, %c0_44] : memref<18x18x32xf32, #tpu.memory_space<vmem>>, vector<16x16x32xf32>
    %79 = vector.extract_strided_slice %34 {offsets = [6, 0], sizes = [1, 32], strides = [1, 1]} : vector<9x32xf32> to vector<1x32xf32>
    %80 = vector.shape_cast %79 : vector<1x32xf32> to vector<32xf32>
    %81 = vector.shape_cast %80 : vector<32xf32> to vector<1x1x32xf32>
    %82 = vector.broadcast %81 : vector<1x1x32xf32> to vector<16x16x32xf32>
    %83 = arith.mulf %78, %82 : vector<16x16x32xf32>
    %84 = arith.addf %77, %83 : vector<16x16x32xf32>
    %c2_45 = arith.constant 2 : index
    %c1_46 = arith.constant 1 : index
    %c0_47 = arith.constant 0 : index
    %85 = vector.load %arg21[%c2_45, %c1_46, %c0_47] : memref<18x18x32xf32, #tpu.memory_space<vmem>>, vector<16x16x32xf32>
    %86 = vector.extract_strided_slice %34 {offsets = [7, 0], sizes = [1, 32], strides = [1, 1]} : vector<9x32xf32> to vector<1x32xf32>
    %87 = vector.shape_cast %86 : vector<1x32xf32> to vector<32xf32>
    %88 = vector.shape_cast %87 : vector<32xf32> to vector<1x1x32xf32>
    %89 = vector.broadcast %88 : vector<1x1x32xf32> to vector<16x16x32xf32>
    %90 = arith.mulf %85, %89 : vector<16x16x32xf32>
    %91 = arith.addf %84, %90 : vector<16x16x32xf32>
    %c2_48 = arith.constant 2 : index
    %c2_49 = arith.constant 2 : index
    %c0_50 = arith.constant 0 : index
    %92 = vector.load %arg21[%c2_48, %c2_49, %c0_50] : memref<18x18x32xf32, #tpu.memory_space<vmem>>, vector<16x16x32xf32>
    %93 = vector.extract_strided_slice %34 {offsets = [8, 0], sizes = [1, 32], strides = [1, 1]} : vector<9x32xf32> to vector<1x32xf32>
    %94 = vector.shape_cast %93 : vector<1x32xf32> to vector<32xf32>
    %95 = vector.shape_cast %94 : vector<32xf32> to vector<1x1x32xf32>
    %96 = vector.broadcast %95 : vector<1x1x32xf32> to vector<16x16x32xf32>
    %97 = arith.mulf %92, %96 : vector<16x16x32xf32>
    %98 = arith.addf %91, %97 : vector<16x16x32xf32>
    %99 = vector.shape_cast %98 : vector<16x16x32xf32> to vector<256x32xf32>
    %c0_51 = arith.constant 0 : index
    %c0_52 = arith.constant 0 : index
    %100 = vector.load %arg7[%c0_51, %c0_52] : memref<1x32xf32, #tpu.memory_space<vmem>>, vector<1x32xf32>
    %101 = vector.broadcast %100 : vector<1x32xf32> to vector<256x32xf32>
    %102 = arith.addf %99, %101 : vector<256x32xf32>
    %103 = vector.extract_strided_slice %102 {offsets = [0, 0], sizes = [256, 16], strides = [1, 1]} : vector<256x32xf32> to vector<256x16xf32>
    %104 = vector.extract_strided_slice %102 {offsets = [0, 16], sizes = [256, 16], strides = [1, 1]} : vector<256x32xf32> to vector<256x16xf32>
    %105 = arith.mulf %103, %104 : vector<256x16xf32>
    %cst_53 = arith.constant dense<0.000000e+00> : vector<16xf32>
    %106 = vector.multi_reduction <add>, %105, %cst_53 [0] : vector<256x16xf32> to vector<16xf32>
    %107 = vector.shape_cast %106 : vector<16xf32> to vector<1x16xf32>
    %cst_54 = arith.constant 2.560000e+02 : f32
    %108 = vector.broadcast %cst_54 : f32 to vector<1x16xf32>
    %109 = arith.divf %107, %108 : vector<1x16xf32>
    %c0_55 = arith.constant 0 : index
    %c0_56 = arith.constant 0 : index
    %110 = vector.load %arg8[%c0_55, %c0_56] : memref<16x16xf32, #tpu.memory_space<vmem>>, vector<16x16xf32>
    %cst_57 = arith.constant dense<0.000000e+00> : vector<1x16xf32>
    %111 = tpu.matmul %109, %110, %cst_57 {dimension_numbers = #tpu.dot_dimension_numbers<[1], [0], [0], [1], [0, 0, 1, 1], [], []>} : vector<1x16xf32>, vector<16x16xf32>, vector<1x16xf32> -> vector<1x16xf32>
    %c0_58 = arith.constant 0 : index
    %c0_59 = arith.constant 0 : index
    %112 = vector.load %arg9[%c0_58, %c0_59] : memref<1x16xf32, #tpu.memory_space<vmem>>, vector<1x16xf32>
    %113 = arith.addf %111, %112 : vector<1x16xf32>
    %114 = vector.broadcast %113 : vector<1x16xf32> to vector<256x16xf32>
    %115 = arith.mulf %105, %114 : vector<256x16xf32>
    %c0_60 = arith.constant 0 : index
    %c0_61 = arith.constant 0 : index
    %116 = vector.load %arg10[%c0_60, %c0_61] : memref<16x16xf32, #tpu.memory_space<vmem>>, vector<16x16xf32>
    %cst_62 = arith.constant dense<0.000000e+00> : vector<256x16xf32>
    %117 = tpu.matmul %115, %116, %cst_62 {dimension_numbers = #tpu.dot_dimension_numbers<[1], [0], [0], [1], [0, 0, 1, 1], [], []>} : vector<256x16xf32>, vector<16x16xf32>, vector<256x16xf32> -> vector<256x16xf32>
    %c0_63 = arith.constant 0 : index
    %c0_64 = arith.constant 0 : index
    %118 = vector.load %arg11[%c0_63, %c0_64] : memref<1x16xf32, #tpu.memory_space<vmem>>, vector<1x16xf32>
    %119 = vector.broadcast %118 : vector<1x16xf32> to vector<256x16xf32>
    %120 = arith.addf %117, %119 : vector<256x16xf32>
    %c0_65 = arith.constant 0 : index
    %c0_66 = arith.constant 0 : index
    %121 = vector.load %arg12[%c0_65, %c0_66] : memref<1x16xf32, #tpu.memory_space<vmem>>, vector<1x16xf32>
    %122 = vector.broadcast %121 : vector<1x16xf32> to vector<256x16xf32>
    %123 = arith.mulf %120, %122 : vector<256x16xf32>
    %124 = arith.addf %2, %123 : vector<256x16xf32>
    %cst_67 = arith.constant dense<0.000000e+00> : vector<256xf32>
    %125 = vector.multi_reduction <add>, %124, %cst_67 [1] : vector<256x16xf32> to vector<256xf32>
    %126 = vector.shape_cast %125 : vector<256xf32> to vector<256x1xf32>
    %cst_68 = arith.constant 1.600000e+01 : f32
    %127 = vector.broadcast %cst_68 : f32 to vector<256x1xf32>
    %128 = arith.divf %126, %127 : vector<256x1xf32>
    %129 = vector.broadcast %128 : vector<256x1xf32> to vector<256x16xf32>
    %130 = arith.subf %124, %129 : vector<256x16xf32>
    %131 = arith.mulf %130, %130 : vector<256x16xf32>
    %cst_69 = arith.constant dense<0.000000e+00> : vector<256xf32>
    %132 = vector.multi_reduction <add>, %131, %cst_69 [1] : vector<256x16xf32> to vector<256xf32>
    %133 = vector.shape_cast %132 : vector<256xf32> to vector<256x1xf32>
    %cst_70 = arith.constant 1.600000e+01 : f32
    %134 = vector.broadcast %cst_70 : f32 to vector<256x1xf32>
    %135 = arith.divf %133, %134 : vector<256x1xf32>
    %cst_71 = arith.constant 9.99999997E-7 : f32
    %136 = vector.broadcast %cst_71 : f32 to vector<256x1xf32>
    %137 = arith.addf %135, %136 : vector<256x1xf32>
    %138 = math.rsqrt %137 : vector<256x1xf32>
    %139 = vector.broadcast %138 : vector<256x1xf32> to vector<256x16xf32>
    %140 = arith.mulf %130, %139 : vector<256x16xf32>
    %c0_72 = arith.constant 0 : index
    %c0_73 = arith.constant 0 : index
    %141 = vector.load %arg13[%c0_72, %c0_73] : memref<1x16xf32, #tpu.memory_space<vmem>>, vector<1x16xf32>
    %142 = vector.broadcast %141 : vector<1x16xf32> to vector<256x16xf32>
    %143 = arith.mulf %140, %142 : vector<256x16xf32>
    %c0_74 = arith.constant 0 : index
    %c0_75 = arith.constant 0 : index
    %144 = vector.load %arg14[%c0_74, %c0_75] : memref<1x16xf32, #tpu.memory_space<vmem>>, vector<1x16xf32>
    %145 = vector.broadcast %144 : vector<1x16xf32> to vector<256x16xf32>
    %146 = arith.addf %143, %145 : vector<256x16xf32>
    %c0_76 = arith.constant 0 : index
    %c0_77 = arith.constant 0 : index
    %147 = vector.load %arg15[%c0_76, %c0_77] : memref<16x32xf32, #tpu.memory_space<vmem>>, vector<16x32xf32>
    %cst_78 = arith.constant dense<0.000000e+00> : vector<256x32xf32>
    %148 = tpu.matmul %146, %147, %cst_78 {dimension_numbers = #tpu.dot_dimension_numbers<[1], [0], [0], [1], [0, 0, 1, 1], [], []>} : vector<256x16xf32>, vector<16x32xf32>, vector<256x32xf32> -> vector<256x32xf32>
    %c0_79 = arith.constant 0 : index
    %c0_80 = arith.constant 0 : index
    %149 = vector.load %arg16[%c0_79, %c0_80] : memref<1x32xf32, #tpu.memory_space<vmem>>, vector<1x32xf32>
    %150 = vector.broadcast %149 : vector<1x32xf32> to vector<256x32xf32>
    %151 = arith.addf %148, %150 : vector<256x32xf32>
    %152 = vector.extract_strided_slice %151 {offsets = [0, 0], sizes = [256, 16], strides = [1, 1]} : vector<256x32xf32> to vector<256x16xf32>
    %153 = vector.extract_strided_slice %151 {offsets = [0, 16], sizes = [256, 16], strides = [1, 1]} : vector<256x32xf32> to vector<256x16xf32>
    %154 = arith.mulf %152, %153 : vector<256x16xf32>
    %c0_81 = arith.constant 0 : index
    %c0_82 = arith.constant 0 : index
    %155 = vector.load %arg17[%c0_81, %c0_82] : memref<16x16xf32, #tpu.memory_space<vmem>>, vector<16x16xf32>
    %cst_83 = arith.constant dense<0.000000e+00> : vector<256x16xf32>
    %156 = tpu.matmul %154, %155, %cst_83 {dimension_numbers = #tpu.dot_dimension_numbers<[1], [0], [0], [1], [0, 0, 1, 1], [], []>} : vector<256x16xf32>, vector<16x16xf32>, vector<256x16xf32> -> vector<256x16xf32>
    %c0_84 = arith.constant 0 : index
    %c0_85 = arith.constant 0 : index
    %157 = vector.load %arg18[%c0_84, %c0_85] : memref<1x16xf32, #tpu.memory_space<vmem>>, vector<1x16xf32>
    %158 = vector.broadcast %157 : vector<1x16xf32> to vector<256x16xf32>
    %159 = arith.addf %156, %158 : vector<256x16xf32>
    %c0_86 = arith.constant 0 : index
    %c0_87 = arith.constant 0 : index
    %160 = vector.load %arg19[%c0_86, %c0_87] : memref<1x16xf32, #tpu.memory_space<vmem>>, vector<1x16xf32>
    %161 = vector.broadcast %160 : vector<1x16xf32> to vector<256x16xf32>
    %162 = arith.mulf %159, %161 : vector<256x16xf32>
    %163 = arith.addf %124, %162 : vector<256x16xf32>
    %164 = vector.shape_cast %163 : vector<256x16xf32> to vector<16x16x16xf32>
    %c0_88 = arith.constant 0 : index
    %c0_89 = arith.constant 0 : index
    %c0_90 = arith.constant 0 : index
    %c0_91 = arith.constant 0 : index
    %165 = vector.load %arg20[%c0_88, %c0_89, %c0_90, %c0_91] : memref<1x16x16x16xf32, #tpu.memory_space<vmem>>, vector<1x16x16x16xf32>
    %166 = vector.shape_cast %165 : vector<1x16x16x16xf32> to vector<16x16x16xf32>
    %167 = vector.shape_cast %164 : vector<16x16x16xf32> to vector<1x16x16x16xf32>
    tpu.vector_store %arg20[%c0_88, %c0_89, %c0_90, %c0_91], %167 {strides = array<i32>} : memref<1x16x16x16xf32, #tpu.memory_space<vmem>>, vector<1x16x16x16xf32>,
    return
  }
  func.func @transform_0(%arg0: i32) -> (i32, i32, i32, i32) {
    %c0_i32 = arith.constant 0 : i32
    %c0_i32_0 = arith.constant 0 : i32
    %c0_i32_1 = arith.constant 0 : i32
    %c0_i32_2 = arith.constant 0 : i32
    return %arg0, %c0_i32, %c0_i32_0, %c0_i32_1 : i32, i32, i32, i32
  }
  func.func @transform_1(%arg0: i32) -> (i32, i32) {
    %c0_i32 = arith.constant 0 : i32
    %c0_i32_0 = arith.constant 0 : i32
    %c0_i32_1 = arith.constant 0 : i32
    return %c0_i32, %c0_i32_0 : i32, i32
  }
  func.func @transform_2(%arg0: i32) -> (i32, i32) {
    %c0_i32 = arith.constant 0 : i32
    %c0_i32_0 = arith.constant 0 : i32
    %c0_i32_1 = arith.constant 0 : i32
    return %c0_i32, %c0_i32_0 : i32, i32
  }
  func.func @transform_3(%arg0: i32) -> (i32, i32) {
    %c0_i32 = arith.constant 0 : i32
    %c0_i32_0 = arith.constant 0 : i32
    %c0_i32_1 = arith.constant 0 : i32
    return %c0_i32, %c0_i32_0 : i32, i32
  }
  func.func @transform_4(%arg0: i32) -> (i32, i32) {
    %c0_i32 = arith.constant 0 : i32
    %c0_i32_0 = arith.constant 0 : i32
    %c0_i32_1 = arith.constant 0 : i32
    return %c0_i32, %c0_i32_0 : i32, i32
  }
  func.func @transform_5(%arg0: i32) -> (i32, i32) {
    %c0_i32 = arith.constant 0 : i32
    %c0_i32_0 = arith.constant 0 : i32
    %c0_i32_1 = arith.constant 0 : i32
    return %c0_i32, %c0_i32_0 : i32, i32
  }
  func.func @transform_6(%arg0: i32) -> (i32, i32) {
    %c0_i32 = arith.constant 0 : i32
    %c0_i32_0 = arith.constant 0 : i32
    %c0_i32_1 = arith.constant 0 : i32
    return %c0_i32, %c0_i32_0 : i32, i32
  }
  func.func @transform_7(%arg0: i32) -> (i32, i32) {
    %c0_i32 = arith.constant 0 : i32
    %c0_i32_0 = arith.constant 0 : i32
    %c0_i32_1 = arith.constant 0 : i32
    return %c0_i32, %c0_i32_0 : i32, i32
  }
  func.func @transform_8(%arg0: i32) -> (i32, i32) {
    %c0_i32 = arith.constant 0 : i32
    %c0_i32_0 = arith.constant 0 : i32
    %c0_i32_1 = arith.constant 0 : i32
    return %c0_i32, %c0_i32_0 : i32, i32
  }
  func.func @transform_9(%arg0: i32) -> (i32, i32) {
    %c0_i32 = arith.constant 0 : i32
    %c0_i32_0 = arith.constant 0 : i32
    %c0_i32_1 = arith.constant 0 : i32
    return %c0_i32, %c0_i32_0 : i32, i32
  }
  func.func @transform_10(%arg0: i32) -> (i32, i32) {
    %c0_i32 = arith.constant 0 : i32
    %c0_i32_0 = arith.constant 0 : i32
    %c0_i32_1 = arith.constant 0 : i32
    return %c0_i32, %c0_i32_0 : i32, i32
  }
  func.func @transform_11(%arg0: i32) -> (i32, i32) {
    %c0_i32 = arith.constant 0 : i32
    %c0_i32_0 = arith.constant 0 : i32
    %c0_i32_1 = arith.constant 0 : i32
    return %c0_i32, %c0_i32_0 : i32, i32
  }
  func.func @transform_12(%arg0: i32) -> (i32, i32) {
    %c0_i32 = arith.constant 0 : i32
    %c0_i32_0 = arith.constant 0 : i32
    %c0_i32_1 = arith.constant 0 : i32
    return %c0_i32, %c0_i32_0 : i32, i32
  }
  func.func @transform_13(%arg0: i32) -> (i32, i32) {
    %c0_i32 = arith.constant 0 : i32
    %c0_i32_0 = arith.constant 0 : i32
    %c0_i32_1 = arith.constant 0 : i32
    return %c0_i32, %c0_i32_0 : i32, i32
  }
  func.func @transform_14(%arg0: i32) -> (i32, i32) {
    %c0_i32 = arith.constant 0 : i32
    %c0_i32_0 = arith.constant 0 : i32
    %c0_i32_1 = arith.constant 0 : i32
    return %c0_i32, %c0_i32_0 : i32, i32
  }
  func.func @transform_15(%arg0: i32) -> (i32, i32) {
    %c0_i32 = arith.constant 0 : i32
    %c0_i32_0 = arith.constant 0 : i32
    %c0_i32_1 = arith.constant 0 : i32
    return %c0_i32, %c0_i32_0 : i32, i32
  }
  func.func @transform_16(%arg0: i32) -> (i32, i32) {
    %c0_i32 = arith.constant 0 : i32
    %c0_i32_0 = arith.constant 0 : i32
    %c0_i32_1 = arith.constant 0 : i32
    return %c0_i32, %c0_i32_0 : i32, i32
  }
  func.func @transform_17(%arg0: i32) -> (i32, i32) {
    %c0_i32 = arith.constant 0 : i32
    %c0_i32_0 = arith.constant 0 : i32
    %c0_i32_1 = arith.constant 0 : i32
    return %c0_i32, %c0_i32_0 : i32, i32
  }
  func.func @transform_18(%arg0: i32) -> (i32, i32) {
    %c0_i32 = arith.constant 0 : i32
    %c0_i32_0 = arith.constant 0 : i32
    %c0_i32_1 = arith.constant 0 : i32
    return %c0_i32, %c0_i32_0 : i32, i32
  }
  func.func @transform_19(%arg0: i32) -> (i32, i32, i32, i32) {
    %c0_i32 = arith.constant 0 : i32
    %c0_i32_0 = arith.constant 0 : i32
    %c0_i32_1 = arith.constant 0 : i32
    %c0_i32_2 = arith.constant 0 : i32
    return %arg0, %c0_i32, %c0_i32_0, %c0_i32_1 : i32, i32, i32, i32
  }
}

</mosaic_0001>

<bundles_post_ra>
// kernel: _lambda_.1
= control target key start
LH: loop header
LB: loop body
LE: loop exit
PB: predicated region body
PF: predicated region fallthrough
CT: control target
= control target key end

     0   :  { %s8161_s0 = inlined_call_operand.vmem [shape: f32[2,16,16,16], index: 0, kind: input, shape index: {}]   ;;  %s8162_s1 = inlined_call_operand.vmem [shape: f32[1,16], index: 1, kind: input, shape index: {}, may-alias: {1,12}]   ;;  %s8163_s2 = inlined_call_operand.vmem [shape: f32[1,16], index: 2, kind: input, shape index: {}, may-alias: {2,13}]   ;;  %s8164_s3 = inlined_call_operand.vmem [shape: f32[16,32], index: 3, kind: input, shape index: {}]   ;;  %s8165_s4 = inlined_call_operand.vmem [shape: f32[1,32], index: 4, kind: input, shape index: {}]   ;;  %s8166_s5 = inlined_call_operand.vmem [shape: f32[9,32], index: 5, kind: input, shape index: {}]   ;;  %s8167_s6 = inlined_call_operand.vmem [shape: f32[1,32], index: 6, kind: input, shape index: {}]   ;;  %s8168_s7 = inlined_call_operand.vmem [shape: f32[16,16], index: 7, kind: input, shape index: {}]   ;;  %s8169_s8 = inlined_call_operand.vmem [shape: f32[1,16], index: 8, kind: input, shape index: {}]   ;;  %s8170_s9 = inlined_call_operand.vmem [shape: f32[16,16], index: 9, kind: input, shape index: {}]   ;;  %s8171_s10 = inlined_call_operand.vmem [shape: f32[1,16], index: 10, kind: input, shape index: {}]   ;;  %s8172_s11 = inlined_call_operand.vmem [shape: f32[1,16], index: 11, kind: input, shape index: {}]   ;;  %s8173_s12 = inlined_call_operand.vmem [shape: f32[1,16], index: 12, kind: input, shape index: {}, may-alias: {1,12}]   ;;  %s8174_s13 = inlined_call_operand.vmem [shape: f32[1,16], index: 13, kind: input, shape index: {}, may-alias: {2,13}]   ;;  %s8175_s14 = inlined_call_operand.vmem [shape: f32[16,32], index: 14, kind: input, shape index: {}]   ;;  %s8176_s15 = inlined_call_operand.vmem [shape: f32[1,32], index: 15, kind: input, shape index: {}]   ;;  %s8177_s16 = inlined_call_operand.vmem [shape: f32[16,16], index: 16, kind: input, shape index: {}]   ;;  %s8178_s17 = inlined_call_operand.vmem [shape: f32[1,16], index: 17, kind: input, shape index: {}]   ;;  %s8179_s18 = inlined_call_operand.vmem [shape: f32[1,16], index: 18, kind: input, shape index: {}]   ;;  %s8180_s19 = inlined_call_operand.vmem [shape: f32[2,16,16,16], index: 19, kind: output, shape index: {}]  }
   0x1   :  { %8207 = sst [smem:[#allocation22_spill]] %s8161_s0  ;;  %s5521_s0 = smov 0  }
   0x2   :  { %8208 = sst [smem:[#allocation23_spill]] %s8162_s1 }
   0x3   :  { %8209 = sst [smem:[#allocation24_spill]] %s8163_s2 }
   0x4   :  { %8210 = sst [smem:[#allocation25_spill]] %s8164_s3 }
   0x5 LB: > { %s4708_s30 = sadd.s32 4294967295, %s5415_s0   ;;  %p4712_p0 = scmp.ge.s32.totalorder %s5415_s0, 1  ;;  %s5415_s0 = sphi %s5521_s0, %s29_s0  }
   0x6   : > { %p537_p1 = scmp.lt.s32.totalorder %s5415_s0, 3 }
   0x8   : > { %p538_p2 = pnand %p4712_p0, %p537_p1 }
   0xa   : > { %541 = sbr.rel (%p538_p2) target bundleno = 2231 (0x8b7), region = 96 }
  0x11   : > { %p593_p3 = scmp.lt.s32.totalorder %s4708_s30, 1  ;;  %vm635_vm0 = vcmask 130048   ;;  %s8211_s22 = sld [smem:[#allocation22_spill]]  ;;  %vm1461_vm1 = vcmask 261120   ;;  %vm1464_vm2 = vcmask 254976   ;;  %vm5420_vm3 = vmmov 0  }
  0x12   : > { %s8212_s25 = sld [smem:[#allocation25_spill]]  ;;  %s8213_s29 = sld [smem:[#allocation23_spill]] }
  0x13   : > { %s8264_s30 = smov (!%p593_p3, %s4708_s30), 1  ;;  %s5418_s1 = smov 112  }
  0x14   : > { %s4860_s20 = sshll.u32 %s8264_s30, 8 }
  0x15   : > { %s7999_s21 = scalar_lea.vmem %s8180_s19, %s4860_s20 }
  0x17   : > { %s5537_s2 = scalar_lea.vmem %s8211_s22, %s4860_s20  ;;  %s8214_s22 = sld [smem:[#allocation24_spill]] }
  0x18   : > { %v5540_v0 = vld [vmem:[%s5537_s2] sm:$0xff]  ;;  %v5543_v1 = vld [vmem:[%s5537_s2 + $0x10] sm:$0xff]  ;;  %v5546_v2 = vld [vmem:[%s5537_s2 + $0x8] sm:$0xff] }
  0x19   : > { %v636_v3 = vsel %vm635_vm0, %v5540_v0, 0.0  ;;  %v642_v4 = vsel %vm635_vm0, %v5543_v1, 0.0  ;;  %v5553_v5 = vld [vmem:[%s5537_s2 + $0x18] sm:$0xff]  ;;  %v639_v6 = vsel %vm635_vm0, %v5546_v2, 0.0  ;;  %v5560_v8 = vld [vmem:[%s5537_s2 + $0x20] sm:$0xff]  ;;  %v5563_v9 = vld [vmem:[%s5537_s2 + $0x28] sm:$0xff] }
  0x1a   : > { %637 = vadd.xlane.f32.xlu0 %v636_v3  ;;  %643 = vadd.xlane.f32.xlu1 %v642_v4  ;;  %v645_v7 = vsel %vm635_vm0, %v5553_v5, 0.0  ;;  %v648_v10 = vsel %vm635_vm0, %v5560_v8, 0.0  ;;  %v651_v11 = vsel %vm635_vm0, %v5563_v9, 0.0  ;;  %v5570_v12 = vld [vmem:[%s5537_s2 + $0x30] sm:$0xff]  ;;  %v5573_v13 = vld [vmem:[%s5537_s2 + $0x38] sm:$0xff]  ;;  %v5580_v16 = vld [vmem:[%s5537_s2 + $0x40] sm:$0xff] }
  0x1b   : > { %v654_v14 = vsel %vm635_vm0, %v5570_v12, 0.0  ;;  %v657_v15 = vsel %vm635_vm0, %v5573_v13, 0.0  ;;  %v5583_v17 = vld [vmem:[%s5537_s2 + $0x48] sm:$0xff]  ;;  %v660_v18 = vsel %vm635_vm0, %v5580_v16, 0.0  ;;  %v5590_v20 = vld [vmem:[%s5537_s2 + $0x50] sm:$0xff]  ;;  %v5593_v21 = vld [vmem:[%s5537_s2 + $0x58] sm:$0xff] }
  0x1c   : > { %v663_v19 = vsel %vm635_vm0, %v5583_v17, 0.0  ;;  %v666_v22 = vsel %vm635_vm0, %v5590_v20, 0.0  ;;  %v669_v23 = vsel %vm635_vm0, %v5593_v21, 0.0  ;;  %v5600_v24 = vld [vmem:[%s5537_s2 + $0x60] sm:$0xff]  ;;  %v5603_v25 = vld [vmem:[%s5537_s2 + $0x68] sm:$0xff]  ;;  %v5610_v28 = vld [vmem:[%s5537_s2 + $0x70] sm:$0xff] }
  0x1d   : > { %v672_v26 = vsel %vm635_vm0, %v5600_v24, 0.0  ;;  %v675_v27 = vsel %vm635_vm0, %v5603_v25, 0.0  ;;  %v5613_v29 = vld [vmem:[%s5537_s2 + $0x78] sm:$0xff]  ;;  %v678_v30 = vsel %vm635_vm0, %v5610_v28, 0.0  ;;  %v5620_v32 = vld [vmem:[%s5537_s2 + $0x80] sm:$0xff]  ;;  %v5623_v33 = vld [vmem:[%s5537_s2 + $0x88] sm:$0xff] }
  0x1e   : > { %640 = vadd.xlane.f32.xlu0 %v639_v6  ;;  %646 = vadd.xlane.f32.xlu1 %v645_v7  ;;  %v681_v31 = vsel %vm635_vm0, %v5613_v29, 0.0  ;;  %v684_v34 = vsel %vm635_vm0, %v5620_v32, 0.0  ;;  %v687_v35 = vsel %vm635_vm0, %v5623_v33, 0.0  ;;  %v5630_v36 = vld [vmem:[%s5537_s2 + $0x90] sm:$0xff]  ;;  %v5633_v37 = vld [vmem:[%s5537_s2 + $0x98] sm:$0xff]  ;;  %v5640_v40 = vld [vmem:[%s5537_s2 + $0xa0] sm:$0xff] }
  0x1f   : > { %v690_v38 = vsel %vm635_vm0, %v5630_v36, 0.0  ;;  %v693_v39 = vsel %vm635_vm0, %v5633_v37, 0.0  ;;  %v5643_v41 = vld [vmem:[%s5537_s2 + $0xa8] sm:$0xff]  ;;  %v696_v42 = vsel %vm635_vm0, %v5640_v40, 0.0  ;;  %v5650_v44 = vld [vmem:[%s5537_s2 + $0xb0] sm:$0xff]  ;;  %v5653_v45 = vld [vmem:[%s5537_s2 + $0xb8] sm:$0xff] }
  0x20   : > { %v699_v43 = vsel %vm635_vm0, %v5643_v41, 0.0  ;;  %v702_v46 = vsel %vm635_vm0, %v5650_v44, 0.0  ;;  %v705_v47 = vsel %vm635_vm0, %v5653_v45, 0.0  ;;  %v5660_v48 = vld [vmem:[%s5537_s2 + $0xc0] sm:$0xff]  ;;  %v5663_v49 = vld [vmem:[%s5537_s2 + $0xc8] sm:$0xff]  ;;  %v5670_v52 = vld [vmem:[%s5537_s2 + $0xd0] sm:$0xff] }
  0x21   : > { %v708_v50 = vsel %vm635_vm0, %v5660_v48, 0.0  ;;  %v711_v51 = vsel %vm635_vm0, %v5663_v49, 0.0  ;;  %v5673_v53 = vld [vmem:[%s5537_s2 + $0xd8] sm:$0xff]  ;;  %v714_v54 = vsel %vm635_vm0, %v5670_v52, 0.0  ;;  %v5680_v56 = vld [vmem:[%s5537_s2 + $0xe0] sm:$0xff]  ;;  %v5683_v57 = vld [vmem:[%s5537_s2 + $0xe8] sm:$0xff] }
  0x22   : > { %649 = vadd.xlane.f32.xlu0 %v648_v10  ;;  %652 = vadd.xlane.f32.xlu1 %v651_v11  ;;  %v717_v55 = vsel %vm635_vm0, %v5673_v53, 0.0  ;;  %v720_v58 = vsel %vm635_vm0, %v5680_v56, 0.0  ;;  %v723_v59 = vsel %vm635_vm0, %v5683_v57, 0.0  ;;  %v5690_v60 = vld [vmem:[%s5537_s2 + $0xf0] sm:$0xff]  ;;  %v5693_v61 = vld [vmem:[%s5537_s2 + $0xf8] sm:$0xff] }
  0x23   : > { %v726_v62 = vsel %vm635_vm0, %v5690_v60, 0.0  ;;  %v729_v63 = vsel %vm635_vm0, %v5693_v61, 0.0 }
  0x26   : > { %655 = vadd.xlane.f32.xlu0 %v654_v14  ;;  %658 = vadd.xlane.f32.xlu1 %v657_v15 }
  0x2a   : > { %661 = vadd.xlane.f32.xlu0 %v660_v18  ;;  %664 = vadd.xlane.f32.xlu1 %v663_v19 }
  0x2e   : > { %667 = vadd.xlane.f32.xlu0 %v666_v22  ;;  %670 = vadd.xlane.f32.xlu1 %v669_v23 }
  0x32   : > { %673 = vadd.xlane.f32.xlu0 %v672_v26  ;;  %676 = vadd.xlane.f32.xlu1 %v675_v27 }
  0x36   : > { %679 = vadd.xlane.f32.xlu0 %v678_v30  ;;  %682 = vadd.xlane.f32.xlu1 %v681_v31 }
  0x3a   : > { %685 = vadd.xlane.f32.xlu0 %v684_v34  ;;  %688 = vadd.xlane.f32.xlu1 %v687_v35 }
  0x3e   : > { %691 = vadd.xlane.f32.xlu0 %v690_v38  ;;  %694 = vadd.xlane.f32.xlu1 %v693_v39 }
  0x42   : > { %697 = vadd.xlane.f32.xlu0 %v696_v42  ;;  %700 = vadd.xlane.f32.xlu1 %v699_v43 }
  0x46   : > { %703 = vadd.xlane.f32.xlu0 %v702_v46  ;;  %706 = vadd.xlane.f32.xlu1 %v705_v47 }
  0x4a   : > { %709 = vadd.xlane.f32.xlu0 %v708_v50  ;;  %712 = vadd.xlane.f32.xlu1 %v711_v51 }
  0x4e   : > { %715 = vadd.xlane.f32.xlu0 %v714_v54  ;;  %718 = vadd.xlane.f32.xlu1 %v717_v55 }
  0x52   : > { %721 = vadd.xlane.f32.xlu0 %v720_v58  ;;  %724 = vadd.xlane.f32.xlu1 %v723_v59 }
  0x56   : > { %727 = vadd.xlane.f32.xlu0 %v726_v62  ;;  %730 = vadd.xlane.f32.xlu1 %v729_v63 }
  0xa7   : > { %v638_v3 = vpop.xlane.xlu0 %637  ;;  %v644_v4 = vpop.xlane.xlu1 %643 }
  0xa8   : > { %v733_v6 = vmul.f32 0.0625, %v638_v3  ;;  %v735_v7 = vmul.f32 0.0625, %v644_v4 }
  0xaa   : > { %v5700_v10 = vsub.f32 %v5540_v0, %v733_v6  ;;  %v5703_v11 = vsub.f32 %v5543_v1, %v735_v7 }
  0xab   : > { %v641_v14 = vpop.xlane.xlu0 %640  ;;  %v647_v15 = vpop.xlane.xlu1 %646 }
  0xac   : > { %v734_v18 = vmul.f32 0.0625, %v641_v14  ;;  %v736_v19 = vmul.f32 0.0625, %v647_v15  ;;  %v797_v22 = vmul.f32 %v5700_v10, %v5700_v10  ;;  %v799_v23 = vmul.f32 %v5703_v11, %v5703_v11 }
  0xae   : > { %v5710_v26 = vsub.f32 %v5546_v2, %v734_v18  ;;  %v5713_v27 = vsub.f32 %v5553_v5, %v736_v19  ;;  %v829_v0 = vsel %vm635_vm0, %v797_v22, 0.0  ;;  %v835_v31 = vsel %vm635_vm0, %v799_v23, 0.0 }
  0xaf   : > { %830 = vadd.xlane.f32.xlu0 %v829_v0  ;;  %v650_v1 = vpop.xlane.xlu0 %649  ;;  %v653_v30 = vpop.xlane.xlu1 %652 }
  0xb0   : > { %v737_v34 = vmul.f32 0.0625, %v650_v1  ;;  %v738_v35 = vmul.f32 0.0625, %v653_v30  ;;  %v798_v38 = vmul.f32 %v5710_v26, %v5710_v26  ;;  %v800_v39 = vmul.f32 %v5713_v27, %v5713_v27 }
  0xb2   : > { %v5722_v2 = vsub.f32 %v5560_v8, %v737_v34  ;;  %v5725_v5 = vsub.f32 %v5563_v9, %v738_v35  ;;  %v832_v42 = vsel %vm635_vm0, %v798_v38, 0.0  ;;  %v838_v47 = vsel %vm635_vm0, %v800_v39, 0.0 }
  0xb3   : > { %836 = vadd.xlane.f32.xlu0 %v835_v31  ;;  %833 = vadd.xlane.f32.xlu1 %v832_v42  ;;  %v656_v43 = vpop.xlane.xlu0 %655  ;;  %v659_v46 = vpop.xlane.xlu1 %658 }
  0xb4   : > { %v739_v50 = vmul.f32 0.0625, %v656_v43  ;;  %v740_v51 = vmul.f32 0.0625, %v659_v46  ;;  %v801_v54 = vmul.f32 %v5722_v2, %v5722_v2  ;;  %v802_v8 = vmul.f32 %v5725_v5, %v5725_v5 }
  0xb6   : > { %v5734_v55 = vsub.f32 %v5570_v12, %v739_v50  ;;  %v5737_v9 = vsub.f32 %v5573_v13, %v740_v51  ;;  %v841_v58 = vsel %vm635_vm0, %v801_v54, 0.0  ;;  %v844_v63 = vsel %vm635_vm0, %v802_v8, 0.0 }
  0xb7   : > { %839 = vadd.xlane.f32.xlu1 %v838_v47  ;;  %842 = vadd.xlane.f32.xlu0 %v841_v58  ;;  %v662_v59 = vpop.xlane.xlu0 %661  ;;  %v665_v62 = vpop.xlane.xlu1 %664 }
  0xb8   : > { %v741_v3 = vmul.f32 0.0625, %v662_v59  ;;  %v742_v4 = vmul.f32 0.0625, %v665_v62  ;;  %v803_v6 = vmul.f32 %v5734_v55, %v5734_v55  ;;  %v804_v12 = vmul.f32 %v5737_v9, %v5737_v9 }
  0xba   : > { %v5746_v7 = vsub.f32 %v5580_v16, %v741_v3  ;;  %v5749_v13 = vsub.f32 %v5583_v17, %v742_v4  ;;  %v847_v14 = vsel %vm635_vm0, %v803_v6, 0.0  ;;  %v850_v19 = vsel %vm635_vm0, %v804_v12, 0.0 }
  0xbb   : > { %845 = vadd.xlane.f32.xlu1 %v844_v63  ;;  %848 = vadd.xlane.f32.xlu0 %v847_v14  ;;  %v668_v15 = vpop.xlane.xlu0 %667  ;;  %v671_v18 = vpop.xlane.xlu1 %670 }
  0xbc   : > { %v743_v22 = vmul.f32 0.0625, %v668_v15  ;;  %v744_v23 = vmul.f32 0.0625, %v671_v18  ;;  %v805_v0 = vmul.f32 %v5746_v7, %v5746_v7  ;;  %v806_v16 = vmul.f32 %v5749_v13, %v5749_v13 }
  0xbe   : > { %v5758_v1 = vsub.f32 %v5590_v20, %v743_v22  ;;  %v5761_v17 = vsub.f32 %v5593_v21, %v744_v23  ;;  %v853_v30 = vsel %vm635_vm0, %v805_v0, 0.0  ;;  %v856_v35 = vsel %vm635_vm0, %v806_v16, 0.0 }
  0xbf   : > { %851 = vadd.xlane.f32.xlu1 %v850_v19  ;;  %854 = vadd.xlane.f32.xlu0 %v853_v30  ;;  %v674_v31 = vpop.xlane.xlu0 %673  ;;  %v677_v34 = vpop.xlane.xlu1 %676 }
  0xc0   : > { %v745_v38 = vmul.f32 0.0625, %v674_v31  ;;  %v746_v39 = vmul.f32 0.0625, %v677_v34  ;;  %v807_v42 = vmul.f32 %v5758_v1, %v5758_v1  ;;  %v808_v20 = vmul.f32 %v5761_v17, %v5761_v17 }
  0xc2   : > { %v5770_v43 = vsub.f32 %v5600_v24, %v745_v38  ;;  %v5773_v21 = vsub.f32 %v5603_v25, %v746_v39  ;;  %v859_v46 = vsel %vm635_vm0, %v807_v42, 0.0  ;;  %v862_v51 = vsel %vm635_vm0, %v808_v20, 0.0 }
  0xc3   : > { %857 = vadd.xlane.f32.xlu1 %v856_v35  ;;  %860 = vadd.xlane.f32.xlu0 %v859_v46  ;;  %v680_v47 = vpop.xlane.xlu0 %679  ;;  %v683_v50 = vpop.xlane.xlu1 %682 }
  0xc4   : > { %v747_v54 = vmul.f32 0.0625, %v680_v47  ;;  %v748_v8 = vmul.f32 0.0625, %v683_v50  ;;  %v809_v58 = vmul.f32 %v5770_v43, %v5770_v43  ;;  %v810_v24 = vmul.f32 %v5773_v21, %v5773_v21  ;;  %v1132_v47 = vld [vmem:[%s8212_s25 + $0x8] sm:$0xff] }
  0xc6   : > { %v5782_v59 = vsub.f32 %v5610_v28, %v747_v54  ;;  %v5785_v25 = vsub.f32 %v5613_v29, %v748_v8  ;;  %v865_v62 = vsel %vm635_vm0, %v809_v58, 0.0  ;;  %v868_v4 = vsel %vm635_vm0, %v810_v24, 0.0 }
  0xc7   : > { %863 = vadd.xlane.f32.xlu1 %v862_v51  ;;  %866 = vadd.xlane.f32.xlu0 %v865_v62  ;;  %v686_v63 = vpop.xlane.xlu0 %685  ;;  %v689_v3 = vpop.xlane.xlu1 %688 }
  0xc8   : > { %v749_v6 = vmul.f32 0.0625, %v686_v63  ;;  %v750_v12 = vmul.f32 0.0625, %v689_v3  ;;  %v811_v14 = vmul.f32 %v5782_v59, %v5782_v59  ;;  %v812_v28 = vmul.f32 %v5785_v25, %v5785_v25 }
  0xca   : > { %v5794_v15 = vsub.f32 %v5620_v32, %v749_v6  ;;  %v5797_v29 = vsub.f32 %v5623_v33, %v750_v12  ;;  %v871_v18 = vsel %vm635_vm0, %v811_v14, 0.0  ;;  %v874_v23 = vsel %vm635_vm0, %v812_v28, 0.0 }
  0xcb   : > { %869 = vadd.xlane.f32.xlu1 %v868_v4  ;;  %872 = vadd.xlane.f32.xlu0 %v871_v18  ;;  %v692_v19 = vpop.xlane.xlu0 %691  ;;  %v695_v22 = vpop.xlane.xlu1 %694 }
  0xcc   : > { %v751_v0 = vmul.f32 0.0625, %v692_v19  ;;  %v752_v16 = vmul.f32 0.0625, %v695_v22  ;;  %v813_v30 = vmul.f32 %v5794_v15, %v5794_v15  ;;  %v814_v32 = vmul.f32 %v5797_v29, %v5797_v29 }
  0xce   : > { %v5806_v31 = vsub.f32 %v5630_v36, %v751_v0  ;;  %v5809_v33 = vsub.f32 %v5633_v37, %v752_v16  ;;  %v877_v34 = vsel %vm635_vm0, %v813_v30, 0.0  ;;  %v880_v39 = vsel %vm635_vm0, %v814_v32, 0.0  ;;  %v1131_v37 = vld [vmem:[%s8212_s25] sm:$0xff] }
  0xcf   : > { %875 = vadd.xlane.f32.xlu1 %v874_v23  ;;  %878 = vadd.xlane.f32.xlu0 %v877_v34  ;;  %v698_v35 = vpop.xlane.xlu0 %697  ;;  %v701_v38 = vpop.xlane.xlu1 %700  ;;  %v5216_v50 = vpack.c.bf16 %v1132_v47, %v1131_v37 }
  0xd0   : > { %v753_v42 = vmul.f32 0.0625, %v698_v35  ;;  %v754_v20 = vmul.f32 0.0625, %v701_v38  ;;  %v815_v46 = vmul.f32 %v5806_v31, %v5806_v31  ;;  %v816_v36 = vmul.f32 %v5809_v33, %v5809_v33 }
  0xd1   : > { %5217 = vmatprep.subr.bf16.mxu0 %v5216_v50 }
  0xd2   : > { %v5824_v51 = vsub.f32 %v5640_v40, %v753_v42  ;;  %v5827_v54 = vsub.f32 %v5643_v41, %v754_v20  ;;  %v883_v8 = vsel %vm635_vm0, %v815_v46, 0.0  ;;  %v886_v62 = vsel %vm635_vm0, %v816_v36, 0.0  ;;  %5219 = vmatpush3.bf16.msra.mxu0 %v5216_v50 }
  0xd3   : > { %881 = vadd.xlane.f32.xlu1 %v880_v39  ;;  %884 = vadd.xlane.f32.xlu0 %v883_v8  ;;  %v704_v58 = vpop.xlane.xlu0 %703  ;;  %v707_v24 = vpop.xlane.xlu1 %706 }
  0xd4   : > { %v755_v63 = vmul.f32 0.0625, %v704_v58  ;;  %v756_v3 = vmul.f32 0.0625, %v707_v24  ;;  %v817_v4 = vmul.f32 %v5824_v51, %v5824_v51  ;;  %v818_v40 = vmul.f32 %v5827_v54, %v5827_v54 }
  0xd6   : > { %v5836_v41 = vsub.f32 %v5650_v44, %v755_v63  ;;  %v5839_v6 = vsub.f32 %v5653_v45, %v756_v3  ;;  %v889_v12 = vsel %vm635_vm0, %v817_v4, 0.0  ;;  %v892_v18 = vsel %vm635_vm0, %v818_v40, 0.0 }
  0xd7   : > { %887 = vadd.xlane.f32.xlu1 %v886_v62  ;;  %890 = vadd.xlane.f32.xlu0 %v889_v12  ;;  %v710_v14 = vpop.xlane.xlu0 %709  ;;  %v713_v28 = vpop.xlane.xlu1 %712 }
  0xd8   : > { %v757_v19 = vmul.f32 0.0625, %v710_v14  ;;  %v758_v22 = vmul.f32 0.0625, %v713_v28  ;;  %v819_v23 = vmul.f32 %v5836_v41, %v5836_v41  ;;  %v820_v44 = vmul.f32 %v5839_v6, %v5839_v6 }
  0xda   : > { %v5848_v0 = vsub.f32 %v5660_v48, %v757_v19  ;;  %v5851_v45 = vsub.f32 %v5663_v49, %v758_v22  ;;  %v895_v16 = vsel %vm635_vm0, %v819_v23, 0.0  ;;  %v898_v34 = vsel %vm635_vm0, %v820_v44, 0.0 }
  0xdb   : > { %893 = vadd.xlane.f32.xlu1 %v892_v18  ;;  %896 = vadd.xlane.f32.xlu0 %v895_v16  ;;  %v716_v30 = vpop.xlane.xlu0 %715  ;;  %v719_v32 = vpop.xlane.xlu1 %718 }
  0xdc   : > { %v759_v35 = vmul.f32 0.0625, %v716_v30  ;;  %v760_v38 = vmul.f32 0.0625, %v719_v32  ;;  %v821_v39 = vmul.f32 %v5848_v0, %v5848_v0  ;;  %v822_v48 = vmul.f32 %v5851_v45, %v5851_v45 }
  0xde   : > { %v5860_v42 = vsub.f32 %v5670_v52, %v759_v35  ;;  %v5863_v49 = vsub.f32 %v5673_v53, %v760_v38  ;;  %v901_v20 = vsel %vm635_vm0, %v821_v39, 0.0  ;;  %v904_v37 = vsel %vm635_vm0, %v822_v48, 0.0 }
  0xdf   : > { %899 = vadd.xlane.f32.xlu1 %v898_v34  ;;  %902 = vadd.xlane.f32.xlu0 %v901_v20  ;;  %v722_v46 = vpop.xlane.xlu0 %721  ;;  %v725_v36 = vpop.xlane.xlu1 %724 }
  0xe0   : > { %v761_v47 = vmul.f32 0.0625, %v722_v46  ;;  %v762_v50 = vmul.f32 0.0625, %v725_v36  ;;  %v823_v8 = vmul.f32 %v5860_v42, %v5860_v42  ;;  %v824_v52 = vmul.f32 %v5863_v49, %v5863_v49 }
  0xe2   : > { %v5872_v58 = vsub.f32 %v5680_v56, %v761_v47  ;;  %v5875_v53 = vsub.f32 %v5683_v57, %v762_v50  ;;  %v907_v24 = vsel %vm635_vm0, %v823_v8, 0.0  ;;  %v910_v3 = vsel %vm635_vm0, %v824_v52, 0.0 }
  0xe3   : > { %905 = vadd.xlane.f32.xlu1 %v904_v37  ;;  %908 = vadd.xlane.f32.xlu0 %v907_v24  ;;  %v728_v62 = vpop.xlane.xlu0 %727  ;;  %v731_v63 = vpop.xlane.xlu1 %730 }
  0xe4   : > { %v763_v4 = vmul.f32 0.0625, %v728_v62  ;;  %v764_v40 = vmul.f32 0.0625, %v731_v63  ;;  %v825_v12 = vmul.f32 %v5872_v58, %v5872_v58  ;;  %v826_v56 = vmul.f32 %v5875_v53, %v5875_v53 }
  0xe6   : > { %v5884_v14 = vsub.f32 %v5690_v60, %v763_v4  ;;  %v5887_v57 = vsub.f32 %v5693_v61, %v764_v40  ;;  %v913_v28 = vsel %vm635_vm0, %v825_v12, 0.0  ;;  %v916_v18 = vsel %vm635_vm0, %v826_v56, 0.0  ;;  %v5900_v4 = vld [vmem:[%s8213_s29] ss:$0 sm:$0xff] }
  0xe7   : > { %911 = vadd.xlane.f32.xlu1 %v910_v3  ;;  %914 = vadd.xlane.f32.xlu0 %v913_v28 }
  0xe8   : > { %v827_v19 = vmul.f32 %v5884_v14, %v5884_v14  ;;  %v828_v22 = vmul.f32 %v5887_v57, %v5887_v57 }
  0xea   : > { %v919_v23 = vsel %vm635_vm0, %v827_v19, 0.0  ;;  %v922_v60 = vsel %vm635_vm0, %v828_v22, 0.0  ;;  %v5906_v19 = vld [vmem:[%s8214_s22] ss:$0 sm:$0xff] }
  0xeb   : > { %917 = vadd.xlane.f32.xlu1 %v916_v18  ;;  %920 = vadd.xlane.f32.xlu0 %v919_v23 }
  0xef   : > { %923 = vadd.xlane.f32.xlu1 %v922_v60 }
 0x13c   : > { %v831_v61 = vpop.xlane.xlu0 %830 }
 0x13d   : > { %v925_v44 = vmul.f32 0.0625, %v831_v61 }
 0x13f   : > { %v957_v16 = vadd.f32 1e-06, %v925_v44 }
 0x140   : > { %v834_v30 = vpop.xlane.xlu1 %833  ;;  %v837_v32 = vpop.xlane.xlu0 %836 }
 0x141   : > { %5247 = vrsqrt.f32 %v957_v16  ;;  %v926_v34 = vmul.f32 0.0625, %v834_v30  ;;  %v927_v35 = vmul.f32 0.0625, %v837_v32 }
 0x143   : > { %v958_v38 = vadd.f32 1e-06, %v926_v34  ;;  %v959_v39 = vadd.f32 1e-06, %v927_v35 }
 0x144   : > { %v840_v48 = vpop.xlane.xlu1 %839  ;;  %v843_v20 = vpop.xlane.xlu0 %842 }
 0x145   : > { %5249 = vrsqrt.f32 %v958_v38  ;;  %v928_v46 = vmul.f32 0.0625, %v840_v48  ;;  %v929_v36 = vmul.f32 0.0625, %v843_v20 }
 0x146   : > { %5251 = vrsqrt.f32 %v959_v39 }
 0x147   : > { %v960_v37 = vadd.f32 1e-06, %v928_v46  ;;  %v961_v47 = vadd.f32 1e-06, %v929_v36 }
 0x148   : > { %v846_v50 = vpop.xlane.xlu1 %845  ;;  %v849_v8 = vpop.xlane.xlu0 %848 }
 0x149   : > { %5253 = vrsqrt.f32 %v960_v37  ;;  %v930_v52 = vmul.f32 0.0625, %v846_v50  ;;  %v931_v24 = vmul.f32 0.0625, %v849_v8 }
 0x14a   : > { %5255 = vrsqrt.f32 %v961_v47 }
 0x14b   : > { %v5248_v62 = vpop.eup %5247  ;;  %v962_v63 = vadd.f32 1e-06, %v930_v52  ;;  %v963_v3 = vadd.f32 1e-06, %v931_v24 }
 0x14c   : > { %v852_v40 = vpop.xlane.xlu1 %851  ;;  %v855_v12 = vpop.xlane.xlu0 %854  ;;  %v1021_v56 = vmul.f32 %v5248_v62, %v5700_v10 }
 0x14d   : > { %5257 = vrsqrt.f32 %v962_v63  ;;  %v932_v28 = vmul.f32 0.0625, %v852_v40  ;;  %v933_v18 = vmul.f32 0.0625, %v855_v12 }
 0x14e   : > { %5259 = vrsqrt.f32 %v963_v3  ;;  %v1060_v22 = vmul.f32 %v5900_v4, %v1021_v56 }
 0x14f   : > { %v5250_v23 = vpop.eup %5249  ;;  %v964_v60 = vadd.f32 1e-06, %v932_v28  ;;  %v965_v61 = vadd.f32 1e-06, %v933_v18 }
 0x150   : > { %v5252_v44 = vpop.eup %5251  ;;  %v858_v16 = vpop.xlane.xlu1 %857  ;;  %v1099_v32 = vadd.f32 %v5906_v19, %v1060_v22  ;;  %v1022_v10 = vmul.f32 %v5250_v23, %v5710_v26 }
 0x151   : > { %v861_v30 = vpop.xlane.xlu0 %860  ;;  %5261 = vrsqrt.f32 %v964_v60  ;;  %v934_v34 = vmul.f32 0.0625, %v858_v16  ;;  %v1023_v38 = vmul.f32 %v5252_v44, %v5703_v11 }
 0x152   : > { %v935_v35 = vmul.f32 0.0625, %v861_v30  ;;  %5263 = vrsqrt.f32 %v965_v61  ;;  %5005 = vmatprep.mubr.msk.f32.mxu0 %vm635_vm0, %v1099_v32  ;;  %v1061_v39 = vmul.f32 %v5900_v4, %v1022_v10 }
 0x153   : > { %v5254_v48 = vpop.eup %5253  ;;  %v966_v20 = vadd.f32 1e-06, %v934_v34  ;;  %v1062_v36 = vmul.f32 %v5900_v4, %v1023_v38 }
 0x154   : > { %v967_v46 = vadd.f32 1e-06, %v935_v35  ;;  %v5256_v37 = vpop.eup %5255  ;;  %v864_v47 = vpop.xlane.xlu1 %863  ;;  %v1100_v26 = vadd.f32 %v5906_v19, %v1061_v39  ;;  %v1024_v8 = vmul.f32 %v5254_v48, %v5713_v27 }
 0x155   : > { %v867_v50 = vpop.xlane.xlu0 %866  ;;  %5265 = vrsqrt.f32 %v966_v20  ;;  %v936_v52 = vmul.f32 0.0625, %v864_v47  ;;  %v1101_v24 = vadd.f32 %v5906_v19, %v1062_v36  ;;  %v1025_v63 = vmul.f32 %v5256_v37, %v5722_v2 }
 0x156   : > { %v937_v11 = vmul.f32 0.0625, %v867_v50  ;;  %5267 = vrsqrt.f32 %v967_v46  ;;  %5006 = vmatmul.mubr.msk.f32.vlgmr.msra.gmra.mrb[0].mxu0 %vm635_vm0, %v1100_v26  ;;  %v1063_v62 = vmul.f32 %v5900_v4, %v1024_v8 }
 0x157   : > { %v5258_v3 = vpop.eup %5257  ;;  %v968_v40 = vadd.f32 1e-06, %v936_v52  ;;  %5008 = vmatprep.mubr.msk.f32.mxu0 %vm635_vm0, %v1101_v24  ;;  %v1064_v22 = vmul.f32 %v5900_v4, %v1025_v63 }
 0x158   : > { %v969_v12 = vadd.f32 1e-06, %v937_v11  ;;  %v5260_v56 = vpop.eup %5259  ;;  %v870_v28 = vpop.xlane.xlu1 %869  ;;  %v1102_v18 = vadd.f32 %v5906_v19, %v1063_v62  ;;  %v1026_v23 = vmul.f32 %v5258_v3, %v5725_v5 }
 0x159   : > { %v873_v27 = vpop.xlane.xlu0 %872  ;;  %5269 = vrsqrt.f32 %v968_v40  ;;  %v938_v60 = vmul.f32 0.0625, %v870_v28  ;;  %v1027_v44 = vmul.f32 %v5260_v56, %v5734_v55  ;;  %v1103_v2 = vadd.f32 %v5906_v19, %v1064_v22 }
 0x15a   : > { %v939_v61 = vmul.f32 0.0625, %v873_v27  ;;  %5271 = vrsqrt.f32 %v969_v12  ;;  %5009 = vmatmul.mubr.msk.f32.gmra.mrb[2].mxu0 %vm635_vm0, %v1102_v18  ;;  %v1065_v16 = vmul.f32 %v5900_v4, %v1026_v23 }
 0x15b   : > { %v5262_v30 = vpop.eup %5261  ;;  %v970_v32 = vadd.f32 1e-06, %v938_v60  ;;  %v1066_v34 = vmul.f32 %v5900_v4, %v1027_v44  ;;  %5011 = vmatprep.mubr.msk.f32.mxu0 %vm635_vm0, %v1103_v2 }
 0x15c   : > { %v971_v10 = vadd.f32 1e-06, %v939_v61  ;;  %v5264_v35 = vpop.eup %5263  ;;  %v876_v5 = vpop.xlane.xlu1 %875  ;;  %v1104_v39 = vadd.f32 %v5906_v19, %v1065_v16  ;;  %v1028_v55 = vmul.f32 %v5262_v30, %v5737_v9 }
 0x15d   : > { %v879_v38 = vpop.xlane.xlu0 %878  ;;  %5273 = vrsqrt.f32 %v970_v32  ;;  %v940_v48 = vmul.f32 0.0625, %v876_v5  ;;  %v1105_v46 = vadd.f32 %v5906_v19, %v1066_v34  ;;  %v1029_v37 = vmul.f32 %v5264_v35, %v5746_v7 }
 0x15e   : > { %v941_v20 = vmul.f32 0.0625, %v879_v38  ;;  %5275 = vrsqrt.f32 %v971_v10  ;;  %5012 = vmatmul.mubr.msk.f32.gmra.mrb[4].mxu0 %vm635_vm0, %v1104_v39  ;;  %v1067_v36 = vmul.f32 %v5900_v4, %v1028_v55 }
 0x15f   : > { %v5266_v47 = vpop.eup %5265  ;;  %v972_v50 = vadd.f32 1e-06, %v940_v48  ;;  %5014 = vmatprep.mubr.msk.f32.mxu0 %vm635_vm0, %v1105_v46  ;;  %v1068_v24 = vmul.f32 %v5900_v4, %v1029_v37 }
 0x160   : > { %v973_v26 = vadd.f32 1e-06, %v941_v20  ;;  %v5268_v8 = vpop.eup %5267  ;;  %v882_v52 = vpop.xlane.xlu1 %881  ;;  %v1106_v11 = vadd.f32 %v5906_v19, %v1067_v36  ;;  %v1030_v62 = vmul.f32 %v5266_v47, %v5749_v13 }
 0x161   : > { %v885_v9 = vpop.xlane.xlu0 %884  ;;  %5277 = vrsqrt.f32 %v972_v50  ;;  %v942_v63 = vmul.f32 0.0625, %v882_v52  ;;  %v1031_v40 = vmul.f32 %v5268_v8, %v5758_v1  ;;  %v1107_v7 = vadd.f32 %v5906_v19, %v1068_v24 }
 0x162   : > { %v943_v3 = vmul.f32 0.0625, %v885_v9  ;;  %5279 = vrsqrt.f32 %v973_v26  ;;  %5015 = vmatmul.mubr.msk.f32.gmra.mrb[6].mxu0 %vm635_vm0, %v1106_v11  ;;  %v1069_v12 = vmul.f32 %v5900_v4, %v1030_v62 }
 0x163   : > { %v5270_v56 = vpop.eup %5269  ;;  %v974_v28 = vadd.f32 1e-06, %v942_v63  ;;  %v1070_v18 = vmul.f32 %v5900_v4, %v1031_v40  ;;  %5017 = vmatprep.mubr.msk.f32.mxu0 %vm635_vm0, %v1107_v7 }
 0x164   : > { %v975_v27 = vadd.f32 1e-06, %v943_v3  ;;  %v5272_v22 = vpop.eup %5271  ;;  %v888_v13 = vpop.xlane.xlu1 %887  ;;  %v1108_v60 = vadd.f32 %v5906_v19, %v1069_v12  ;;  %v1032_v1 = vmul.f32 %v5270_v56, %v5761_v17 }
 0x165   : > { %v891_v23 = vpop.xlane.xlu0 %890  ;;  %5281 = vrsqrt.f32 %v974_v28  ;;  %v944_v61 = vmul.f32 0.0625, %v888_v13  ;;  %v1109_v2 = vadd.f32 %v5906_v19, %v1070_v18  ;;  %v1033_v30 = vmul.f32 %v5272_v22, %v5770_v43 }
 0x166   : > { %v945_v44 = vmul.f32 0.0625, %v891_v23  ;;  %5283 = vrsqrt.f32 %v975_v27  ;;  %5018 = vmatmul.mubr.msk.f32.gmra.mrb[8].mxu0 %vm635_vm0, %v1108_v60  ;;  %v1071_v16 = vmul.f32 %v5900_v4, %v1032_v1 }
 0x167   : > { %v5274_v32 = vpop.eup %5273  ;;  %v976_v10 = vadd.f32 1e-06, %v944_v61  ;;  %5020 = vmatprep.mubr.msk.f32.mxu0 %vm635_vm0, %v1109_v2  ;;  %v1072_v39 = vmul.f32 %v5900_v4, %v1033_v30 }
 0x168   : > { %v977_v34 = vadd.f32 1e-06, %v945_v44  ;;  %v5276_v35 = vpop.eup %5275  ;;  %v894_v5 = vpop.xlane.xlu1 %893  ;;  %v1110_v38 = vadd.f32 %v5906_v19, %v1071_v16  ;;  %v1034_v55 = vmul.f32 %v5274_v32, %v5773_v21 }
 0x169   : > { %v897_v17 = vpop.xlane.xlu0 %896  ;;  %5285 = vrsqrt.f32 %v976_v10  ;;  %v946_v48 = vmul.f32 0.0625, %v894_v5  ;;  %v1035_v46 = vmul.f32 %v5276_v35, %v5782_v59  ;;  %v1111_v43 = vadd.f32 %v5906_v19, %v1072_v39 }
 0x16a   : > { %v947_v20 = vmul.f32 0.0625, %v897_v17  ;;  %5287 = vrsqrt.f32 %v977_v34  ;;  %5021 = vmatmul.mubr.msk.f32.gmra.mrb[10].mxu0 %vm635_vm0, %v1110_v38  ;;  %v1073_v36 = vmul.f32 %v5900_v4, %v1034_v55 }
 0x16b   : > { %v5278_v37 = vpop.eup %5277  ;;  %v978_v47 = vadd.f32 1e-06, %v946_v48  ;;  %v1074_v26 = vmul.f32 %v5900_v4, %v1035_v46  ;;  %5023 = vmatprep.mubr.msk.f32.mxu0 %vm635_vm0, %v1111_v43 }
 0x16c   : > { %v979_v50 = vadd.f32 1e-06, %v947_v20  ;;  %v5280_v8 = vpop.eup %5279  ;;  %v900_v21 = vpop.xlane.xlu1 %899  ;;  %v1112_v9 = vadd.f32 %v5906_v19, %v1073_v36  ;;  %v1036_v59 = vmul.f32 %v5278_v37, %v5785_v25 }
 0x16d   : > { %v903_v52 = vpop.xlane.xlu0 %902  ;;  %5289 = vrsqrt.f32 %v978_v47  ;;  %v948_v11 = vmul.f32 0.0625, %v900_v21  ;;  %v1113_v62 = vadd.f32 %v5906_v19, %v1074_v26  ;;  %v1037_v3 = vmul.f32 %v5280_v8, %v5794_v15 }
 0x16e   : > { %v949_v24 = vmul.f32 0.0625, %v903_v52  ;;  %5291 = vrsqrt.f32 %v979_v50  ;;  %5024 = vmatmul.mubr.msk.f32.gmra.mrb[12].mxu0 %vm635_vm0, %v1112_v9  ;;  %v1075_v63 = vmul.f32 %v5900_v4, %v1036_v59 }
 0x16f   : > { %v5282_v40 = vpop.eup %5281  ;;  %v980_v7 = vadd.f32 1e-06, %v948_v11  ;;  %5026 = vmatprep.mubr.msk.f32.mxu0 %vm635_vm0, %v1113_v62  ;;  %v1076_v18 = vmul.f32 %v5900_v4, %v1037_v3 }
 0x170   : > { %v981_v12 = vadd.f32 1e-06, %v949_v24  ;;  %v5284_v56 = vpop.eup %5283  ;;  %v906_v28 = vpop.xlane.xlu1 %905  ;;  %v1114_v27 = vadd.f32 %v5906_v19, %v1075_v63  ;;  %v1038_v22 = vmul.f32 %v5282_v40, %v5797_v29 }
 0x171   : > { %v909_v25 = vpop.xlane.xlu0 %908  ;;  %5293 = vrsqrt.f32 %v980_v7  ;;  %v950_v13 = vmul.f32 0.0625, %v906_v28  ;;  %v1039_v60 = vmul.f32 %v5284_v56, %v5806_v31  ;;  %v1115_v15 = vadd.f32 %v5906_v19, %v1076_v18 }
 0x172   : > { %v951_v23 = vmul.f32 0.0625, %v909_v25  ;;  %5295 = vrsqrt.f32 %v981_v12  ;;  %5027 = vmatmul.mubr.msk.f32.gmra.mrb[14].mxu0 %vm635_vm0, %v1114_v27  ;;  %v1077_v1 = vmul.f32 %v5900_v4, %v1038_v22 }
 0x173   : > { %v5286_v61 = vpop.eup %5285  ;;  %v982_v44 = vadd.f32 1e-06, %v950_v13  ;;  %v1078_v16 = vmul.f32 %v5900_v4, %v1039_v60  ;;  %5029 = vmatprep.mubr.msk.f32.mxu0 %vm635_vm0, %v1115_v15 }
 0x174   : > { %v983_v2 = vadd.f32 1e-06, %v951_v23  ;;  %v5288_v30 = vpop.eup %5287  ;;  %v912_v29 = vpop.xlane.xlu1 %911  ;;  %v1116_v10 = vadd.f32 %v5906_v19, %v1077_v1  ;;  %v1040_v31 = vmul.f32 %v5286_v61, %v5809_v33 }
 0x175   : > { %v915_v32 = vpop.xlane.xlu0 %914  ;;  %5297 = vrsqrt.f32 %v982_v44  ;;  %v952_v34 = vmul.f32 0.0625, %v912_v29  ;;  %v1117_v5 = vadd.f32 %v5906_v19, %v1078_v16  ;;  %v1041_v38 = vmul.f32 %v5288_v30, %v5824_v51 }
 0x176   : > { %v953_v35 = vmul.f32 0.0625, %v915_v32  ;;  %5299 = vrsqrt.f32 %v983_v2  ;;  %5030 = vmatmul.mubr.msk.f32.gmra.mrb[16].mxu0 %vm635_vm0, %v1116_v10  ;;  %v1079_v17 = vmul.f32 %v5900_v4, %v1040_v31 }
 0x177   : > { %v5290_v39 = vpop.eup %5289  ;;  %v984_v55 = vadd.f32 1e-06, %v952_v34  ;;  %5032 = vmatprep.mubr.msk.f32.mxu0 %vm635_vm0, %v1117_v5  ;;  %v1080_v36 = vmul.f32 %v5900_v4, %v1041_v38  ;;  %v8183_v5 = vmov 0.0   ;;  %v1550_v38 = vld [vmem:[%s8166_s5] sm:$0xff] }
 0x178   : > { %v985_v48 = vadd.f32 1e-06, %v953_v35  ;;  %v5292_v20 = vpop.eup %5291  ;;  %v918_v46 = vpop.xlane.xlu1 %917  ;;  %v1118_v43 = vadd.f32 %v5906_v19, %v1079_v17  ;;  %v1042_v37 = vmul.f32 %v5290_v39, %v5827_v54  ;;  %1467 = vst.msk [vmem:[#allocation2 + $0x20] sm:$0xff] %vm1461_vm1, %v8183_v5  ;;  %1462 = vst.msk [vmem:[#allocation2] sm:$0xff] %vm1461_vm1, %v8183_v5 }
 0x179   : > { %v921_v33 = vpop.xlane.xlu0 %920  ;;  %5301 = vrsqrt.f32 %v984_v55  ;;  %v954_v47 = vmul.f32 0.0625, %v918_v46  ;;  %v1043_v26 = vmul.f32 %v5292_v20, %v5836_v41  ;;  %v1119_v51 = vadd.f32 %v5906_v19, %v1080_v36  ;;  %1468 = vst.msk [vmem:[#allocation2 + $0x28] sm:$0x3] %vm1464_vm2, %v8183_v5  ;;  %1465 = vst.msk [vmem:[#allocation2 + $0x10] sm:$0x3] %vm1464_vm2, %v8183_v5 }
 0x17a   : > { %v955_v50 = vmul.f32 0.0625, %v921_v33  ;;  %5303 = vrsqrt.f32 %v985_v48  ;;  %5033 = vmatmul.mubr.msk.f32.gmra.mrb[18].mxu0 %vm635_vm0, %v1118_v43  ;;  %v1081_v8 = vmul.f32 %v5900_v4, %v1042_v37  ;;  %1463 = vst.msk [vmem:[#allocation2 + $0x8] sm:$0xff] %vm1461_vm1, %v8183_v5  ;;  %1466 = vst.msk [vmem:[#allocation2 + $0x18] sm:$0xff] %vm1461_vm1, %v8183_v5  ;;  %v6159_v48 = vld [vmem:[%s8165_s4] ss:$0 sm:$0xff] }
 0x17b   : > { %v5294_v21 = vpop.eup %5293  ;;  %v986_v52 = vadd.f32 1e-06, %v954_v47  ;;  %v1082_v59 = vmul.f32 %v5900_v4, %v1043_v26  ;;  %5035 = vmatprep.mubr.msk.f32.mxu0 %vm635_vm0, %v1119_v51  ;;  %1469 = vst.msk [vmem:[#allocation2 + $0x30] sm:$0xff] %vm1461_vm1, %v8183_v5  ;;  %1470 = vst.msk [vmem:[#allocation2 + $0x38] sm:$0xff] %vm1461_vm1, %v8183_v5 }
 0x17c   : > { %v987_v9 = vadd.f32 1e-06, %v955_v50  ;;  %v5296_v11 = vpop.eup %5295  ;;  %v924_v54 = vpop.xlane.xlu1 %923  ;;  %v1120_v24 = vadd.f32 %v5906_v19, %v1081_v8  ;;  %v1044_v41 = vmul.f32 %v5294_v21, %v5839_v6  ;;  %1471 = vst.msk [vmem:[#allocation2 + $0x40] sm:$0x3] %vm1464_vm2, %v8183_v5  ;;  %1474 = vst.msk [vmem:[#allocation2 + $0x58] sm:$0x3] %vm1464_vm2, %v8183_v5 }
 0x17d   : > { %5305 = vrsqrt.f32 %v986_v52  ;;  %v956_v62 = vmul.f32 0.0625, %v924_v54  ;;  %v1121_v63 = vadd.f32 %v5906_v19, %v1082_v59  ;;  %v1045_v3 = vmul.f32 %v5296_v11, %v5848_v0  ;;  %1472 = vst.msk [vmem:[#allocation2 + $0x48] sm:$0xff] %vm1461_vm1, %v8183_v5  ;;  %1473 = vst.msk [vmem:[#allocation2 + $0x50] sm:$0xff] %vm1461_vm1, %v8183_v5 }
 0x17e   : > { %5307 = vrsqrt.f32 %v987_v9  ;;  %5036 = vmatmul.mubr.msk.f32.gmra.mrb[20].mxu0 %vm635_vm0, %v1120_v24  ;;  %v1083_v40 = vmul.f32 %v5900_v4, %v1044_v41  ;;  %1475 = vst.msk [vmem:[#allocation2 + $0x60] sm:$0xff] %vm1461_vm1, %v8183_v5  ;;  %1476 = vst.msk [vmem:[#allocation2 + $0x68] sm:$0xff] %vm1461_vm1, %v8183_v5 }
 0x17f   : > { %v5298_v7 = vpop.eup %5297  ;;  %v988_v12 = vadd.f32 1e-06, %v956_v62  ;;  %5038 = vmatprep.mubr.msk.f32.mxu0 %vm635_vm0, %v1121_v63  ;;  %v1084_v56 = vmul.f32 %v5900_v4, %v1045_v3  ;;  %1477 = vst.msk [vmem:[#allocation2 + $0x70] sm:$0x3] %vm1464_vm2, %v8183_v5  ;;  %1480 = vst.msk [vmem:[#allocation2 + $0x88] sm:$0x3] %vm1464_vm2, %v8183_v5 }
 0x180   : > { %v5300_v28 = vpop.eup %5299  ;;  %v1122_v6 = vadd.f32 %v5906_v19, %v1083_v40  ;;  %v1046_v25 = vmul.f32 %v5298_v7, %v5851_v45  ;;  %1478 = vst.msk [vmem:[#allocation2 + $0x78] sm:$0xff] %vm1461_vm1, %v8183_v5  ;;  %1479 = vst.msk [vmem:[#allocation2 + $0x80] sm:$0xff] %vm1461_vm1, %v8183_v5  ;;  %v1552_v43 = vld [vmem:[#allocation2] sm:$0xff] }
 0x181   : > { %5309 = vrsqrt.f32 %v988_v12  ;;  %v1123_v27 = vadd.f32 %v5906_v19, %v1084_v56  ;;  %v1047_v0 = vmul.f32 %v5300_v28, %v5860_v42  ;;  %1481 = vst.msk [vmem:[#allocation2 + $0x90] sm:$0xff] %vm1461_vm1, %v8183_v5  ;;  %1482 = vst.msk [vmem:[#allocation2 + $0x98] sm:$0xff] %vm1461_vm1, %v8183_v5  ;;  %v1553_v20 = vld [vmem:[#allocation2 + $0x8] sm:$0xff] }
 0x182   : > { %5039 = vmatmul.mubr.msk.f32.gmra.mrb[22].mxu0 %vm635_vm0, %v1122_v6  ;;  %v1085_v18 = vmul.f32 %v5900_v4, %v1046_v25  ;;  %1483 = vst.msk [vmem:[#allocation2 + $0xa0] sm:$0x3] %vm1464_vm2, %v8183_v5  ;;  %1486 = vst.msk [vmem:[#allocation2 + $0xb8] sm:$0x3] %vm1464_vm2, %v8183_v5  ;;  %v1653_v46 = vld [vmem:[#allocation2 + $0x9] sm:$0xff]  ;;  %v1652_v36 = vld [vmem:[#allocation2 + $0x1] sm:$0xff] }
 0x183   : > { %v5302_v22 = vpop.eup %5301  ;;  %5041 = vmatprep.mubr.msk.f32.mxu0 %vm635_vm0, %v1123_v27  ;;  %v1086_v13 = vmul.f32 %v5900_v4, %v1047_v0  ;;  %1484 = vst.msk [vmem:[#allocation2 + $0xa8] sm:$0xff] %vm1461_vm1, %v8183_v5  ;;  %1485 = vst.msk [vmem:[#allocation2 + $0xb0] sm:$0xff] %vm1461_vm1, %v8183_v5  ;;  %v1753_v59 = vld [vmem:[#allocation2 + $0xa] sm:$0xff]  ;;  %v1752_v54 = vld [vmem:[#allocation2 + $0x2] sm:$0xff] }
 0x184   : > { %v5304_v23 = vpop.eup %5303  ;;  %v1124_v60 = vadd.f32 %v5906_v19, %v1085_v18  ;;  %v1048_v15 = vmul.f32 %v5302_v22, %v5863_v49  ;;  %1487 = vst.msk [vmem:[#allocation2 + $0xc0] sm:$0xff] %vm1461_vm1, %v8183_v5  ;;  %1488 = vst.msk [vmem:[#allocation2 + $0xc8] sm:$0xff] %vm1461_vm1, %v8183_v5 }
 0x185   : > { %v1125_v45 = vadd.f32 %v5906_v19, %v1086_v13  ;;  %v1049_v1 = vmul.f32 %v5304_v23, %v5872_v58  ;;  %1489 = vst.msk [vmem:[#allocation2 + $0xd0] sm:$0x3] %vm1464_vm2, %v8183_v5  ;;  %1492 = vst.msk [vmem:[#allocation2 + $0xe8] sm:$0x3] %vm1464_vm2, %v8183_v5 }
 0x186   : > { %5042 = vmatmul.mubr.msk.f32.gmra.mrb[24].mxu0 %vm635_vm0, %v1124_v60  ;;  %v1087_v42 = vmul.f32 %v5900_v4, %v1048_v15  ;;  %1490 = vst.msk [vmem:[#allocation2 + $0xd8] sm:$0xff] %vm1461_vm1, %v8183_v5  ;;  %1491 = vst.msk [vmem:[#allocation2 + $0xe0] sm:$0xff] %vm1461_vm1, %v8183_v5 }
 0x187   : > { %v5306_v61 = vpop.eup %5305  ;;  %5044 = vmatprep.mubr.msk.f32.mxu0 %vm635_vm0, %v1125_v45  ;;  %v1088_v44 = vmul.f32 %v5900_v4, %v1049_v1  ;;  %1493 = vst.msk [vmem:[#allocation2 + $0xf0] sm:$0xff] %vm1461_vm1, %v8183_v5  ;;  %1494 = vst.msk [vmem:[#allocation2 + $0xf8] sm:$0xff] %vm1461_vm1, %v8183_v5 }
 0x188   : > { %v5308_v2 = vpop.eup %5307  ;;  %v1126_v16 = vadd.f32 %v5906_v19, %v1087_v42  ;;  %v1050_v30 = vmul.f32 %v5306_v61, %v5875_v53  ;;  %1495 = vst.msk [vmem:[#allocation2 + $0x100] sm:$0x3] %vm1464_vm2, %v8183_v5  ;;  %1498 = vst.msk [vmem:[#allocation2 + $0x118] sm:$0x3] %vm1464_vm2, %v8183_v5 }
 0x189   : > { %v1127_v49 = vadd.f32 %v5906_v19, %v1088_v44  ;;  %v1051_v29 = vmul.f32 %v5308_v2, %v5884_v14  ;;  %1496 = vst.msk [vmem:[#allocation2 + $0x108] sm:$0xff] %vm1461_vm1, %v8183_v5  ;;  %1497 = vst.msk [vmem:[#allocation2 + $0x110] sm:$0xff] %vm1461_vm1, %v8183_v5 }
 0x18a   : > { %5045 = vmatmul.mubr.msk.f32.gmra.mrb[26].mxu0 %vm635_vm0, %v1126_v16  ;;  %v1089_v58 = vmul.f32 %v5900_v4, %v1050_v30  ;;  %1499 = vst.msk [vmem:[#allocation2 + $0x120] sm:$0xff] %vm1461_vm1, %v8183_v5  ;;  %1500 = vst.msk [vmem:[#allocation2 + $0x128] sm:$0xff] %vm1461_vm1, %v8183_v5 }
 0x18b   : > { %v5310_v32 = vpop.eup %5309  ;;  %5047 = vmatprep.mubr.msk.f32.mxu0 %vm635_vm0, %v1127_v49  ;;  %v1090_v10 = vmul.f32 %v5900_v4, %v1051_v29  ;;  %1501 = vst.msk [vmem:[#allocation2 + $0x130] sm:$0x3] %vm1464_vm2, %v8183_v5  ;;  %1504 = vst.msk [vmem:[#allocation2 + $0x148] sm:$0x3] %vm1464_vm2, %v8183_v5 }
 0x18c   : > { %v1128_v31 = vadd.f32 %v5906_v19, %v1089_v58  ;;  %v1052_v34 = vmul.f32 %v5310_v32, %v5887_v57  ;;  %1502 = vst.msk [vmem:[#allocation2 + $0x138] sm:$0xff] %vm1461_vm1, %v8183_v5  ;;  %1503 = vst.msk [vmem:[#allocation2 + $0x140] sm:$0xff] %vm1461_vm1, %v8183_v5  ;;  %v1584_v57 = vlaneseq }
 0x18d   : > { %v1129_v35 = vadd.f32 %v5906_v19, %v1090_v10  ;;  %1505 = vst.msk [vmem:[#allocation2 + $0x150] sm:$0xff] %vm1461_vm1, %v8183_v5  ;;  %1506 = vst.msk [vmem:[#allocation2 + $0x158] sm:$0xff] %vm1461_vm1, %v8183_v5 }
 0x18e   : > { %5048 = vmatmul.mubr.msk.f32.gmra.mrb[28].mxu0 %vm635_vm0, %v1128_v31  ;;  %v1091_v53 = vmul.f32 %v5900_v4, %v1052_v34  ;;  %1507 = vst.msk [vmem:[#allocation2 + $0x160] sm:$0x3] %vm1464_vm2, %v8183_v5  ;;  %1510 = vst.msk [vmem:[#allocation2 + $0x178] sm:$0x3] %vm1464_vm2, %v8183_v5  ;;  %v6143_v4 = vshrl.u32 %v1584_v57, 7 }
 0x18f   : > { %5050 = vmatprep.mubr.msk.f32.mxu0 %vm635_vm0, %v1129_v35  ;;  %1508 = vst.msk [vmem:[#allocation2 + $0x168] sm:$0xff] %vm1461_vm1, %v8183_v5  ;;  %1509 = vst.msk [vmem:[#allocation2 + $0x170] sm:$0xff] %vm1461_vm1, %v8183_v5 }
 0x190   : > { %v1130_v14 = vadd.f32 %v5906_v19, %v1091_v53  ;;  %1511 = vst.msk [vmem:[#allocation2 + $0x180] sm:$0xff] %vm1461_vm1, %v8183_v5  ;;  %1512 = vst.msk [vmem:[#allocation2 + $0x188] sm:$0xff] %vm1461_vm1, %v8183_v5  ;;  %v8182_v19 = vsub.s32 0, %v6143_v4  ;;  %v1686_v17 = vsub.s32 1, %v6143_v4  ;;  %v1786_v33 = vsub.s32 2, %v6143_v4 }
 0x191   : > { %1513 = vst.msk [vmem:[#allocation2 + $0x190] sm:$0x3] %vm1464_vm2, %v8183_v5  ;;  %1516 = vst.msk [vmem:[#allocation2 + $0x1a8] sm:$0x3] %vm1464_vm2, %v8183_v5  ;;  %v1986_v11 = vsub.s32 4, %v6143_v4  ;;  %v1886_v41 = vsub.s32 3, %v6143_v4 }
 0x192   : > { %5051 = vmatmul.mubr.msk.f32.gmra.mrb[30].mxu0 %vm635_vm0, %v1130_v14  ;;  %1514 = vst.msk [vmem:[#allocation2 + $0x198] sm:$0xff] %vm1461_vm1, %v8183_v5  ;;  %1515 = vst.msk [vmem:[#allocation2 + $0x1a0] sm:$0xff] %vm1461_vm1, %v8183_v5  ;;  %v6152_v39 = vrot.slane %v1550_v38, %v8182_v19  ;;  %v6154_v55 = vrot.slane %v1550_v38, %v1686_v17  ;;  %v6166_v21 = vrot.slane %v1550_v38, %v1786_v33  ;;  %v6206_v14 = vld [vmem:[%s8166_s5 + $0x8] ss:$0 sm:$0xff] }
 0x193   : > { %8215 = vst [vmem:[#allocation3_spill] sm:$0xff] %v6143_v4  ;;  %v2086_v62 = vsub.s32 5, %v6143_v4  ;;  %v6180_v6 = vrot.slane %v1550_v38, %v1986_v11  ;;  %v2187_v25 = vsub.s32 6, %v6143_v4  ;;  %v2287_v27 = vsub.s32 7, %v6143_v4 }
 0x194   : > { %v1589_v26 = vmul.f32 %v6152_v39, %v1553_v20  ;;  %v1689_v51 = vmul.f32 %v6154_v55, %v1653_v46  ;;  %v1588_v52 = vmul.f32 %v6152_v39, %v1552_v43  ;;  %v1688_v9 = vmul.f32 %v6154_v55, %v1652_v36 }
 0x195   : > { %v1789_v12 = vmul.f32 %v6166_v21, %v1753_v59  ;;  %v1788_v28 = vmul.f32 %v6166_v21, %v1752_v54  ;;  %v6185_v18 = vrot.slane %v1550_v38, %v1886_v41  ;;  %v6187_v22 = vrot.slane %v1550_v38, %v2086_v62 }
 0x196   : > { %v1721_v40 = vadd.f32 %v1689_v51, %v1589_v26  ;;  %v1720_v56 = vadd.f32 %v1688_v9, %v1588_v52  ;;  %v6193_v2 = vrot.slane %v1550_v38, %v2187_v25  ;;  %v6195_v16 = vrot.slane %v1550_v38, %v2287_v27 }
 0x198   : > { %v1821_v15 = vadd.f32 %v1789_v12, %v1721_v40  ;;  %v1820_v42 = vadd.f32 %v1788_v28, %v1720_v56 }
 0x229   : > { %v5007_v37 = vpop.f32.mrb[0].mxu0 }
 0x22a   : > { %v1308_v47 = vadd.f32 %v5007_v37, %v6159_v48  ;;  %v1302_v50 = vpop.f32.mrb[1].mxu0 }
 0x22b   : > { %v1303_v8 = vadd.f32 %v6159_v48, %v1302_v50 }
 0x22c   : > { %1519 = vst.msk [vmem:[#allocation2 + $0x21] sm:$0xff] %vm1461_vm1, %v1308_v47 }
 0x22d   : > { %1518 = vst.msk [vmem:[#allocation2 + $0x19] sm:$0xff] %vm1461_vm1, %v1303_v8  ;;  %v5010_v24 = vpop.f32.mrb[2].mxu0 }
 0x22e   : > { %v1318_v63 = vadd.f32 %v5010_v24, %v6159_v48  ;;  %v1312_v3 = vpop.f32.mrb[3].mxu0 }
 0x22f   : > { %v1313_v7 = vadd.f32 %v6159_v48, %v1312_v3 }
 0x230   : > { %1521 = vst.msk [vmem:[#allocation2 + $0x39] sm:$0xff] %vm1461_vm1, %v1318_v63 }
 0x231   : > { %1520 = vst.msk [vmem:[#allocation2 + $0x31] sm:$0xff] %vm1461_vm1, %v1313_v7  ;;  %v5013_v0 = vpop.f32.mrb[4].mxu0 }
 0x232   : > { %v1328_v13 = vadd.f32 %v5013_v0, %v6159_v48  ;;  %v1322_v23 = vpop.f32.mrb[5].mxu0 }
 0x233   : > { %v1323_v60 = vadd.f32 %v6159_v48, %v1322_v23  ;;  %v1953_v45 = vld [vmem:[#allocation2 + $0x21] sm:$0xff] }
 0x234   : > { %v2053_v1 = vld [vmem:[#allocation2 + $0x22] sm:$0xff]  ;;  %1523 = vst.msk [vmem:[#allocation2 + $0x51] sm:$0xff] %vm1461_vm1, %v1328_v13  ;;  %v1989_v44 = vmul.f32 %v6180_v6, %v1953_v45  ;;  %v1852_v30 = vld [vmem:[#allocation2 + $0x18] sm:$0xff]  ;;  %v1691_v17 = vmul.f32 %v1953_v45, %v6154_v55 }
 0x235   : > { %v1853_v61 = vld [vmem:[#allocation2 + $0x20] sm:$0xff]  ;;  %1522 = vst.msk [vmem:[#allocation2 + $0x49] sm:$0xff] %vm1461_vm1, %v1323_v60  ;;  %v5016_v29 = vpop.f32.mrb[6].mxu0  ;;  %v2089_v32 = vmul.f32 %v6187_v22, %v2053_v1  ;;  %v1888_v10 = vmul.f32 %v6185_v18, %v1852_v30  ;;  %v1590_v34 = vmul.f32 %v1852_v30, %v6152_v39  ;;  %v1791_v38 = vmul.f32 %v2053_v1, %v6166_v21 }
 0x236   : > { %v1952_v49 = vld [vmem:[#allocation2 + $0x19] sm:$0xff]  ;;  %v1889_v58 = vmul.f32 %v6185_v18, %v1853_v61  ;;  %v1338_v35 = vadd.f32 %v5016_v29, %v6159_v48  ;;  %v1332_v53 = vpop.f32.mrb[7].mxu0  ;;  %v1591_v52 = vmul.f32 %v1853_v61, %v6152_v39 }
 0x237   : > { %v2052_v31 = vld [vmem:[#allocation2 + $0x1a] sm:$0xff]  ;;  %v1690_v57 = vmul.f32 %v1952_v49, %v6154_v55  ;;  %v1333_v20 = vadd.f32 %v6159_v48, %v1332_v53  ;;  %v1920_v36 = vadd.f32 %v1888_v10, %v1820_v42  ;;  %v1988_v37 = vmul.f32 %v6180_v6, %v1952_v49 }
 0x238   : > { %v1921_v46 = vadd.f32 %v1889_v58, %v1821_v15  ;;  %v6212_v33 = vld [vmem:[#allocation2 + $0x39] sm:$0xff]  ;;  %1525 = vst.msk [vmem:[#allocation2 + $0x69] sm:$0xff] %vm1461_vm1, %v1338_v35  ;;  %v2088_v50 = vmul.f32 %v6187_v22, %v2052_v31  ;;  %v2153_v26 = vld [vmem:[#allocation2 + $0x30] sm:$0xff]  ;;  %v1790_v8 = vmul.f32 %v2052_v31, %v6166_v21  ;;  %v1723_v13 = vadd.f32 %v1691_v17, %v1591_v52 }
 0x239   : > { %v6214_v43 = vld [vmem:[#allocation2 + $0x3a] sm:$0xff]  ;;  %v1722_v51 = vadd.f32 %v1690_v57, %v1590_v34  ;;  %1524 = vst.msk [vmem:[#allocation2 + $0x61] sm:$0xff] %vm1461_vm1, %v1333_v20  ;;  %v5019_v9 = vpop.f32.mrb[8].mxu0  ;;  %v2290_v11 = vmul.f32 %v6195_v16, %v6212_v33  ;;  %v2020_v24 = vadd.f32 %v1988_v37, %v1920_v36  ;;  %v2253_v41 = vld [vmem:[#allocation2 + $0x31] sm:$0xff]  ;;  %v2189_v40 = vmul.f32 %v6193_v2, %v2153_v26 }
 0x23a   : > { %v6218_v47 = vld [vmem:[#allocation2 + $0x38] sm:$0xff]  ;;  %v2021_v59 = vadd.f32 %v1989_v44, %v1921_v46  ;;  %v2390_v54 = vmul.f32 %v6206_v14, %v6214_v43  ;;  %v1348_v62 = vadd.f32 %v5019_v9, %v6159_v48  ;;  %v1342_v63 = vpop.f32.mrb[9].mxu0  ;;  %v1890_v27 = vmul.f32 %v2153_v26, %v6185_v18  ;;  %v6256_v17 = vld [vmem:[%s8167_s6] ss:$0 sm:$0xff] }
 0x23b   : > { %v2190_v3 = vmul.f32 %v6193_v2, %v6218_v47  ;;  %v1822_v7 = vadd.f32 %v1790_v8, %v1722_v51  ;;  %v1343_v12 = vadd.f32 %v6159_v48, %v1342_v63  ;;  %v2120_v28 = vadd.f32 %v2088_v50, %v2020_v24  ;;  %v2353_v25 = vld [vmem:[#allocation2 + $0x32] sm:$0xff] }
 0x23c   : > { %v2121_v56 = vadd.f32 %v2089_v32, %v2021_v59  ;;  %1527 = vst.msk [vmem:[#allocation2 + $0x81] sm:$0xff] %vm1461_vm1, %v1348_v62  ;;  %v2289_v0 = vmul.f32 %v6195_v16, %v2253_v41  ;;  %v1891_v23 = vmul.f32 %v6218_v47, %v6185_v18  ;;  %v1991_v60 = vmul.f32 %v6212_v33, %v6180_v6  ;;  %v6242_v44 = vld [vmem:[#allocation2 + $0x48] sm:$0xff]  ;;  %v6249_v31 = vld [vmem:[#allocation2 + $0x50] sm:$0xff] }
 0x23d   : > { %1526 = vst.msk [vmem:[#allocation2 + $0x79] sm:$0xff] %vm1461_vm1, %v1343_v12  ;;  %v5022_v15 = vpop.f32.mrb[10].mxu0  ;;  %v2221_v1 = vadd.f32 %v2189_v40, %v2120_v28  ;;  %v1922_v42 = vadd.f32 %v1890_v27, %v1822_v7  ;;  %v1990_v61 = vmul.f32 %v2253_v41, %v6180_v6  ;;  %v6244_v30 = vld [vmem:[#allocation2 + $0x49] sm:$0xff]  ;;  %v2389_v58 = vmul.f32 %v6206_v14, %v2353_v25  ;;  %v6279_v12 = vld [vmem:[#allocation2 + $0x51] sm:$0xff] }
 0x23e   : > { %v2222_v45 = vadd.f32 %v2190_v3, %v2121_v56  ;;  %v1358_v49 = vadd.f32 %v5022_v15, %v6159_v48  ;;  %v1352_v29 = vpop.f32.mrb[11].mxu0  ;;  %v2090_v32 = vmul.f32 %v2353_v25, %v6187_v22  ;;  %v1823_v10 = vadd.f32 %v1791_v38, %v1723_v13  ;;  %v6282_v28 = vld [vmem:[#allocation2 + $0x52] sm:$0xff] }
 0x23f   : > { %v1353_v34 = vadd.f32 %v6159_v48, %v1352_v29  ;;  %v2321_v53 = vadd.f32 %v2289_v0, %v2221_v1  ;;  %v2022_v57 = vadd.f32 %v1990_v61, %v1922_v42  ;;  %v2191_v20 = vmul.f32 %v6193_v2, %v6242_v44 }
 0x240   : > { %v2322_v35 = vadd.f32 %v2290_v11, %v2222_v45  ;;  %1529 = vst.msk [vmem:[#allocation2 + $0x99] sm:$0xff] %vm1461_vm1, %v1358_v49  ;;  %v2291_v38 = vmul.f32 %v6195_v16, %v6244_v30  ;;  %v1923_v46 = vadd.f32 %v1891_v23, %v1823_v10  ;;  %v2091_v36 = vmul.f32 %v6214_v43, %v6187_v22  ;;  %v6268_v11 = vld [vmem:[#allocation2 + $0x4a] sm:$0xff] }
 0x241   : > { %1528 = vst.msk [vmem:[#allocation2 + $0x91] sm:$0xff] %vm1461_vm1, %v1353_v34  ;;  %v5025_v37 = vpop.f32.mrb[12].mxu0  ;;  %v2421_v51 = vadd.f32 %v2389_v58, %v2321_v53  ;;  %v2122_v8 = vadd.f32 %v2090_v32, %v2022_v57  ;;  %v2192_v52 = vmul.f32 %v6193_v2, %v6249_v31  ;;  %v1592_v62 = vmul.f32 %v2153_v26, %v6152_v39 }
 0x242   : > { %v2422_v50 = vadd.f32 %v2390_v54, %v2322_v35  ;;  %v1368_v9 = vadd.f32 %v5025_v37, %v6159_v48  ;;  %v1362_v59 = vpop.f32.mrb[13].mxu0  ;;  %v2023_v24 = vadd.f32 %v1991_v60, %v1923_v46  ;;  %v1692_v63 = vmul.f32 %v2253_v41, %v6154_v55 }
 0x243   : > { %v1363_v3 = vadd.f32 %v6159_v48, %v1362_v59  ;;  %v6277_v54 = vadd.f32 %v6256_v17, %v2421_v51  ;;  %v2223_v7 = vadd.f32 %v2191_v20, %v2122_v8  ;;  %v1792_v26 = vmul.f32 %v2353_v25, %v6166_v21  ;;  %v6313_v20 = vld [vmem:[#allocation2 + $0x60] sm:$0xff] }
 0x244   : > { %v6274_v40 = vadd.f32 %v6256_v17, %v2422_v50  ;;  %1531 = vst.msk [vmem:[#allocation2 + $0xb1] sm:$0xff] %vm1461_vm1, %v1368_v9  ;;  %v2123_v56 = vadd.f32 %v2091_v36, %v2023_v24  ;;  %v1724_v27 = vadd.f32 %v1692_v63, %v1592_v62  ;;  %v1892_v41 = vmul.f32 %v6242_v44, %v6185_v18  ;;  %v6322_v51 = vld [vmem:[#allocation2 + $0x62] sm:$0xff] }
 0x245   : > { %1530 = vst.msk [vmem:[#allocation2 + $0xa9] sm:$0xff] %vm1461_vm1, %v1363_v3  ;;  %2524 = vrot.lane.b32.xlu0 %v6277_v54, %s5418_s1  ;;  %v5028_v0 = vpop.f32.mrb[14].mxu0  ;;  %v2323_v13 = vadd.f32 %v2291_v38, %v2223_v7  ;;  %v2391_v23 = vmul.f32 %v6206_v14, %v6268_v11  ;;  %v2292_v45 = vmul.f32 %v6195_v16, %v6279_v12  ;;  %v6315_v38 = vld [vmem:[#allocation2 + $0x61] sm:$0xff] }
 0x246   : > { %2526 = vrot.lane.b32.xlu1 %v6274_v40, %s5418_s1  ;;  %v1378_v60 = vadd.f32 %v5028_v0, %v6159_v48  ;;  %v1372_v25 = vpop.f32.mrb[15].mxu0  ;;  %v2224_v15 = vadd.f32 %v2192_v52, %v2123_v56  ;;  %v1824_v1 = vadd.f32 %v1792_v26, %v1724_v27  ;;  %v2392_v49 = vmul.f32 %v6206_v14, %v6282_v28  ;;  %v6338_v7 = vld [vmem:[#allocation2 + $0x68] sm:$0xff] }
 0x247   : > { %v1373_v42 = vadd.f32 %v6159_v48, %v1372_v25  ;;  %v2423_v61 = vadd.f32 %v2391_v23, %v2323_v13  ;;  %v1992_v29 = vmul.f32 %v6244_v30, %v6180_v6  ;;  %v1593_v10 = vmul.f32 %v6218_v47, %v6152_v39 }
 0x248   : > { %1533 = vst.msk [vmem:[#allocation2 + $0xc9] sm:$0xff] %vm1461_vm1, %v1378_v60  ;;  %v2324_v58 = vadd.f32 %v2292_v45, %v2224_v15  ;;  %v1924_v32 = vadd.f32 %v1892_v41, %v1824_v1  ;;  %v1693_v34 = vmul.f32 %v6212_v33, %v6154_v55  ;;  %v2092_v57 = vmul.f32 %v6268_v11, %v6187_v22 }
 0x249   : > { %1532 = vst.msk [vmem:[#allocation2 + $0xc1] sm:$0xff] %vm1461_vm1, %v1373_v42  ;;  %v6309_v35 = vadd.f32 %v6256_v17, %v2423_v61  ;;  %v5031_v53 = vpop.f32.mrb[16].mxu0  ;;  %v1793_v46 = vmul.f32 %v6214_v43, %v6166_v21  ;;  %v1893_v47 = vmul.f32 %v6249_v31, %v6185_v18  ;;  %v2193_v43 = vmul.f32 %v6193_v2, %v6313_v20  ;;  %v2258_v61 = vld [vmem:[#allocation2 + $0x69] sm:$0xff] }
 0x24a   : > { %v1388_v33 = vadd.f32 %v5031_v53, %v6159_v48  ;;  %v1382_v36 = vpop.f32.mrb[17].mxu0  ;;  %v2424_v37 = vadd.f32 %v2392_v49, %v2324_v58  ;;  %v2024_v50 = vadd.f32 %v1992_v29, %v1924_v32  ;;  %v1725_v8 = vadd.f32 %v1693_v34, %v1593_v10  ;;  %v6360_v49 = vld [vmem:[#allocation2 + $0x6a] sm:$0xff] }
 0x24b   : > { %2528 = vrot.lane.b32.xlu1 %v6309_v35, %s5418_s1  ;;  %v1383_v52 = vadd.f32 %v6159_v48, %v1382_v36  ;;  %v2293_v59 = vmul.f32 %v6195_v16, %v6315_v38  ;;  %v2393_v63 = vmul.f32 %v6206_v14, %v6322_v51  ;;  %v1594_v56 = vmul.f32 %v6242_v44, %v6152_v39 }
 0x24c   : > { %1535 = vst.msk [vmem:[#allocation2 + $0xe1] sm:$0xff] %vm1461_vm1, %v1388_v33  ;;  %v2124_v9 = vadd.f32 %v2092_v57, %v2024_v50  ;;  %v1825_v24 = vadd.f32 %v1793_v46, %v1725_v8  ;;  %v6334_v62 = vadd.f32 %v6256_v17, %v2424_v37  ;;  %v1694_v27 = vmul.f32 %v6244_v30, %v6154_v55  ;;  %v6368_v57 = vld [vmem:[#allocation2 + $0x78] sm:$0xff] }
 0x24d   : > { %1534 = vst.msk [vmem:[#allocation2 + $0xd9] sm:$0xff] %vm1461_vm1, %v1383_v52  ;;  %v5034_v3 = vpop.f32.mrb[18].mxu0  ;;  %v1993_v23 = vmul.f32 %v6279_v12, %v6180_v6  ;;  %v1794_v44 = vmul.f32 %v6268_v11, %v6166_v21  ;;  %v1894_v30 = vmul.f32 %v6313_v20, %v6185_v18  ;;  %v2093_v1 = vmul.f32 %v6282_v28, %v6187_v22  ;;  %v6373_v37 = vld [vmem:[#allocation2 + $0x79] sm:$0xff] }
 0x24e   : > { %v2225_v26 = vadd.f32 %v2193_v43, %v2124_v9  ;;  %v1398_v41 = vadd.f32 %v5034_v3, %v6159_v48  ;;  %v1392_v0 = vpop.f32.mrb[19].mxu0  ;;  %v1925_v13 = vadd.f32 %v1893_v47, %v1825_v24  ;;  %v1726_v25 = vadd.f32 %v1694_v27, %v1594_v56 }
 0x24f   : > { %2530 = vrot.lane.b32.xlu1 %v6334_v62, %s5418_s1  ;;  %v1393_v60 = vadd.f32 %v6159_v48, %v1392_v0  ;;  %v2194_v42 = vmul.f32 %v6193_v2, %v6338_v7  ;;  %v1994_v11 = vmul.f32 %v6315_v38, %v6180_v6  ;;  %v1595_v32 = vmul.f32 %v6249_v31, %v6152_v39 }
 0x250   : > { %v2325_v15 = vadd.f32 %v2293_v59, %v2225_v26  ;;  %1537 = vst.msk [vmem:[#allocation2 + $0xf9] sm:$0xff] %vm1461_vm1, %v1398_v41  ;;  %v2025_v45 = vadd.f32 %v1993_v23, %v1925_v13  ;;  %v1826_v29 = vadd.f32 %v1794_v44, %v1726_v25  ;;  %v1695_v10 = vmul.f32 %v6279_v12, %v6154_v55  ;;  %v6384_v59 = vld [vmem:[#allocation2 + $0x7a] sm:$0xff] }
 0x251   : > { %1536 = vst.msk [vmem:[#allocation2 + $0xf1] sm:$0xff] %vm1461_vm1, %v1393_v60  ;;  %v5037_v58 = vpop.f32.mrb[20].mxu0  ;;  %v1795_v33 = vmul.f32 %v6282_v28, %v6166_v21  ;;  %v1895_v31 = vmul.f32 %v6338_v7, %v6185_v18  ;;  %v2294_v9 = vmul.f32 %v6195_v16, %v2258_v61  ;;  %v2394_v43 = vmul.f32 %v6206_v14, %v6360_v49  ;;  %v6396_v41 = vld [vmem:[#allocation2 + $0x80] sm:$0xff] }
 0x252   : > { %v2425_v34 = vadd.f32 %v2393_v63, %v2325_v15  ;;  %v2125_v53 = vadd.f32 %v2093_v1, %v2025_v45  ;;  %v1408_v46 = vadd.f32 %v5037_v58, %v6159_v48  ;;  %v1402_v47 = vpop.f32.mrb[21].mxu0  ;;  %v1926_v36 = vadd.f32 %v1894_v30, %v1826_v29  ;;  %v6413_v58 = vld [vmem:[#allocation2 + $0x81] sm:$0xff] }
 0x253   : > { %v1403_v50 = vadd.f32 %v6159_v48, %v1402_v47  ;;  %v1727_v8 = vadd.f32 %v1695_v10, %v1595_v32  ;;  %v2094_v24 = vmul.f32 %v6322_v51, %v6187_v22  ;;  %v2195_v63 = vmul.f32 %v6193_v2, %v6368_v57 }
 0x254   : > { %v6379_v12 = vadd.f32 %v6256_v17, %v2425_v34  ;;  %v2226_v52 = vadd.f32 %v2194_v42, %v2125_v53  ;;  %1539 = vst.msk [vmem:[#allocation2 + $0x111] sm:$0xff] %vm1461_vm1, %v1408_v46  ;;  %v2026_v28 = vadd.f32 %v1994_v11, %v1926_v36  ;;  %v2295_v26 = vmul.f32 %v6195_v16, %v6373_v37  ;;  %v6420_v36 = vld [vmem:[#allocation2 + $0x82] sm:$0xff] }
 0x255   : > { %1538 = vst.msk [vmem:[#allocation2 + $0x109] sm:$0xff] %vm1461_vm1, %v1403_v50  ;;  %v1827_v3 = vadd.f32 %v1795_v33, %v1727_v8  ;;  %v5040_v56 = vpop.f32.mrb[22].mxu0  ;;  %v1596_v0 = vmul.f32 %v6313_v20, %v6152_v39  ;;  %v1696_v13 = vmul.f32 %v6315_v38, %v6154_v55  ;;  %v2395_v25 = vmul.f32 %v6206_v14, %v6384_v59  ;;  %v6422_v50 = vld [vmem:[#allocation2 + $0x90] sm:$0xff] }
 0x256   : > { %2532 = vrot.lane.b32.xlu0 %v6379_v12, %s5418_s1  ;;  %v2326_v27 = vadd.f32 %v2294_v9, %v2226_v52  ;;  %v1412_v23 = vpop.f32.mrb[23].mxu0  ;;  %v2126_v60 = vadd.f32 %v2094_v24, %v2026_v28  ;;  %v1995_v30 = vmul.f32 %v2258_v61, %v6180_v6  ;;  %v1796_v1 = vmul.f32 %v6322_v51, %v6166_v21 }
 0x257   : > { %v1927_v44 = vadd.f32 %v1895_v31, %v1827_v3  ;;  %v1728_v45 = vadd.f32 %v1696_v13, %v1596_v0  ;;  %v1896_v42 = vmul.f32 %v6368_v57, %v6185_v18  ;;  %v2095_v38 = vmul.f32 %v6360_v49, %v6187_v22 }
 0x258   : > { %v2426_v15 = vadd.f32 %v2394_v43, %v2326_v27  ;;  %v2227_v20 = vadd.f32 %v2195_v63, %v2126_v60  ;;  %v2196_v11 = vmul.f32 %v6193_v2, %v6396_v41  ;;  %v1418_v51 = vadd.f32 %v5040_v56, %v6159_v48  ;;  %v6439_v63 = vld [vmem:[#allocation2 + $0x92] sm:$0xff] }
 0x259   : > { %v2027_v29 = vadd.f32 %v1995_v30, %v1927_v44  ;;  %v5043_v32 = vpop.f32.mrb[24].mxu0  ;;  %v1828_v34 = vadd.f32 %v1796_v1, %v1728_v45  ;;  %v1413_v53 = vadd.f32 %v6159_v48, %v1412_v23  ;;  %v1597_v8 = vmul.f32 %v6338_v7, %v6152_v39 }
 0x25a   : > { %v6416_v10 = vadd.f32 %v6256_v17, %v2426_v15  ;;  %v1422_v46 = vpop.f32.mrb[25].mxu0  ;;  %v2327_v47 = vadd.f32 %v2295_v26, %v2227_v20  ;;  %v1697_v31 = vmul.f32 %v2258_v61, %v6154_v55  ;;  %v2296_v52 = vmul.f32 %v6195_v16, %v6413_v58  ;;  %1541 = vst.msk [vmem:[#allocation2 + $0x129] sm:$0xff] %vm1461_vm1, %v1418_v51  ;;  %v6437_v61 = vld [vmem:[#allocation2 + $0x91] sm:$0xff] }
 0x25b   : > { %v2127_v33 = vadd.f32 %v2095_v38, %v2027_v29  ;;  %v1928_v9 = vadd.f32 %v1896_v42, %v1828_v34  ;;  %v1996_v43 = vmul.f32 %v6373_v37, %v6180_v6  ;;  %1540 = vst.msk [vmem:[#allocation2 + $0x121] sm:$0xff] %vm1461_vm1, %v1413_v53  ;;  %v1797_v28 = vmul.f32 %v6360_v49, %v6166_v21  ;;  %v6462_v42 = vld [vmem:[#allocation2 + $0x98] sm:$0xff] }
 0x25c   : > { %2534 = vrot.lane.b32.xlu1 %v6416_v10, %s5418_s1  ;;  %v2427_v7 = vadd.f32 %v2395_v25, %v2327_v47  ;;  %v1729_v3 = vadd.f32 %v1697_v31, %v1597_v8  ;;  %v1897_v56 = vmul.f32 %v6396_v41, %v6185_v18  ;;  %v2396_v26 = vmul.f32 %v6206_v14, %v6420_v36  ;;  %v6474_v53 = vld [vmem:[#allocation2 + $0x99] sm:$0xff] }
 0x25d   : > { %v2228_v24 = vadd.f32 %v2196_v11, %v2127_v33  ;;  %v6443_v27 = vpop.f32.mrb[26].mxu0  ;;  %v2028_v0 = vadd.f32 %v1996_v43, %v1928_v9  ;;  %v2096_v13 = vmul.f32 %v6384_v59, %v6187_v22  ;;  %v2197_v49 = vmul.f32 %v6193_v2, %v6422_v50  ;;  %v6476_v47 = vld [vmem:[#allocation2 + $0x9a] sm:$0xff] }
 0x25e   : > { %v6451_v23 = vpop.f32.mrb[27].mxu0  ;;  %v6454_v60 = vadd.f32 %v6256_v17, %v2427_v7  ;;  %v1829_v44 = vadd.f32 %v1797_v28, %v1729_v3  ;;  %v1598_v30 = vmul.f32 %v6368_v57, %v6152_v39  ;;  %v2297_v45 = vmul.f32 %v6195_v16, %v6437_v61 }
 0x25f   : > { %v2328_v25 = vadd.f32 %v2296_v52, %v2228_v24  ;;  %v2128_v15 = vadd.f32 %v2096_v13, %v2028_v0  ;;  %v2397_v1 = vmul.f32 %v6206_v14, %v6439_v63  ;;  %v1698_v20 = vmul.f32 %v6373_v37, %v6154_v55  ;;  %v6499_v13 = vld [vmem:[#allocation2 + $0xa8] sm:$0xff] }
 0x260   : > { %2536 = vrot.lane.b32.xlu0 %v6454_v60, %s5418_s1  ;;  %v1929_v38 = vadd.f32 %v1897_v56, %v1829_v44  ;;  %v1997_v57 = vmul.f32 %v6413_v58, %v6180_v6  ;;  %v2097_v11 = vmul.f32 %v6420_v36, %v6187_v22  ;;  %v1798_v37 = vmul.f32 %v6384_v59, %v6166_v21 }
 0x261   : > { %v2428_v29 = vadd.f32 %v2396_v26, %v2328_v25  ;;  %v6472_v34 = vpop.f32.mrb[28].mxu0  ;;  %v2229_v51 = vadd.f32 %v2197_v49, %v2128_v15  ;;  %v1730_v33 = vadd.f32 %v1698_v20, %v1598_v30  ;;  %v1898_v8 = vmul.f32 %v6422_v50, %v6185_v18  ;;  %v2263_v30 = vld [vmem:[#allocation2 + $0xa9] sm:$0xff] }
 0x262   : > { %v6482_v31 = vpop.f32.mrb[29].mxu0  ;;  %v2029_v9 = vadd.f32 %v1997_v57, %v1929_v38  ;;  %v2198_v43 = vmul.f32 %v6193_v2, %v6462_v42  ;;  %v1428_v28 = vadd.f32 %v5043_v32, %v6159_v48  ;;  %v1423_v3 = vadd.f32 %v6159_v48, %v1422_v46  ;;  %v6513_v20 = vld [vmem:[#allocation2 + $0xaa] sm:$0xff] }
 0x263   : > { %v6485_v52 = vadd.f32 %v6256_v17, %v2428_v29  ;;  %v2329_v7 = vadd.f32 %v2297_v45, %v2229_v51  ;;  %v1830_v24 = vadd.f32 %v1798_v37, %v1730_v33  ;;  %v1599_v59 = vmul.f32 %v6396_v41, %v6152_v39 }
 0x264   : > { %v2129_v56 = vadd.f32 %v2097_v11, %v2029_v9  ;;  %v2298_v26 = vmul.f32 %v6195_v16, %v6474_v53  ;;  %v2398_v0 = vmul.f32 %v6206_v14, %v6476_v47  ;;  %1543 = vst.msk [vmem:[#allocation2 + $0x141] sm:$0xff] %vm1461_vm1, %v1428_v28  ;;  %v1699_v32 = vmul.f32 %v6413_v58, %v6154_v55  ;;  %v6527_v9 = vld [vmem:[#allocation2 + $0xb0] sm:$0xff] }
 0x265   : > { %2538 = vrot.lane.b32.xlu1 %v6485_v52, %s5418_s1  ;;  %v6504_v46 = vpop.f32.mrb[30].mxu0  ;;  %v2429_v41 = vadd.f32 %v2397_v1, %v2329_v7  ;;  %v1930_v49 = vadd.f32 %v1898_v8, %v1830_v24  ;;  %v1998_v25 = vmul.f32 %v6437_v61, %v6180_v6  ;;  %v2098_v44 = vmul.f32 %v6439_v63, %v6187_v22 }
 0x266   : > { %1542 = vst.msk [vmem:[#allocation2 + $0x139] sm:$0xff] %vm1461_vm1, %v1423_v3  ;;  %v6511_v15 = vpop.f32.mrb[31].mxu0  ;;  %v2230_v45 = vadd.f32 %v2198_v43, %v2129_v56  ;;  %v1731_v29 = vadd.f32 %v1699_v32, %v1599_v59  ;;  %v1799_v58 = vmul.f32 %v6420_v36, %v6166_v21  ;;  %v1899_v1 = vmul.f32 %v6462_v42, %v6185_v18  ;;  %v6539_v59 = vld [vmem:[#allocation2 + $0xb1] sm:$0xff] }
 0x267   : > { %v6520_v38 = vadd.f32 %v6256_v17, %v2429_v41  ;;  %v2030_v57 = vadd.f32 %v1998_v25, %v1930_v49  ;;  %v2199_v11 = vmul.f32 %v6193_v2, %v6499_v13  ;;  %v1600_v51 = vmul.f32 %v6422_v50, %v6152_v39  ;;  %v6547_v49 = vld [vmem:[#allocation2 + $0xb2] sm:$0xff] }
 0x268   : > { %v2330_v33 = vadd.f32 %v2298_v26, %v2230_v45  ;;  %v2299_v37 = vmul.f32 %v6195_v16, %v2263_v30  ;;  %v1831_v8 = vadd.f32 %v1799_v58, %v1731_v29  ;;  %v1700_v36 = vmul.f32 %v6437_v61, %v6154_v55 }
 0x269   : > { %2540 = vrot.lane.b32.xlu0 %v6520_v38, %s5418_s1  ;;  %v2130_v43 = vadd.f32 %v2098_v44, %v2030_v57  ;;  %v2399_v28 = vmul.f32 %v6206_v14, %v6513_v20  ;;  %v1999_v7 = vmul.f32 %v6474_v53, %v6180_v6  ;;  %v1800_v50 = vmul.f32 %v6439_v63, %v6166_v21 }
 0x26a   : > { %v2430_v24 = vadd.f32 %v2398_v0, %v2330_v33  ;;  %v1931_v3 = vadd.f32 %v1899_v1, %v1831_v8  ;;  %v1732_v56 = vadd.f32 %v1700_v36, %v1600_v51  ;;  %v1900_v61 = vmul.f32 %v6499_v13, %v6185_v18  ;;  %v6558_v1 = vld [vmem:[#allocation2 + $0xc0] sm:$0xff] }
 0x26b   : > { %v2231_v26 = vadd.f32 %v2199_v11, %v2130_v43  ;;  %v2099_v32 = vmul.f32 %v6476_v47, %v6187_v22  ;;  %v2200_v41 = vmul.f32 %v6193_v2, %v6527_v9  ;;  %v1438_v63 = vadd.f32 %v6443_v27, %v6159_v48  ;;  %v2265_v8 = vld [vmem:[#allocation2 + $0xc1] sm:$0xff] }
 0x26c   : > { %v6552_v0 = vadd.f32 %v6256_v17, %v2430_v24  ;;  %v2031_v25 = vadd.f32 %v1999_v7, %v1931_v3  ;;  %v1832_v44 = vadd.f32 %v1800_v50, %v1732_v56  ;;  %v1433_v45 = vadd.f32 %v6159_v48, %v6451_v23 }
 0x26d   : > { %v2331_v29 = vadd.f32 %v2299_v37, %v2231_v26  ;;  %v2300_v58 = vmul.f32 %v6195_v16, %v6539_v59  ;;  %1545 = vst.msk [vmem:[#allocation2 + $0x159] sm:$0xff] %vm1461_vm1, %v1438_v63  ;;  %v1601_v57 = vmul.f32 %v6462_v42, %v6152_v39  ;;  %v1701_v27 = vmul.f32 %v6474_v53, %v6154_v55 }
 0x26e   : > { %2542 = vrot.lane.b32.xlu1 %v6552_v0, %s5418_s1  ;;  %v2131_v11 = vadd.f32 %v2099_v32, %v2031_v25  ;;  %v2400_v23 = vmul.f32 %v6206_v14, %v6547_v49  ;;  %v1932_v51 = vadd.f32 %v1900_v61, %v1832_v44  ;;  %v2000_v33 = vmul.f32 %v2263_v30, %v6180_v6  ;;  %v6588_v25 = vld [vmem:[#allocation2 + $0xc8] sm:$0xff] }
 0x26f   : > { %1544 = vst.msk [vmem:[#allocation2 + $0x151] sm:$0xff] %vm1461_vm1, %v1433_v45  ;;  %v2431_v37 = vadd.f32 %v2399_v28, %v2331_v29  ;;  %v1733_v36 = vadd.f32 %v1701_v27, %v1601_v57  ;;  %v1801_v42 = vmul.f32 %v6476_v47, %v6166_v21  ;;  %v1901_v53 = vmul.f32 %v6527_v9, %v6185_v18  ;;  %v2365_v28 = vld [vmem:[#allocation2 + $0xc2] sm:$0xff] }
 0x270   : > { %v2232_v43 = vadd.f32 %v2200_v41, %v2131_v11  ;;  %v2032_v7 = vadd.f32 %v2000_v33, %v1932_v51  ;;  %v2100_v50 = vmul.f32 %v6513_v20, %v6187_v22  ;;  %v2201_v24 = vmul.f32 %v6193_v2, %v6558_v1  ;;  %v2266_v33 = vld [vmem:[#allocation2 + $0xc9] sm:$0xff] }
 0x271   : > { %v6580_v3 = vadd.f32 %v6256_v17, %v2431_v37  ;;  %v1833_v56 = vadd.f32 %v1801_v42, %v1733_v36  ;;  %v1602_v61 = vmul.f32 %v6499_v13, %v6152_v39  ;;  %v1702_v47 = vmul.f32 %v2263_v30, %v6154_v55 }
 0x272   : > { %v2332_v26 = vadd.f32 %v2300_v58, %v2232_v43  ;;  %v2132_v32 = vadd.f32 %v2100_v50, %v2032_v7  ;;  %v2301_v41 = vmul.f32 %v6195_v16, %v2265_v8  ;;  %v2001_v63 = vmul.f32 %v6539_v59, %v6180_v6  ;;  %v2366_v7 = vld [vmem:[#allocation2 + $0xca] sm:$0xff] }
 0x273   : > { %2544 = vrot.lane.b32.xlu0 %v6580_v3, %s5418_s1  ;;  %v1933_v44 = vadd.f32 %v1901_v53, %v1833_v56  ;;  %v1734_v45 = vadd.f32 %v1702_v47, %v1602_v61  ;;  %v1802_v29 = vmul.f32 %v6513_v20, %v6166_v21  ;;  %v1902_v13 = vmul.f32 %v6558_v1, %v6185_v18  ;;  %v6611_v56 = vld [vmem:[#allocation2 + $0xd8] sm:$0xff] }
 0x274   : > { %v2432_v30 = vadd.f32 %v2400_v23, %v2332_v26  ;;  %v2233_v58 = vadd.f32 %v2201_v24, %v2132_v32  ;;  %v2401_v57 = vmul.f32 %v6206_v14, %v2365_v28  ;;  %v2101_v27 = vmul.f32 %v6547_v49, %v6187_v22 }
 0x275   : > { %v2033_v11 = vadd.f32 %v2001_v63, %v1933_v44  ;;  %v2202_v51 = vmul.f32 %v6193_v2, %v6588_v25  ;;  %v1834_v37 = vadd.f32 %v1802_v29, %v1734_v45  ;;  %v1448_v36 = vadd.f32 %v6472_v34, %v6159_v48 }
 0x276   : > { %v6604_v20 = vadd.f32 %v6256_v17, %v2432_v30  ;;  %v2333_v42 = vadd.f32 %v2301_v41, %v2233_v58  ;;  %v1443_v23 = vadd.f32 %v6159_v48, %v6482_v31  ;;  %v1603_v53 = vmul.f32 %v6527_v9, %v6152_v39  ;;  %v2267_v41 = vld [vmem:[#allocation2 + $0xd9] sm:$0xff] }
 0x277   : > { %v2133_v43 = vadd.f32 %v2101_v27, %v2033_v11  ;;  %v1934_v50 = vadd.f32 %v1902_v13, %v1834_v37  ;;  %v2002_v24 = vmul.f32 %v2265_v8, %v6180_v6  ;;  %1547 = vst.msk [vmem:[#allocation2 + $0x171] sm:$0xff] %vm1461_vm1, %v1448_v36  ;;  %v1703_v34 = vmul.f32 %v6539_v59, %v6154_v55  ;;  %v2367_v58 = vld [vmem:[#allocation2 + $0xda] sm:$0xff] }
 0x278   : > { %2546 = vrot.lane.b32.xlu1 %v6604_v20, %s5418_s1  ;;  %v2433_v61 = vadd.f32 %v2401_v57, %v2333_v42  ;;  %v2302_v31 = vmul.f32 %v6195_v16, %v2266_v33  ;;  %v2102_v9 = vmul.f32 %v2365_v28, %v6187_v22  ;;  %1546 = vst.msk [vmem:[#allocation2 + $0x169] sm:$0xff] %vm1461_vm1, %v1443_v23 }
 0x279   : > { %v1803_v47 = vmul.f32 %v6547_v49, %v6166_v21  ;;  %v2234_v26 = vadd.f32 %v2202_v51, %v2133_v43  ;;  %v2034_v32 = vadd.f32 %v2002_v24, %v1934_v50  ;;  %v1735_v63 = vadd.f32 %v1703_v34, %v1603_v53  ;;  %v2168_v53 = vld [vmem:[#allocation2 + $0xe0] sm:$0xff] }
 0x27a   : > { %v1903_v59 = vmul.f32 %v6588_v25, %v6185_v18  ;;  %v6626_v44 = vadd.f32 %v6256_v17, %v2433_v61  ;;  %v2402_v45 = vmul.f32 %v6206_v14, %v2366_v7  ;;  %v2203_v29 = vmul.f32 %v6193_v2, %v6611_v56 }
 0x27b   : > { %v1604_v13 = vmul.f32 %v6558_v1, %v6152_v39  ;;  %v2334_v30 = vadd.f32 %v2302_v31, %v2234_v26  ;;  %v2134_v49 = vadd.f32 %v2102_v9, %v2034_v32  ;;  %v1835_v57 = vadd.f32 %v1803_v47, %v1735_v63  ;;  %v2268_v31 = vld [vmem:[#allocation2 + $0xe1] sm:$0xff] }
 0x27c   : > { %v1704_v27 = vmul.f32 %v2265_v8, %v6154_v55  ;;  %2548 = vrot.lane.b32.xlu0 %v6626_v44, %s5418_s1  ;;  %v2303_v11 = vmul.f32 %v6195_v16, %v2267_v41  ;;  %v2003_v51 = vmul.f32 %v2266_v33, %v6180_v6  ;;  %v1804_v37 = vmul.f32 %v2365_v28, %v6166_v21 }
 0x27d   : > { %v1904_v36 = vmul.f32 %v6611_v56, %v6185_v18  ;;  %v2434_v42 = vadd.f32 %v2402_v45, %v2334_v30  ;;  %v2235_v1 = vadd.f32 %v2203_v29, %v2134_v49  ;;  %v1935_v23 = vadd.f32 %v1903_v59, %v1835_v57  ;;  %v2368_v45 = vld [vmem:[#allocation2 + $0xe2] sm:$0xff]  ;;  %v2169_v49 = vld [vmem:[#allocation2 + $0xf0] sm:$0xff] }
 0x27e   : > { %v1736_v43 = vadd.f32 %v1704_v27, %v1604_v13  ;;  %v2403_v50 = vmul.f32 %v6206_v14, %v2367_v58  ;;  %v2103_v8 = vmul.f32 %v2366_v7, %v6187_v22  ;;  %v1458_v24 = vadd.f32 %v6504_v46, %v6159_v48 }
 0x27f   : > { %v6646_v34 = vadd.f32 %v6256_v17, %v2434_v42  ;;  %v2335_v61 = vadd.f32 %v2303_v11, %v2235_v1  ;;  %v2035_v28 = vadd.f32 %v2003_v51, %v1935_v23  ;;  %v2204_v47 = vmul.f32 %v6193_v2, %v2168_v53 }
 0x280   : > { %v1836_v9 = vadd.f32 %v1804_v37, %v1736_v43  ;;  %1549 = vst.msk [vmem:[#allocation2 + $0x189] sm:$0xff] %vm1461_vm1, %v1458_v24  ;;  %v1453_v26 = vadd.f32 %v6159_v48, %v6511_v15  ;;  %v1605_v32 = vmul.f32 %v6588_v25, %v6152_v39  ;;  %v1705_v63 = vmul.f32 %v2266_v33, %v6154_v55  ;;  %v2269_v37 = vld [vmem:[#allocation2 + $0xf1] sm:$0xff] }
 0x281   : > { %2550 = vrot.lane.b32.xlu1 %v6646_v34, %s5418_s1  ;;  %v2435_v46 = vadd.f32 %v2403_v50, %v2335_v61  ;;  %v2135_v59 = vadd.f32 %v2103_v8, %v2035_v28  ;;  %v2004_v13 = vmul.f32 %v2267_v41, %v6180_v6  ;;  %v2304_v30 = vmul.f32 %v6195_v16, %v2268_v31  ;;  %v2170_v61 = vld [vmem:[#allocation2 + $0xf8] sm:$0xff] }
 0x282   : > { %v1936_v29 = vadd.f32 %v1904_v36, %v1836_v9  ;;  %1548 = vst.msk [vmem:[#allocation2 + $0x181] sm:$0xff] %vm1461_vm1, %v1453_v26  ;;  %v1737_v48 = vadd.f32 %v1705_v63, %v1605_v32  ;;  %v1805_v15 = vmul.f32 %v2366_v7, %v6166_v21  ;;  %v1905_v25 = vmul.f32 %v2168_v53, %v6185_v18  ;;  %v2369_v36 = vld [vmem:[#allocation2 + $0xf2] sm:$0xff] }
 0x283   : > { %v6663_v33 = vadd.f32 %v6256_v17, %v2435_v46  ;;  %v2236_v57 = vadd.f32 %v2204_v47, %v2135_v59  ;;  %v2104_v11 = vmul.f32 %v2367_v58, %v6187_v22  ;;  %v2404_v51 = vmul.f32 %v6206_v14, %v2368_v45  ;;  %v2270_v63 = vld [vmem:[#allocation2 + $0xf9] sm:$0xff] }
 0x284   : > { %v2036_v27 = vadd.f32 %v2004_v13, %v1936_v29  ;;  %v1837_v42 = vadd.f32 %v1805_v15, %v1737_v48  ;;  %v1606_v1 = vmul.f32 %v6611_v56, %v6152_v39  ;;  %v1706_v23 = vmul.f32 %v2267_v41, %v6154_v55  ;;  %v2370_v15 = vld [vmem:[#allocation2 + $0xfa] sm:$0xff] }
 0x285   : > { %2552 = vrot.lane.b32.xlu0 %v6663_v33, %s5418_s1  ;;  %v2336_v7 = vadd.f32 %v2304_v30, %v2236_v57  ;;  %v2205_v50 = vmul.f32 %v6193_v2, %v2169_v49  ;;  %v2005_v8 = vmul.f32 %v2268_v31, %v6180_v6  ;;  %v1806_v9 = vmul.f32 %v2367_v58, %v6166_v21 }
 0x286   : > { %v2136_v43 = vadd.f32 %v2104_v11, %v2036_v27  ;;  %v1937_v24 = vadd.f32 %v1905_v25, %v1837_v42  ;;  %v1738_v28 = vadd.f32 %v1706_v23, %v1606_v1  ;;  %v1906_v47 = vmul.f32 %v2169_v49, %v6185_v18 }
 0x287   : > { %v2436_v26 = vadd.f32 %v2404_v51, %v2336_v7  ;;  %v2305_v41 = vmul.f32 %v6195_v16, %v2269_v37  ;;  %v2405_v32 = vmul.f32 %v6206_v14, %v2369_v36  ;;  %v2105_v59 = vmul.f32 %v2368_v45, %v6187_v22 }
 0x288   : > { %v2237_v56 = vadd.f32 %v2205_v50, %v2136_v43  ;;  %v2037_v46 = vadd.f32 %v2005_v8, %v1937_v24  ;;  %v1838_v29 = vadd.f32 %v1806_v9, %v1738_v28  ;;  %v1607_v13 = vmul.f32 %v2168_v53, %v6152_v39  ;;  %v2171_v53 = vld [vmem:[#allocation2 + $0x108] sm:$0xff] }
 0x289   : > { %v6681_v30 = vadd.f32 %v6256_v17, %v2436_v26  ;;  %v2206_v58 = vmul.f32 %v6193_v2, %v2170_v61  ;;  %v1707_v25 = vmul.f32 %v2268_v31, %v6154_v55  ;;  %v2306_v27 = vmul.f32 %v6195_v16, %v2270_v63  ;;  %v2271_v28 = vld [vmem:[#allocation2 + $0x109] sm:$0xff] }
 0x28a   : > { %v2337_v48 = vadd.f32 %v2305_v41, %v2237_v56  ;;  %v2137_v57 = vadd.f32 %v2105_v59, %v2037_v46  ;;  %v1938_v11 = vadd.f32 %v1906_v47, %v1838_v29  ;;  %v2006_v51 = vmul.f32 %v2269_v37, %v6180_v6  ;;  %v2371_v9 = vld [vmem:[#allocation2 + $0x10a] sm:$0xff] }
 0x28b   : > { %2554 = vrot.lane.b32.xlu1 %v6681_v30, %s5418_s1  ;;  %v1739_v1 = vadd.f32 %v1707_v25, %v1607_v13  ;;  %v1807_v23 = vmul.f32 %v2368_v45, %v6166_v21  ;;  %v1907_v7 = vmul.f32 %v2170_v61, %v6185_v18  ;;  %v2406_v50 = vmul.f32 %v6206_v14, %v2370_v15  ;;  %v2172_v29 = vld [vmem:[#allocation2 + $0x110] sm:$0xff] }
 0x28c   : > { %v2437_v42 = vadd.f32 %v2405_v32, %v2337_v48  ;;  %v2238_v43 = vadd.f32 %v2206_v58, %v2137_v57  ;;  %v2038_v31 = vadd.f32 %v2006_v51, %v1938_v11  ;;  %v2106_v8 = vmul.f32 %v2369_v36, %v6187_v22 }
 0x28d   : > { %v1839_v47 = vadd.f32 %v1807_v23, %v1739_v1  ;;  %v1608_v26 = vmul.f32 %v2169_v49, %v6152_v39  ;;  %v1708_v56 = vmul.f32 %v2269_v37, %v6154_v55  ;;  %v2207_v32 = vmul.f32 %v6193_v2, %v2171_v53 }
 0x28e   : > { %v6694_v24 = vadd.f32 %v6256_v17, %v2437_v42  ;;  %v2338_v41 = vadd.f32 %v2306_v27, %v2238_v43  ;;  %v2138_v45 = vadd.f32 %v2106_v8, %v2038_v31  ;;  %v2007_v46 = vmul.f32 %v2270_v63, %v6180_v6  ;;  %v2272_v27 = vld [vmem:[#allocation2 + $0x111] sm:$0xff] }
 0x28f   : > { %v1939_v59 = vadd.f32 %v1907_v7, %v1839_v47  ;;  %v1740_v13 = vadd.f32 %v1708_v56, %v1608_v26  ;;  %v1808_v48 = vmul.f32 %v2369_v36, %v6166_v21  ;;  %v1908_v58 = vmul.f32 %v2171_v53, %v6185_v18  ;;  %v2372_v43 = vld [vmem:[#allocation2 + $0x112] sm:$0xff] }
 0x290   : > { %2556 = vrot.lane.b32.xlu0 %v6694_v24, %s5418_s1  ;;  %v2438_v25 = vadd.f32 %v2406_v50, %v2338_v41  ;;  %v2239_v49 = vadd.f32 %v2207_v32, %v2138_v45  ;;  %v2307_v37 = vmul.f32 %v6195_v16, %v2271_v28  ;;  %v2407_v57 = vmul.f32 %v6206_v14, %v2371_v9 }
 0x291   : > { %v2039_v11 = vadd.f32 %v2007_v46, %v1939_v59  ;;  %v2107_v51 = vmul.f32 %v2370_v15, %v6187_v22  ;;  %v1840_v42 = vadd.f32 %v1808_v48, %v1740_v13  ;;  %v1609_v1 = vmul.f32 %v2170_v61, %v6152_v39  ;;  %v2173_v61 = vld [vmem:[#allocation2 + $0x120] sm:$0xff] }
 0x292   : > { %v6709_v23 = vadd.f32 %v6256_v17, %v2438_v25  ;;  %v2339_v7 = vadd.f32 %v2307_v37, %v2239_v49  ;;  %v2208_v36 = vmul.f32 %v6193_v2, %v2172_v29  ;;  %v1709_v50 = vmul.f32 %v2270_v63, %v6154_v55  ;;  %v2373_v25 = vld [vmem:[#allocation2 + $0x122] sm:$0xff] }
 0x293   : > { %v2139_v31 = vadd.f32 %v2107_v51, %v2039_v11  ;;  %v2308_v8 = vmul.f32 %v6195_v16, %v2272_v27  ;;  %v1940_v47 = vadd.f32 %v1908_v58, %v1840_v42  ;;  %v2008_v26 = vmul.f32 %v2271_v28, %v6180_v6  ;;  %v2273_v58 = vld [vmem:[#allocation2 + $0x121] sm:$0xff] }
 0x294   : > { %2558 = vrot.lane.b32.xlu1 %v6709_v23, %s5418_s1  ;;  %v2439_v56 = vadd.f32 %v2407_v57, %v2339_v7  ;;  %v1741_v41 = vadd.f32 %v1709_v50, %v1609_v1  ;;  %v1809_v45 = vmul.f32 %v2370_v15, %v6166_v21  ;;  %v1909_v32 = vmul.f32 %v2172_v29, %v6185_v18  ;;  %v2174_v1 = vld [vmem:[#allocation2 + $0x128] sm:$0xff] }
 0x295   : > { %v2240_v46 = vadd.f32 %v2208_v36, %v2139_v31  ;;  %v2408_v59 = vmul.f32 %v6206_v14, %v2372_v43  ;;  %v2040_v63 = vadd.f32 %v2008_v26, %v1940_v47  ;;  %v2108_v13 = vmul.f32 %v2371_v9, %v6187_v22  ;;  %v2274_v26 = vld [vmem:[#allocation2 + $0x129] sm:$0xff] }
 0x296   : > { %v6722_v48 = vadd.f32 %v6256_v17, %v2439_v56  ;;  %v1841_v49 = vadd.f32 %v1809_v45, %v1741_v41  ;;  %v1610_v37 = vmul.f32 %v2171_v53, %v6152_v39  ;;  %v1710_v57 = vmul.f32 %v2271_v28, %v6154_v55 }
 0x297   : > { %v2340_v11 = vadd.f32 %v2308_v8, %v2240_v46  ;;  %v2140_v15 = vadd.f32 %v2108_v13, %v2040_v63  ;;  %v2209_v51 = vmul.f32 %v6193_v2, %v2173_v61  ;;  %v2009_v42 = vmul.f32 %v2272_v27, %v6180_v6  ;;  %v6736_v8 = vld [vmem:[%s8166_s5 + $0x8] ss:$0 sm:$0xff]  ;;  %v2374_v63 = vld [vmem:[#allocation2 + $0x12a] sm:$0xff] }
 0x298   : > { %2560 = vrot.lane.b32.xlu0 %v6722_v48, %s5418_s1  ;;  %v1941_v14 = vadd.f32 %v1909_v32, %v1841_v49  ;;  %v1742_v7 = vadd.f32 %v1710_v57, %v1610_v37  ;;  %v1810_v36 = vmul.f32 %v2371_v9, %v6166_v21  ;;  %v1910_v50 = vmul.f32 %v2173_v61, %v6185_v18 }
 0x299   : > { %v2440_v31 = vadd.f32 %v2408_v59, %v2340_v11  ;;  %v2241_v53 = vadd.f32 %v2209_v51, %v2140_v15  ;;  %v2309_v28 = vmul.f32 %v6195_v16, %v2273_v58  ;;  %v2409_v47 = vmul.f32 %v6736_v8, %v2373_v25 }
 0x29a   : > { %v2041_v56 = vadd.f32 %v2009_v42, %v1941_v14  ;;  %v2109_v41 = vmul.f32 %v2372_v43, %v6187_v22  ;;  %v1842_v45 = vadd.f32 %v1810_v36, %v1742_v7  ;;  %v1611_v9 = vmul.f32 %v2172_v29, %v6152_v39  ;;  %v2175_v29 = vld [vmem:[#allocation2 + $0x138] sm:$0xff] }
 0x29b   : > { %v6742_v32 = vadd.f32 %v6256_v17, %v2440_v31  ;;  %v2341_v46 = vadd.f32 %v2309_v28, %v2241_v53  ;;  %v2210_v59 = vmul.f32 %v6193_v2, %v2174_v1  ;;  %v1711_v13 = vmul.f32 %v2272_v27, %v6154_v55  ;;  %v2275_v53 = vld [vmem:[#allocation2 + $0x139] sm:$0xff] }
 0x29c   : > { %v2141_v49 = vadd.f32 %v2109_v41, %v2041_v56  ;;  %v2310_v37 = vmul.f32 %v6195_v16, %v2274_v26  ;;  %v1942_v57 = vadd.f32 %v1910_v50, %v1842_v45  ;;  %v2010_v11 = vmul.f32 %v2273_v58, %v6180_v6  ;;  %v2375_v28 = vld [vmem:[#allocation2 + $0x13a] sm:$0xff] }
 0x29d   : > { %2562 = vrot.lane.b32.xlu1 %v6742_v32, %s5418_s1  ;;  %v2441_v15 = vadd.f32 %v2409_v47, %v2341_v46  ;;  %v1743_v51 = vadd.f32 %v1711_v13, %v1611_v9  ;;  %v1811_v42 = vmul.f32 %v2372_v43, %v6166_v21  ;;  %v1911_v14 = vmul.f32 %v2174_v1, %v6185_v18  ;;  %v2176_v13 = vld [vmem:[#allocation2 + $0x140] sm:$0xff] }
 0x29e   : > { %v2242_v7 = vadd.f32 %v2210_v59, %v2141_v49  ;;  %v2410_v36 = vmul.f32 %v6736_v8, %v2374_v63  ;;  %v2042_v27 = vadd.f32 %v2010_v11, %v1942_v57  ;;  %v2110_v31 = vmul.f32 %v2373_v25, %v6187_v22 }
 0x29f   : > { %v6755_v50 = vadd.f32 %v6256_v17, %v2441_v15  ;;  %v1843_v56 = vadd.f32 %v1811_v42, %v1743_v51  ;;  %v1612_v47 = vmul.f32 %v2173_v61, %v6152_v39  ;;  %v1712_v41 = vmul.f32 %v2273_v58, %v6154_v55  ;;  %v2276_v15 = vld [vmem:[#allocation2 + $0x141] sm:$0xff] }
 0x2a0   : > { %v2342_v45 = vadd.f32 %v2310_v37, %v2242_v7  ;;  %v2142_v43 = vadd.f32 %v2110_v31, %v2042_v27  ;;  %v2211_v9 = vmul.f32 %v6193_v2, %v2175_v29  ;;  %v2011_v46 = vmul.f32 %v2274_v26, %v6180_v6 }
 0x2a1   : > { %2564 = vrot.lane.b32.xlu0 %v6755_v50, %s5418_s1  ;;  %v1943_v59 = vadd.f32 %v1911_v14, %v1843_v56  ;;  %v1744_v17 = vadd.f32 %v1712_v41, %v1612_v47  ;;  %v1812_v49 = vmul.f32 %v2373_v25, %v6166_v21  ;;  %v1912_v57 = vmul.f32 %v2175_v29, %v6185_v18  ;;  %v6772_v14 = vld [vmem:[%s8167_s6] ss:$0 sm:$0xff]  ;;  %v2376_v56 = vld [vmem:[#allocation2 + $0x142] sm:$0xff] }
 0x2a2   : > { %v2442_v11 = vadd.f32 %v2410_v36, %v2342_v45  ;;  %v2243_v61 = vadd.f32 %v2211_v9, %v2142_v43  ;;  %v2311_v58 = vmul.f32 %v6195_v16, %v2275_v53  ;;  %v2411_v37 = vmul.f32 %v6736_v8, %v2375_v28 }
 0x2a3   : > { %v2043_v51 = vadd.f32 %v2011_v46, %v1943_v59  ;;  %v2111_v42 = vmul.f32 %v2374_v63, %v6187_v22  ;;  %v1844_v7 = vadd.f32 %v1812_v49, %v1744_v17  ;;  %v1613_v27 = vmul.f32 %v2174_v1, %v6152_v39  ;;  %v2177_v46 = vld [vmem:[#allocation2 + $0x150] sm:$0xff] }
 0x2a4   : > { %v6775_v25 = vadd.f32 %v6772_v14, %v2442_v11  ;;  %v2343_v36 = vadd.f32 %v2311_v58, %v2243_v61  ;;  %v2212_v31 = vmul.f32 %v6193_v2, %v2176_v13  ;;  %v1713_v47 = vmul.f32 %v2274_v26, %v6154_v55 }
 0x2a5   : > { %v2143_v41 = vadd.f32 %v2111_v42, %v2043_v51  ;;  %v2312_v45 = vmul.f32 %v6195_v16, %v2276_v15  ;;  %v1944_v43 = vadd.f32 %v1912_v57, %v1844_v7  ;;  %v2012_v1 = vmul.f32 %v2275_v53, %v6180_v6  ;;  %v2277_v51 = vld [vmem:[#allocation2 + $0x151] sm:$0xff] }
 0x2a6   : > { %2566 = vrot.lane.b32.xlu1 %v6775_v25, %s5418_s1  ;;  %v2443_v9 = vadd.f32 %v2411_v37, %v2343_v36  ;;  %v1745_v59 = vadd.f32 %v1713_v47, %v1613_v27  ;;  %v1813_v17 = vmul.f32 %v2374_v63, %v6166_v21  ;;  %v1913_v49 = vmul.f32 %v2176_v13, %v6185_v18  ;;  %v2377_v42 = vld [vmem:[#allocation2 + $0x152] sm:$0xff] }
 0x2a7   : > { %v2244_v11 = vadd.f32 %v2212_v31, %v2143_v41  ;;  %v2412_v61 = vmul.f32 %v6736_v8, %v2376_v56  ;;  %v2044_v26 = vadd.f32 %v2012_v1, %v1944_v43  ;;  %v2112_v58 = vmul.f32 %v2375_v28, %v6187_v22  ;;  %v2178_v43 = vld [vmem:[#allocation2 + $0x158] sm:$0xff] }
 0x2a8   : > { %v6788_v57 = vadd.f32 %v6772_v14, %v2443_v9  ;;  %v1845_v7 = vadd.f32 %v1813_v17, %v1745_v59  ;;  %v1614_v37 = vmul.f32 %v2175_v29, %v6152_v39  ;;  %v1714_v27 = vmul.f32 %v2275_v53, %v6154_v55 }
 0x2a9   : > { %v2344_v36 = vadd.f32 %v2312_v45, %v2244_v11  ;;  %v2144_v63 = vadd.f32 %v2112_v58, %v2044_v26  ;;  %v2213_v47 = vmul.f32 %v6193_v2, %v2177_v46  ;;  %v2013_v31 = vmul.f32 %v2276_v15, %v6180_v6  ;;  %v2278_v11 = vld [vmem:[#allocation2 + $0x159] sm:$0xff] }
 0x2aa   : > { %2568 = vrot.lane.b32.xlu0 %v6788_v57, %s5418_s1  ;;  %v1945_v41 = vadd.f32 %v1913_v49, %v1845_v7  ;;  %v1746_v1 = vadd.f32 %v1714_v27, %v1614_v37  ;;  %v1814_v9 = vmul.f32 %v2375_v28, %v6166_v21  ;;  %v1914_v59 = vmul.f32 %v2177_v46, %v6185_v18  ;;  %v2378_v37 = vld [vmem:[#allocation2 + $0x15a] sm:$0xff] }
 0x2ab   : > { %v2444_v17 = vadd.f32 %v2412_v61, %v2344_v36  ;;  %v2245_v29 = vadd.f32 %v2213_v47, %v2144_v63  ;;  %v2313_v53 = vmul.f32 %v6195_v16, %v2277_v51  ;;  %v2413_v45 = vmul.f32 %v6736_v8, %v2377_v42 }
 0x2ac   : > { %v2045_v26 = vadd.f32 %v2013_v31, %v1945_v41  ;;  %v2113_v58 = vmul.f32 %v2376_v56, %v6187_v22  ;;  %v1846_v19 = vadd.f32 %v1814_v9, %v1746_v1  ;;  %v1615_v5 = vmul.f32 %v2176_v13, %v6152_v39  ;;  %v2179_v13 = vld [vmem:[#allocation2 + $0x168] sm:$0xff] }
 0x2ad   : > { %v6803_v49 = vadd.f32 %v6772_v14, %v2444_v17  ;;  %v2345_v7 = vadd.f32 %v2313_v53, %v2245_v29  ;;  %v2214_v28 = vmul.f32 %v6193_v2, %v2178_v43  ;;  %v1715_v61 = vmul.f32 %v2276_v15, %v6154_v55 }
 0x2ae   : > { %v2145_v27 = vadd.f32 %v2113_v58, %v2045_v26  ;;  %v2314_v36 = vmul.f32 %v6195_v16, %v2278_v11  ;;  %v1946_v63 = vadd.f32 %v1914_v59, %v1846_v19  ;;  %v2014_v47 = vmul.f32 %v2277_v51, %v6180_v6  ;;  %v2279_v59 = vld [vmem:[#allocation2 + $0x169] sm:$0xff] }
 0x2af   : > { %2570 = vrot.lane.b32.xlu1 %v6803_v49, %s5418_s1  ;;  %v2445_v31 = vadd.f32 %v2413_v45, %v2345_v7  ;;  %v1747_v41 = vadd.f32 %v1715_v61, %v1615_v5  ;;  %v1815_v1 = vmul.f32 %v2376_v56, %v6166_v21  ;;  %v1915_v9 = vmul.f32 %v2178_v43, %v6185_v18  ;;  %v2379_v26 = vld [vmem:[#allocation2 + $0x16a] sm:$0xff] }
 0x2b0   : > { %v2246_v17 = vadd.f32 %v2214_v28, %v2145_v27  ;;  %v2414_v29 = vmul.f32 %v6736_v8, %v2378_v37  ;;  %v2046_v15 = vadd.f32 %v2014_v47, %v1946_v63  ;;  %v2114_v53 = vmul.f32 %v2377_v42, %v6187_v22  ;;  %v2180_v63 = vld [vmem:[#allocation2 + $0x170] sm:$0xff] }
 0x2b1   : > { %v6816_v19 = vadd.f32 %v6772_v14, %v2445_v31  ;;  %v1847_v58 = vadd.f32 %v1815_v1, %v1747_v41  ;;  %v1616_v45 = vmul.f32 %v2177_v46, %v6152_v39  ;;  %v1716_v5 = vmul.f32 %v2277_v51, %v6154_v55 }
 0x2b2   : > { %v2346_v7 = vadd.f32 %v2314_v36, %v2246_v17  ;;  %v2146_v56 = vadd.f32 %v2114_v53, %v2046_v15  ;;  %v2215_v61 = vmul.f32 %v6193_v2, %v2179_v13  ;;  %v2015_v28 = vmul.f32 %v2278_v11, %v6180_v6  ;;  %v2280_v17 = vld [vmem:[#allocation2 + $0x171] sm:$0xff] }
 0x2b3   : > { %8216 = vst [vmem:[#allocation4_spill] sm:$0xff] %v6816_v19  ;;  %2572 = vrot.lane.b32.xlu0 %v6816_v19, %s5418_s1  ;;  %v1947_v27 = vadd.f32 %v1915_v9, %v1847_v58  ;;  %v1748_v47 = vadd.f32 %v1716_v5, %v1616_v45  ;;  %v1816_v31 = vmul.f32 %v2377_v42, %v6166_v21  ;;  %v2380_v45 = vld [vmem:[#allocation2 + $0x172] sm:$0xff] }
 0x2b4   : > { %v1916_v41 = vmul.f32 %v2179_v13, %v6185_v18  ;;  %v2446_v1 = vadd.f32 %v2414_v29, %v2346_v7  ;;  %v2247_v46 = vadd.f32 %v2215_v61, %v2146_v56  ;;  %v2315_v51 = vmul.f32 %v6195_v16, %v2279_v59 }
 0x2b5   : > { %v2415_v36 = vmul.f32 %v6736_v8, %v2379_v26  ;;  %v2047_v15 = vadd.f32 %v2015_v28, %v1947_v27  ;;  %v2115_v53 = vmul.f32 %v2378_v37, %v6187_v22  ;;  %v1848_v4 = vadd.f32 %v1816_v31, %v1748_v47 }
 0x2b6   : > { %v1617_v19 = vmul.f32 %v2178_v43, %v6152_v39  ;;  %v6831_v9 = vadd.f32 %v6772_v14, %v2446_v1  ;;  %v2347_v58 = vadd.f32 %v2315_v51, %v2247_v46  ;;  %v2216_v42 = vmul.f32 %v6193_v2, %v2180_v63  ;;  %v2181_v43 = vld [vmem:[#allocation2 + $0x180] sm:$0xff] }
 0x2b7   : > { %v1717_v29 = vmul.f32 %v2278_v11, %v6154_v55  ;;  %v2147_v5 = vadd.f32 %v2115_v53, %v2047_v15  ;;  %v2316_v7 = vmul.f32 %v6195_v16, %v2280_v17  ;;  %v1948_v56 = vadd.f32 %v1916_v41, %v1848_v4  ;;  %v2281_v41 = vld [vmem:[#allocation2 + $0x181] sm:$0xff] }
 0x2b8   : > { %8217 = vst [vmem:[#allocation5_spill] sm:$0xff] %v6831_v9  ;;  %v2016_v61 = vmul.f32 %v2279_v59, %v6180_v6  ;;  %2574 = vrot.lane.b32.xlu1 %v6831_v9, %s5418_s1  ;;  %v2447_v28 = vadd.f32 %v2415_v36, %v2347_v58  ;;  %v1817_v47 = vmul.f32 %v2378_v37, %v6166_v21  ;;  %v2381_v15 = vld [vmem:[#allocation2 + $0x182] sm:$0xff] }
 0x2b9   : > { %v1749_v27 = vadd.f32 %v1717_v29, %v1617_v19  ;;  %v1917_v31 = vmul.f32 %v2180_v63, %v6185_v18  ;;  %v2248_v1 = vadd.f32 %v2216_v42, %v2147_v5  ;;  %v2416_v46 = vmul.f32 %v6736_v8, %v2380_v45 }
 0x2ba   : > { %v2048_v11 = vadd.f32 %v2016_v61, %v1948_v56  ;;  %v2116_v51 = vmul.f32 %v2379_v26, %v6187_v22  ;;  %v6844_v4 = vadd.f32 %v6772_v14, %v2447_v28  ;;  %v1618_v36 = vmul.f32 %v2179_v13, %v6152_v39  ;;  %v2182_v56 = vld [vmem:[#allocation2 + $0x188] sm:$0xff] }
 0x2bb   : > { %v1849_v53 = vadd.f32 %v1817_v47, %v1749_v27  ;;  %v1718_v19 = vmul.f32 %v2279_v59, %v6154_v55  ;;  %v2348_v58 = vadd.f32 %v2316_v7, %v2248_v1  ;;  %v2217_v29 = vmul.f32 %v6193_v2, %v2181_v43  ;;  %v2282_v1 = vld [vmem:[#allocation2 + $0x189] sm:$0xff] }
 0x2bc   : > { %8218 = vst [vmem:[#allocation6_spill] sm:$0xff] %v6844_v4  ;;  %v2148_v37 = vadd.f32 %v2116_v51, %v2048_v11  ;;  %v2017_v42 = vmul.f32 %v2280_v17, %v6180_v6  ;;  %2576 = vrot.lane.b32.xlu0 %v6844_v4, %s5418_s1  ;;  %v1818_v28 = vmul.f32 %v2379_v26, %v6166_v21 }
 0x2bd   : > { %v1949_v5 = vadd.f32 %v1917_v31, %v1849_v53  ;;  %v1750_v61 = vadd.f32 %v1718_v19, %v1618_v36  ;;  %v1918_v27 = vmul.f32 %v2181_v43, %v6185_v18  ;;  %v2448_v47 = vadd.f32 %v2416_v46, %v2348_v58  ;;  %v2183_v43 = vld [vmem:[#allocation2 + $0x198] sm:$0xff] }
 0x2be   : > { %v2249_v13 = vadd.f32 %v2217_v29, %v2148_v37  ;;  %v2317_v59 = vmul.f32 %v6195_v16, %v2281_v41  ;;  %v2417_v7 = vmul.f32 %v6736_v8, %v2381_v15  ;;  %v2117_v51 = vmul.f32 %v2380_v45, %v6187_v22 }
 0x2bf   : > { %v2049_v11 = vadd.f32 %v2017_v42, %v1949_v5  ;;  %v1850_v9 = vadd.f32 %v1818_v28, %v1750_v61  ;;  %v1619_v4 = vmul.f32 %v2180_v63, %v6152_v39  ;;  %v6859_v31 = vadd.f32 %v6772_v14, %v2448_v47  ;;  %v2382_v39 = vld [vmem:[#allocation2 + $0x18a] sm:$0xff]  ;;  %v2283_v63 = vld [vmem:[#allocation2 + $0x199] sm:$0xff] }
 0x2c0   : > { %v2349_v53 = vadd.f32 %v2317_v59, %v2249_v13  ;;  %v2218_v26 = vmul.f32 %v6193_v2, %v2182_v56  ;;  %v1719_v46 = vmul.f32 %v2280_v17, %v6154_v55  ;;  %v2318_v19 = vmul.f32 %v6195_v16, %v2282_v1  ;;  %v2527_v13 = vpop.permute.xlu1 %2526 }
 0x2c1   : > { %v2149_v36 = vadd.f32 %v2117_v51, %v2049_v11  ;;  %v1950_v58 = vadd.f32 %v1918_v27, %v1850_v9  ;;  %v2018_v37 = vmul.f32 %v2281_v41, %v6180_v6  ;;  %2578 = vrot.lane.b32.xlu1 %v6859_v31, %s5418_s1  ;;  %v1819_v5 = vmul.f32 %v2380_v45, %v6166_v21  ;;  %v2383_v41 = vld [vmem:[#allocation2 + $0x19a] sm:$0xff] }
 0x2c2   : > { %v2449_v29 = vadd.f32 %v2417_v7, %v2349_v53  ;;  %v1751_v42 = vadd.f32 %v1719_v46, %v1619_v4  ;;  %v1919_v61 = vmul.f32 %v2182_v56, %v6185_v18  ;;  %v2118_v55 = vmul.f32 %v2381_v15, %v6187_v22  ;;  %v2184_v45 = vld [vmem:[#allocation2 + $0x1a0] sm:$0xff] }
 0x2c3   : > { %v2250_v28 = vadd.f32 %v2218_v26, %v2149_v36  ;;  %v2050_v47 = vadd.f32 %v2018_v37, %v1950_v58  ;;  %v2219_v17 = vmul.f32 %v6193_v2, %v2183_v43  ;;  %v2418_v7 = vmul.f32 %v6736_v8, %v2382_v39  ;;  %v2284_v53 = vld [vmem:[#allocation2 + $0x1a1] sm:$0xff] }
 0x2c4   : > { %v6872_v9 = vadd.f32 %v6772_v14, %v2449_v29  ;;  %v1851_v27 = vadd.f32 %v1819_v5, %v1751_v42  ;;  %v2319_v21 = vmul.f32 %v6195_v16, %v2283_v63  ;;  %v2019_v15 = vmul.f32 %v2282_v1, %v6180_v6  ;;  %v2384_v58 = vld [vmem:[#allocation2 + $0x1a2] sm:$0xff]  ;;  %v2529_v63 = vpop.permute.xlu1 %2528  ;;  %v2525_v5 = vpop.permute.xlu0 %2524 }
 0x2c5   : > { %v2350_v59 = vadd.f32 %v2318_v19, %v2250_v28  ;;  %v2150_v4 = vadd.f32 %v2118_v55, %v2050_v47  ;;  %v2419_v51 = vmul.f32 %v6736_v8, %v2383_v41  ;;  %v2119_v43 = vmul.f32 %v2382_v39, %v6187_v22 }
 0x2c6   : > { %2580 = vrot.lane.b32.xlu0 %v6872_v9, %s5418_s1  ;;  %v1951_v18 = vadd.f32 %v1919_v61, %v1851_v27  ;;  %v2220_v46 = vmul.f32 %v6193_v2, %v2184_v45  ;;  %v2320_v29 = vmul.f32 %v6195_v16, %v2284_v53  ;;  %v2420_v42 = vmul.f32 %v6736_v8, %v2384_v58 }
 0x2c7   : > { %v2450_v56 = vadd.f32 %v2418_v7, %v2350_v59  ;;  %v2251_v11 = vadd.f32 %v2219_v17, %v2150_v4  ;;  %v6895_v39 = vmul.f32 %v2527_v13, %v6274_v40  ;;  %v6898_v16 = vmul.f32 %v2525_v5, %v6277_v54  ;;  %v2723_v54 = vld [vmem:[%s8168_s7] sm:$0xff] }
 0x2c8   : > { %v2051_v26 = vadd.f32 %v2019_v15, %v1951_v18  ;;  %v2531_v28 = vpop.permute.xlu1 %2530  ;;  %v6901_v47 = vmul.f32 %v2529_v63, %v6309_v35  ;;  %v2724_v35 = vld [vmem:[%s8168_s7 + $0x8] sm:$0xff]  ;;  %v5419_v41 = vmov 0.0|0.0   ;;  %v2533_v59 = vpop.permute.xlu0 %2532 }
 0x2c9   : > { %v6883_v36 = vadd.f32 %v6772_v14, %v2450_v56  ;;  %v2351_v19 = vadd.f32 %v2319_v21, %v2251_v11  ;;  %v2653_v55 = vsel %vm635_vm0, %v6895_v39, 0.0  ;;  %v2652_v17 = vsel %vm635_vm0, %v6898_v16, 0.0  ;;  %5220 = vmatprep.subr.bf16.mxu1 %v5419_v41 }
 0x2ca   : > { %v2151_v37 = vadd.f32 %v2119_v43, %v2051_v26  ;;  %v6911_v40 = vmul.f32 %v2531_v28, %v6334_v62  ;;  %v5221_v27 = vpack.c.bf16 %v2724_v35, %v2723_v54  ;;  %v8219_v62 = vmov 0.0  }
 0x2cb   : > { %2582 = vrot.lane.b32.xlu1 %v6883_v36, %s5418_s1  ;;  %v2451_v6 = vadd.f32 %v2419_v51, %v2351_v19  ;;  %5057 = vmatprep.mubr.msk.f32.mxu1 %vm5420_vm3, %v8219_v62  ;;  %v2654_v13 = vadd.f32 %v2653_v55, %v2652_v17  ;;  %v6927_v45 = vmul.f32 %v2533_v59, %v6379_v12 }
 0x2cc   : > { %v2252_v1 = vadd.f32 %v2220_v46, %v2151_v37  ;;  %v2657_v7 = vsel %vm635_vm0, %v6911_v40, 0.0  ;;  %5222 = vmatpush3.bf16.msra.mxu1 %v5221_v27 }
 0x2cd   : > { %v6890_v22 = vadd.f32 %v6772_v14, %v2451_v6  ;;  %v2659_v56 = vsel %vm635_vm0, %v6927_v45, 0.0 }
 0x2ce   : > { %v2352_v2 = vadd.f32 %v2320_v29, %v2252_v1  ;;  %v2535_v21 = vpop.permute.xlu1 %2534 }
 0x2cf   : > { %2584 = vrot.lane.b32.xlu0 %v6890_v22, %s5418_s1  ;;  %v6930_v15 = vmul.f32 %v2535_v21, %v6416_v10 }
 0x2d0   : > { %v2452_v61 = vadd.f32 %v2420_v42, %v2352_v2 }
 0x2d1   : > { %v2661_v53 = vsel %vm635_vm0, %v6930_v15, 0.0 }
 0x2d2   : > { %v6904_v8 = vadd.f32 %v6772_v14, %v2452_v61  ;;  %v2655_v14 = vsel %vm635_vm0, %v6901_v47, 0.0  ;;  %v2537_v51 = vpop.permute.xlu0 %2536 }
 0x2d3   : > { %v2656_v4 = vadd.f32 %v2655_v14, %v2654_v13  ;;  %v6937_v43 = vmul.f32 %v2537_v51, %v6454_v60 }
 0x2d4   : > { %2586 = vrot.lane.b32.xlu1 %v6904_v8, %s5418_s1 }
 0x2d5   : > { %v2658_v18 = vadd.f32 %v2657_v7, %v2656_v4  ;;  %v2663_v10 = vsel %vm635_vm0, %v6937_v43, 0.0 }
 0x2d7   : > { %v2660_v11 = vadd.f32 %v2659_v56, %v2658_v18  ;;  %v2539_v26 = vpop.permute.xlu1 %2538 }
 0x2d8   : > { %v6940_v12 = vmul.f32 %v2539_v26, %v6485_v52 }
 0x2d9   : > { %v2662_v46 = vadd.f32 %v2661_v53, %v2660_v11 }
 0x2da   : > { %v2665_v37 = vsel %vm635_vm0, %v6940_v12, 0.0 }
 0x2db   : > { %v2664_v19 = vadd.f32 %v2663_v10, %v2662_v46  ;;  %v2541_v58 = vpop.permute.xlu0 %2540 }
 0x2dc   : > { %v6947_v63 = vmul.f32 %v2541_v58, %v6520_v38 }
 0x2dd   : > { %v2666_v6 = vadd.f32 %v2665_v37, %v2664_v19 }
 0x2de   : > { %v2667_v52 = vsel %vm635_vm0, %v6947_v63, 0.0 }
 0x2df   : > { %v2668_v1 = vadd.f32 %v2667_v52, %v2666_v6 }
 0x2e0   : > { %v2543_v29 = vpop.permute.xlu1 %2542 }
 0x2e1   : > { %v6950_v60 = vmul.f32 %v2543_v29, %v6552_v0 }
 0x2e3   : > { %v2669_v5 = vsel %vm635_vm0, %v6950_v60, 0.0 }
 0x2e4   : > { %v2670_v28 = vadd.f32 %v2669_v5, %v2668_v1 }
 0x2e5   : > { %v2545_v42 = vpop.permute.xlu0 %2544 }
 0x2e6   : > { %v6957_v61 = vmul.f32 %v2545_v42, %v6580_v3 }
 0x2e8   : > { %v2671_v0 = vsel %vm635_vm0, %v6957_v61, 0.0 }
 0x2e9   : > { %v2672_v55 = vadd.f32 %v2671_v0, %v2670_v28 }
 0x2ea   : > { %v2547_v2 = vpop.permute.xlu1 %2546 }
 0x2eb   : > { %v6960_v38 = vmul.f32 %v2547_v2, %v6604_v20 }
 0x2ed   : > { %v2673_v54 = vsel %vm635_vm0, %v6960_v38, 0.0 }
 0x2ee   : > { %v2549_v17 = vpop.permute.xlu0 %2548  ;;  %v2674_v41 = vadd.f32 %v2673_v54, %v2672_v55 }
 0x2ef   : > { %v6967_v14 = vmul.f32 %v2549_v17, %v6626_v44 }
 0x2f1   : > { %v2675_v20 = vsel %vm635_vm0, %v6967_v14, 0.0 }
 0x2f2   : > { %v2676_v27 = vadd.f32 %v2675_v20, %v2674_v41 }
 0x2f3   : > { %v2551_v35 = vpop.permute.xlu1 %2550 }
 0x2f4   : > { %v6970_v3 = vmul.f32 %v2551_v35, %v6646_v34 }
 0x2f6   : > { %v2677_v13 = vsel %vm635_vm0, %v6970_v3, 0.0 }
 0x2f7   : > { %v2553_v62 = vpop.permute.xlu0 %2552  ;;  %v2678_v4 = vadd.f32 %v2677_v13, %v2676_v27  ;;  %v8220_v27 = vld [vmem:[#allocation4_spill] sm:$0xff] }
 0x2f8   : > { %v6977_v7 = vmul.f32 %v2553_v62, %v6663_v33 }
 0x2fa   : > { %v2679_v34 = vsel %vm635_vm0, %v6977_v7, 0.0 }
 0x2fb   : > { %v2680_v21 = vadd.f32 %v2679_v34, %v2678_v4 }
 0x2fd   : > { %v2555_v59 = vpop.permute.xlu1 %2554 }
 0x2fe   : > { %v6980_v44 = vmul.f32 %v2555_v59, %v6681_v30 }
 0x300   : > { %v2681_v56 = vsel %vm635_vm0, %v6980_v44, 0.0 }
 0x301   : > { %v2682_v53 = vadd.f32 %v2681_v56, %v2680_v21  ;;  %v8222_v56 = vld [vmem:[#allocation6_spill] sm:$0xff] }
 0x302   : > { %v2557_v18 = vpop.permute.xlu0 %2556 }
 0x303   : > { %v6987_v51 = vmul.f32 %v2557_v18, %v6694_v24 }
 0x305   : > { %v2683_v30 = vsel %vm635_vm0, %v6987_v51, 0.0 }
 0x306   : > { %v2559_v11 = vpop.permute.xlu1 %2558  ;;  %v2684_v26 = vadd.f32 %v2683_v30, %v2682_v53 }
 0x307   : > { %v6990_v33 = vmul.f32 %v2559_v11, %v6709_v23 }
 0x309   : > { %v2685_v10 = vsel %vm635_vm0, %v6990_v33, 0.0 }
 0x30a   : > { %v2561_v46 = vpop.permute.xlu0 %2560  ;;  %v2686_v37 = vadd.f32 %v2685_v10, %v2684_v26 }
 0x30b   : > { %v6997_v58 = vmul.f32 %v2561_v46, %v6722_v48 }
 0x30d   : > { %v2687_v23 = vsel %vm635_vm0, %v6997_v58, 0.0 }
 0x30e   : > { %v2688_v29 = vadd.f32 %v2687_v23, %v2686_v37 }
 0x30f   : > { %v2563_v19 = vpop.permute.xlu1 %2562 }
 0x310   : > { %v7000_v24 = vmul.f32 %v2563_v19, %v6742_v32 }
 0x312   : > { %v2689_v52 = vsel %vm635_vm0, %v7000_v24, 0.0 }
 0x313   : > { %v2565_v6 = vpop.permute.xlu0 %2564  ;;  %v2690_v5 = vadd.f32 %v2689_v52, %v2688_v29 }
 0x314   : > { %v7007_v1 = vmul.f32 %v2565_v6, %v6755_v50 }
 0x316   : > { %v2691_v32 = vsel %vm635_vm0, %v7007_v1, 0.0 }
 0x317   : > { %v2692_v2 = vadd.f32 %v2691_v32, %v2690_v5 }
 0x318   : > { %v2567_v42 = vpop.permute.xlu1 %2566 }
 0x319   : > { %v7010_v48 = vmul.f32 %v2567_v42, %v6775_v25 }
 0x31b   : > { %v2693_v0 = vsel %vm635_vm0, %v7010_v48, 0.0 }
 0x31c   : > { %v2569_v28 = vpop.permute.xlu0 %2568  ;;  %v2694_v17 = vadd.f32 %v2693_v0, %v2692_v2 }
 0x31d   : > { %v7017_v55 = vmul.f32 %v2569_v28, %v6788_v57  ;;  %v8221_v57 = vld [vmem:[#allocation5_spill] sm:$0xff] }
 0x31f   : > { %v2695_v25 = vsel %vm635_vm0, %v7017_v55, 0.0 }
 0x320   : > { %v2696_v35 = vadd.f32 %v2695_v25, %v2694_v17 }
 0x321   : > { %v2571_v54 = vpop.permute.xlu1 %2570 }
 0x322   : > { %v7020_v50 = vmul.f32 %v2571_v54, %v6803_v49 }
 0x324   : > { %v2697_v20 = vsel %vm635_vm0, %v7020_v50, 0.0 }
 0x325   : > { %v2573_v41 = vpop.permute.xlu0 %2572  ;;  %v2698_v13 = vadd.f32 %v2697_v20, %v2696_v35 }
 0x326   : > { %v7027_v62 = vmul.f32 %v2573_v41, %v8220_v27 }
 0x328   : > { %v2699_v49 = vsel %vm635_vm0, %v7027_v62, 0.0 }
 0x329   : > { %v2700_v34 = vadd.f32 %v2699_v49, %v2698_v13 }
 0x32a   : > { %v2575_v59 = vpop.permute.xlu1 %2574 }
 0x32b   : > { %v7030_v4 = vmul.f32 %v2575_v59, %v8221_v57  ;;  %v2835_v57 = vld [vmem:[%s8170_s9] sm:$0xff] }
 0x32d   : > { %v2701_v21 = vsel %vm635_vm0, %v7030_v4, 0.0 }
 0x32e   : > { %v2577_v18 = vpop.permute.xlu0 %2576  ;;  %v2702_v53 = vadd.f32 %v2701_v21, %v2700_v34  ;;  %v2725_v34 = vld [vmem:[%s8169_s8] sm:$0x1] }
 0x32f   : > { %v7037_v11 = vmul.f32 %v2577_v18, %v8222_v56 }
 0x331   : > { %v2703_v26 = vsel %vm635_vm0, %v7037_v11, 0.0 }
 0x332   : > { %v2704_v10 = vadd.f32 %v2703_v26, %v2702_v53  ;;  %v8223_v53 = vld [vmem:[#allocation3_spill] sm:$0xff] }
 0x333   : > { %v2579_v30 = vpop.permute.xlu1 %2578 }
 0x334   : > { %v7042_v46 = vmul.f32 %v2579_v30, %v6859_v31  ;;  %v8224_v30 = vsub.s32 0, %v8223_v53 }
 0x336   : > { %v2705_v19 = vsel %vm635_vm0, %v7042_v46, 0.0 }
 0x337   : > { %v2706_v29 = vadd.f32 %v2705_v19, %v2704_v10 }
 0x338   : > { %v2581_v37 = vpop.permute.xlu0 %2580 }
 0x339   : > { %v7047_v23 = vmul.f32 %v2581_v37, %v6872_v9 }
 0x33b   : > { %v2707_v6 = vsel %vm635_vm0, %v7047_v23, 0.0 }
 0x33c   : > { %v2708_v42 = vadd.f32 %v2707_v6, %v2706_v29 }
 0x33d   : > { %v2583_v52 = vpop.permute.xlu1 %2582 }
 0x33e   : > { %v7052_v5 = vmul.f32 %v2583_v52, %v6883_v36  ;;  %v7184_v52 = vld [vmem:[%s8172_s11] ss:$0 sm:$0xff] }
 0x340   : > { %v2709_v31 = vsel %vm635_vm0, %v7052_v5, 0.0 }
 0x341   : > { %v2585_v32 = vpop.permute.xlu0 %2584  ;;  %v2710_v2 = vadd.f32 %v2709_v31, %v2708_v42 }
 0x342   : > { %v7057_v28 = vmul.f32 %v2585_v32, %v6890_v22 }
 0x344   : > { %v2711_v9 = vsel %vm635_vm0, %v7057_v28, 0.0 }
 0x345   : > { %v2712_v0 = vadd.f32 %v2711_v9, %v2710_v2  ;;  %v5377_v9 = vld [vmem:[%s5537_s2 + $0x8] sm:$0xff] }
 0x346   : > { %v2587_v17 = vpop.permute.xlu1 %2586 }
 0x347   : > { %v7062_v54 = vmul.f32 %v2587_v17, %v6904_v8  ;;  %v2836_v8 = vld [vmem:[%s8170_s9 + $0x8] sm:$0xff] }
 0x348   : > { %v5223_v49 = vpack.c.bf16 %v2836_v8, %v2835_v57 }
 0x349   : > { %v2713_v36 = vsel %vm635_vm0, %v7062_v54, 0.0 }
 0x34a   : > { %v2714_v25 = vadd.f32 %v2713_v36, %v2712_v0  ;;  %5224 = vmatprep.subr.bf16.mxu1 %v5223_v49  ;;  %v5378_v36 = vld [vmem:[%s5537_s2] sm:$0xff] }
 0x34c   : > { %v2715_v35 = vrot.slane %v2714_v25, 4 }
 0x34e   : > { %v2716_v41 = vadd.f32 %v2715_v35, %v2714_v25 }
 0x350   : > { %v2717_v20 = vrot.slane %v2716_v41, 2 }
 0x352   : > { %v2718_v27 = vadd.f32 %v2717_v20, %v2716_v41 }
 0x354   : > { %v2719_v13 = vrot.slane %v2718_v27, 1 }
 0x356   : > { %v2720_v59 = vadd.f32 %v2719_v13, %v2718_v27 }
 0x358   : > { %v2722_v22 = vmul.f32 0.00390625, %v2720_v59 }
 0x35a   : > { %5058 = vmatmul.mubr.msk.f32.vlgmr.msra.gmra.mrb[0].mxu1 %vm635_vm0, %v2722_v22  ;;  %v5379_v22 = vld [vmem:[%s5537_s2 + $0x18] sm:$0xff] }
 0x35b   : > { %5226 = vmatpush3.bf16.msra.mxu1 %v5223_v49 }
 0x42d   : > { %v2795_v21 = vpop.f32.mrb[0].mxu1 }
 0x42e   : > { %v2796_v18 = vadd.f32 %v2795_v21, %v2725_v34  ;;  %v5059_v56 = vpop.f32.mrb[1].mxu1 }
 0x42f   : > { %v5380_v56 = vld [vmem:[%s5537_s2 + $0x10] sm:$0xff] }
 0x430   : > { %v7078_v26 = vrot.slane %v2796_v18, %v8224_v30 }
 0x432   : > { %v2803_v10 = vmul.f32 %v7078_v26, %v6898_v16  ;;  %v2804_v19 = vmul.f32 %v7078_v26, %v6895_v39  ;;  %v2805_v37 = vmul.f32 %v7078_v26, %v6901_v47  ;;  %v2806_v29 = vmul.f32 %v7078_v26, %v6911_v40 }
 0x433   : > { %v2807_v6 = vmul.f32 %v7078_v26, %v6927_v45  ;;  %v2808_v39 = vmul.f32 %v7078_v26, %v6930_v15  ;;  %v2809_v16 = vmul.f32 %v7078_v26, %v6937_v43  ;;  %v2810_v47 = vmul.f32 %v7078_v26, %v6940_v12 }
 0x434   : > { %5064 = vmatprep.mubr.msk.f32.mxu1 %vm635_vm0, %v2803_v10  ;;  %v2811_v40 = vmul.f32 %v7078_v26, %v6947_v63  ;;  %v2812_v45 = vmul.f32 %v7078_v26, %v6950_v60  ;;  %v2813_v15 = vmul.f32 %v7078_v26, %v6957_v61  ;;  %v2814_v43 = vmul.f32 %v7078_v26, %v6960_v38  ;;  %v5381_v10 = vld [vmem:[%s5537_s2 + $0x28] sm:$0xff] }
 0x435   : > { %5065 = vmatmul.mubr.msk.f32.vlgmr.msra.gmra.mrb[2].mxu1 %vm635_vm0, %v2804_v19  ;;  %v2815_v12 = vmul.f32 %v7078_v26, %v6967_v14  ;;  %v2816_v63 = vmul.f32 %v7078_v26, %v6970_v3  ;;  %v2817_v60 = vmul.f32 %v7078_v26, %v6977_v7  ;;  %v2818_v61 = vmul.f32 %v7078_v26, %v6980_v44 }
 0x436   : > { %5067 = vmatprep.mubr.msk.f32.mxu1 %vm635_vm0, %v2805_v37  ;;  %v2819_v38 = vmul.f32 %v7078_v26, %v6987_v51  ;;  %v2820_v14 = vmul.f32 %v7078_v26, %v6990_v33  ;;  %v2821_v3 = vmul.f32 %v7078_v26, %v6997_v58  ;;  %v2822_v7 = vmul.f32 %v7078_v26, %v7000_v24 }
 0x437   : > { %v2823_v44 = vmul.f32 %v7078_v26, %v7007_v1  ;;  %v2824_v51 = vmul.f32 %v7078_v26, %v7010_v48  ;;  %v2825_v33 = vmul.f32 %v7078_v26, %v7017_v55  ;;  %v2826_v58 = vmul.f32 %v7078_v26, %v7020_v50 }
 0x438   : > { %v2827_v24 = vmul.f32 %v7078_v26, %v7027_v62  ;;  %v2828_v1 = vmul.f32 %v7078_v26, %v7030_v4  ;;  %v2829_v48 = vmul.f32 %v7078_v26, %v7037_v11  ;;  %v2830_v55 = vmul.f32 %v7078_v26, %v7042_v46  ;;  %v7179_v46 = vld [vmem:[%s8171_s10] ss:$0 sm:$0xff] }
 0x439   : > { %5068 = vmatmul.mubr.msk.f32.gmra.mrb[4].mxu1 %vm635_vm0, %v2806_v29  ;;  %v2831_v50 = vmul.f32 %v7078_v26, %v7047_v23  ;;  %v2832_v62 = vmul.f32 %v7078_v26, %v7052_v5  ;;  %v2833_v4 = vmul.f32 %v7078_v26, %v7057_v28  ;;  %v2834_v11 = vmul.f32 %v7078_v26, %v7062_v54 }
 0x43a   : > { %5070 = vmatprep.mubr.msk.f32.mxu1 %vm635_vm0, %v2807_v6 }
 0x43d   : > { %5071 = vmatmul.mubr.msk.f32.gmra.mrb[6].mxu1 %vm635_vm0, %v2808_v39 }
 0x43e   : > { %5073 = vmatprep.mubr.msk.f32.mxu1 %vm635_vm0, %v2809_v16 }
 0x441   : > { %5074 = vmatmul.mubr.msk.f32.gmra.mrb[8].mxu1 %vm635_vm0, %v2810_v47  ;;  %v5382_v47 = vld [vmem:[%s5537_s2 + $0x20] sm:$0xff] }
 0x442   : > { %5076 = vmatprep.mubr.msk.f32.mxu1 %vm635_vm0, %v2811_v40 }
 0x445   : > { %5077 = vmatmul.mubr.msk.f32.gmra.mrb[10].mxu1 %vm635_vm0, %v2812_v45 }
 0x446   : > { %5079 = vmatprep.mubr.msk.f32.mxu1 %vm635_vm0, %v2813_v15 }
 0x449   : > { %5080 = vmatmul.mubr.msk.f32.gmra.mrb[12].mxu1 %vm635_vm0, %v2814_v43 }
 0x44a   : > { %5082 = vmatprep.mubr.msk.f32.mxu1 %vm635_vm0, %v2815_v12  ;;  %v5383_v12 = vld [vmem:[%s5537_s2 + $0x38] sm:$0xff] }
 0x44d   : > { %5083 = vmatmul.mubr.msk.f32.gmra.mrb[14].mxu1 %vm635_vm0, %v2816_v63 }
 0x44e   : > { %5085 = vmatprep.mubr.msk.f32.mxu1 %vm635_vm0, %v2817_v60 }
 0x451   : > { %5086 = vmatmul.mubr.msk.f32.gmra.mrb[16].mxu1 %vm635_vm0, %v2818_v61 }
 0x452   : > { %5088 = vmatprep.mubr.msk.f32.mxu1 %vm635_vm0, %v2819_v38 }
 0x455   : > { %5089 = vmatmul.mubr.msk.f32.gmra.mrb[18].mxu1 %vm635_vm0, %v2820_v14 }
 0x456   : > { %5091 = vmatprep.mubr.msk.f32.mxu1 %vm635_vm0, %v2821_v3 }
 0x459   : > { %5092 = vmatmul.mubr.msk.f32.gmra.mrb[20].mxu1 %vm635_vm0, %v2822_v7  ;;  %v5384_v7 = vld [vmem:[%s5537_s2 + $0x30] sm:$0xff] }
 0x45a   : > { %5094 = vmatprep.mubr.msk.f32.mxu1 %vm635_vm0, %v2823_v44 }
 0x45d   : > { %5095 = vmatmul.mubr.msk.f32.gmra.mrb[22].mxu1 %vm635_vm0, %v2824_v51 }
 0x45e   : > { %5097 = vmatprep.mubr.msk.f32.mxu1 %vm635_vm0, %v2825_v33 }
 0x461   : > { %5098 = vmatmul.mubr.msk.f32.gmra.mrb[24].mxu1 %vm635_vm0, %v2826_v58 }
 0x462   : > { %5100 = vmatprep.mubr.msk.f32.mxu1 %vm635_vm0, %v2827_v24  ;;  %v5385_v24 = vld [vmem:[%s5537_s2 + $0x48] sm:$0xff] }
 0x465   : > { %5101 = vmatmul.mubr.msk.f32.gmra.mrb[26].mxu1 %vm635_vm0, %v2828_v1 }
 0x466   : > { %5103 = vmatprep.mubr.msk.f32.mxu1 %vm635_vm0, %v2829_v48 }
 0x469   : > { %5104 = vmatmul.mubr.msk.f32.gmra.mrb[28].mxu1 %vm635_vm0, %v2830_v55 }
 0x46a   : > { %5106 = vmatprep.mubr.msk.f32.mxu1 %vm635_vm0, %v2831_v50 }
 0x46d   : > { %5107 = vmatmul.mubr.msk.f32.gmra.mrb[30].mxu1 %vm635_vm0, %v2832_v62 }
 0x46e   : > { %5109 = vmatprep.mubr.msk.f32.mxu1 %vm635_vm0, %v2833_v4 }
 0x471   : > { %5110 = vmatmul.mubr.msk.f32.gmra.mrb[32].mxu1 %vm635_vm0, %v2834_v11  ;;  %v5386_v11 = vld [vmem:[%s5537_s2 + $0x40] sm:$0xff] }
 0x508   : > { %v5066_v23 = vpop.f32.mrb[2].mxu1 }
 0x509   : > { %v3012_v42 = vadd.f32 %v5066_v23, %v7179_v46  ;;  %v3006_v5 = vpop.f32.mrb[3].mxu1 }
 0x50a   : > { %v3007_v31 = vadd.f32 %v7179_v46, %v3006_v5 }
 0x50b   : > { %v3173_v32 = vmul.f32 %v7184_v52, %v3012_v42 }
 0x50c   : > { %v3172_v2 = vmul.f32 %v7184_v52, %v3007_v31  ;;  %v5069_v28 = vpop.f32.mrb[4].mxu1 }
 0x50d   : > { %v7191_v0 = vadd.f32 %v5377_v9, %v3173_v32  ;;  %v3022_v17 = vadd.f32 %v5069_v28, %v7179_v46  ;;  %v3016_v54 = vpop.f32.mrb[5].mxu1  ;;  %v5387_v32 = vld [vmem:[%s5537_s2 + $0x58] sm:$0xff] }
 0x50e   : > { %v7195_v25 = vadd.f32 %v5378_v36, %v3172_v2  ;;  %v3017_v35 = vadd.f32 %v7179_v46, %v3016_v54 }
 0x50f   : > { %v3175_v41 = vmul.f32 %v7184_v52, %v3022_v17  ;;  %v3239_v20 = vsel %vm635_vm0, %v7191_v0, 0.0 }
 0x510   : > { %v3174_v27 = vmul.f32 %v7184_v52, %v3017_v35  ;;  %3240 = vadd.xlane.f32.xlu1 %v3239_v20  ;;  %v5072_v13 = vpop.f32.mrb[6].mxu1  ;;  %v3236_v59 = vsel %vm635_vm0, %v7195_v25, 0.0  ;;  %v5388_v35 = vld [vmem:[%s5537_s2 + $0x50] sm:$0xff] }
 0x511   : > { %v7205_v57 = vadd.f32 %v5379_v22, %v3175_v41  ;;  %v3032_v8 = vadd.f32 %v5072_v13, %v7179_v46  ;;  %v3026_v49 = vpop.f32.mrb[7].mxu1  ;;  %3237 = vadd.xlane.f32.xlu0 %v3236_v59  ;;  %v5389_v59 = vld [vmem:[%s5537_s2 + $0x68] sm:$0xff] }
 0x512   : > { %v3027_v34 = vadd.f32 %v7179_v46, %v3026_v49  ;;  %v7213_v53 = vadd.f32 %v5380_v56, %v3174_v27  ;;  %v5390_v56 = vld [vmem:[%s5537_s2 + $0x60] sm:$0xff] }
 0x513   : > { %v3177_v21 = vmul.f32 %v7184_v52, %v3032_v8  ;;  %v3245_v18 = vsel %vm635_vm0, %v7205_v57, 0.0 }
 0x514   : > { %v3176_v30 = vmul.f32 %v7184_v52, %v3027_v34  ;;  %v5075_v26 = vpop.f32.mrb[8].mxu1  ;;  %v3242_v43 = vsel %vm635_vm0, %v7213_v53, 0.0 }
 0x515   : > { %v7217_v19 = vadd.f32 %v5381_v10, %v3177_v21  ;;  %v3042_v37 = vadd.f32 %v5075_v26, %v7179_v46  ;;  %v3036_v29 = vpop.f32.mrb[9].mxu1  ;;  %3246 = vadd.xlane.f32.xlu0 %v3245_v18 }
 0x516   : > { %v3037_v6 = vadd.f32 %v7179_v46, %v3036_v29  ;;  %v7225_v40 = vadd.f32 %v5382_v47, %v3176_v30  ;;  %v5391_v29 = vld [vmem:[%s5537_s2 + $0x78] sm:$0xff] }
 0x517   : > { %v3179_v39 = vmul.f32 %v7184_v52, %v3042_v37  ;;  %v3251_v16 = vsel %vm635_vm0, %v7217_v19, 0.0 }
 0x518   : > { %v3178_v45 = vmul.f32 %v7184_v52, %v3037_v6  ;;  %3252 = vadd.xlane.f32.xlu1 %v3251_v16  ;;  %v5078_v15 = vpop.f32.mrb[10].mxu1  ;;  %v3248_v58 = vsel %vm635_vm0, %v7225_v40, 0.0 }
 0x519   : > { %v7231_v63 = vadd.f32 %v5383_v12, %v3179_v39  ;;  %v3052_v60 = vadd.f32 %v5078_v15, %v7179_v46  ;;  %v3046_v61 = vpop.f32.mrb[11].mxu1  ;;  %3243 = vadd.xlane.f32.xlu0 %v3242_v43  ;;  %v5392_v43 = vld [vmem:[%s5537_s2 + $0x70] sm:$0xff] }
 0x51a   : > { %v3047_v38 = vadd.f32 %v7179_v46, %v3046_v61  ;;  %v7239_v44 = vadd.f32 %v5384_v7, %v3178_v45 }
 0x51b   : > { %v3181_v14 = vmul.f32 %v7184_v52, %v3052_v60  ;;  %v3257_v3 = vsel %vm635_vm0, %v7231_v63, 0.0 }
 0x51c   : > { %v3180_v51 = vmul.f32 %v7184_v52, %v3047_v38  ;;  %3258 = vadd.xlane.f32.xlu1 %v3257_v3  ;;  %v5081_v33 = vpop.f32.mrb[12].mxu1  ;;  %v3254_v31 = vsel %vm635_vm0, %v7239_v44, 0.0 }
 0x51d   : > { %v7245_v1 = vadd.f32 %v5385_v24, %v3181_v14  ;;  %v3062_v48 = vadd.f32 %v5081_v33, %v7179_v46  ;;  %v3056_v55 = vpop.f32.mrb[13].mxu1  ;;  %3249 = vadd.xlane.f32.xlu0 %v3248_v58  ;;  %v5393_v14 = vld [vmem:[%s5537_s2 + $0x88] sm:$0xff] }
 0x51e   : > { %v3057_v50 = vadd.f32 %v7179_v46, %v3056_v55  ;;  %v7253_v23 = vadd.f32 %v5386_v11, %v3180_v51  ;;  %v5395_v11 = vld [vmem:[%s5537_s2 + $0x98] sm:$0xff] }
 0x51f   : > { %v3183_v62 = vmul.f32 %v7184_v52, %v3062_v48  ;;  %v3263_v4 = vsel %vm635_vm0, %v7245_v1, 0.0  ;;  %v5394_v48 = vld [vmem:[%s5537_s2 + $0x80] sm:$0xff] }
 0x520   : > { %v3182_v42 = vmul.f32 %v7184_v52, %v3057_v50  ;;  %3264 = vadd.xlane.f32.xlu1 %v3263_v4  ;;  %v5084_v5 = vpop.f32.mrb[14].mxu1  ;;  %v3260_v13 = vsel %vm635_vm0, %v7253_v23, 0.0 }
 0x521   : > { %v7259_v2 = vadd.f32 %v5387_v32, %v3183_v62  ;;  %v3072_v28 = vadd.f32 %v5084_v5, %v7179_v46  ;;  %v3066_v9 = vpop.f32.mrb[15].mxu1  ;;  %3255 = vadd.xlane.f32.xlu0 %v3254_v31 }
 0x522   : > { %v3067_v17 = vadd.f32 %v7179_v46, %v3066_v9  ;;  %v7267_v41 = vadd.f32 %v5388_v35, %v3182_v42 }
 0x523   : > { %v3185_v54 = vmul.f32 %v7184_v52, %v3072_v28  ;;  %v3269_v36 = vsel %vm635_vm0, %v7259_v2, 0.0 }
 0x524   : > { %v3184_v20 = vmul.f32 %v7184_v52, %v3067_v17  ;;  %3270 = vadd.xlane.f32.xlu1 %v3269_v36  ;;  %v5087_v27 = vpop.f32.mrb[16].mxu1  ;;  %v3266_v37 = vsel %vm635_vm0, %v7267_v41, 0.0  ;;  %v5396_v17 = vld [vmem:[%s5537_s2 + $0x90] sm:$0xff] }
 0x525   : > { %v7273_v22 = vadd.f32 %v5389_v59, %v3185_v54  ;;  %v3082_v8 = vadd.f32 %v5087_v27, %v7179_v46  ;;  %v3076_v49 = vpop.f32.mrb[17].mxu1  ;;  %3261 = vadd.xlane.f32.xlu0 %v3260_v13  ;;  %v5397_v27 = vld [vmem:[%s5537_s2 + $0xa8] sm:$0xff] }
 0x526   : > { %v3077_v34 = vadd.f32 %v7179_v46, %v3076_v49  ;;  %v7281_v30 = vadd.f32 %v5390_v56, %v3184_v20 }
 0x527   : > { %v3187_v21 = vmul.f32 %v7184_v52, %v3082_v8  ;;  %v3275_v18 = vsel %vm635_vm0, %v7273_v22, 0.0 }
 0x528   : > { %8225 = vst [vmem:[#allocation4_spill] sm:$0xff] %v7281_v30  ;;  %v3186_v26 = vmul.f32 %v7184_v52, %v3077_v34  ;;  %3276 = vadd.xlane.f32.xlu1 %v3275_v18  ;;  %v5090_v10 = vpop.f32.mrb[18].mxu1  ;;  %v3272_v38 = vsel %vm635_vm0, %v7281_v30, 0.0  ;;  %v5398_v18 = vld [vmem:[%s5537_s2 + $0xa0] sm:$0xff] }
 0x529   : > { %v7287_v6 = vadd.f32 %v5391_v29, %v3187_v21  ;;  %v3092_v39 = vadd.f32 %v5090_v10, %v7179_v46  ;;  %v3086_v16 = vpop.f32.mrb[19].mxu1  ;;  %3267 = vadd.xlane.f32.xlu0 %v3266_v37  ;;  %v5399_v29 = vld [vmem:[%s5537_s2 + $0xb8] sm:$0xff] }
 0x52a   : > { %v3087_v47 = vadd.f32 %v7179_v46, %v3086_v16  ;;  %v7295_v12 = vadd.f32 %v5392_v43, %v3186_v26 }
 0x52b   : > { %8226 = vst [vmem:[#allocation5_spill] sm:$0xff] %v7287_v6  ;;  %v3189_v45 = vmul.f32 %v7184_v52, %v3092_v39  ;;  %v3281_v15 = vsel %vm635_vm0, %v7287_v6, 0.0 }
 0x52c   : > { %8227 = vst [vmem:[#allocation6_spill] sm:$0xff] %v7295_v12  ;;  %v3188_v60 = vmul.f32 %v7184_v52, %v3087_v47  ;;  %3282 = vadd.xlane.f32.xlu1 %v3281_v15  ;;  %v5093_v61 = vpop.f32.mrb[20].mxu1  ;;  %v3278_v4 = vsel %vm635_vm0, %v7295_v12, 0.0 }
 0x52d   : > { %v7301_v3 = vadd.f32 %v5393_v14, %v3189_v45  ;;  %v3102_v7 = vadd.f32 %v5093_v61, %v7179_v46  ;;  %v3096_v51 = vpop.f32.mrb[21].mxu1  ;;  %3273 = vadd.xlane.f32.xlu0 %v3272_v38 }
 0x52e   : > { %v3097_v33 = vadd.f32 %v7179_v46, %v3096_v51  ;;  %v7309_v55 = vadd.f32 %v5394_v48, %v3188_v60  ;;  %v5400_v60 = vld [vmem:[%s5537_s2 + $0xb0] sm:$0xff]  ;;  %v5401_v51 = vld [vmem:[%s5537_s2 + $0xc8] sm:$0xff] }
 0x52f   : > { %8228 = vst [vmem:[#allocation3_spill] sm:$0xff] %v7301_v3  ;;  %v3191_v58 = vmul.f32 %v7184_v52, %v3102_v7  ;;  %v3287_v24 = vsel %vm635_vm0, %v7301_v3, 0.0 }
 0x530   : > { %8229 = vst [vmem:[#allocation7_spill] sm:$0xff] %v7309_v55  ;;  %v3190_v50 = vmul.f32 %v7184_v52, %v3097_v33  ;;  %3288 = vadd.xlane.f32.xlu1 %v3287_v24  ;;  %v5096_v62 = vpop.f32.mrb[22].mxu1  ;;  %v3284_v20 = vsel %vm635_vm0, %v7309_v55, 0.0 }
 0x531   : > { %v7315_v42 = vadd.f32 %v5395_v11, %v3191_v58  ;;  %v3112_v5 = vadd.f32 %v5096_v62, %v7179_v46  ;;  %v3106_v31 = vpop.f32.mrb[23].mxu1  ;;  %3279 = vadd.xlane.f32.xlu0 %v3278_v4  ;;  %v5402_v4 = vld [vmem:[%s5537_s2 + $0xc0] sm:$0xff] }
 0x532   : > { %v3107_v32 = vadd.f32 %v7179_v46, %v3106_v31  ;;  %v7323_v54 = vadd.f32 %v5396_v17, %v3190_v50 }
 0x533   : > { %8230 = vst [vmem:[#allocation8_spill] sm:$0xff] %v7315_v42  ;;  %v3193_v28 = vmul.f32 %v7184_v52, %v3112_v5  ;;  %v3293_v9 = vsel %vm635_vm0, %v7315_v42, 0.0 }
 0x534   : > { %8231 = vst [vmem:[#allocation9_spill] sm:$0xff] %v7323_v54  ;;  %v3192_v36 = vmul.f32 %v7184_v52, %v3107_v32  ;;  %3294 = vadd.xlane.f32.xlu1 %v3293_v9  ;;  %v5099_v35 = vpop.f32.mrb[24].mxu1  ;;  %v3290_v37 = vsel %vm635_vm0, %v7323_v54, 0.0 }
 0x535   : > { %v7329_v13 = vadd.f32 %v5397_v27, %v3193_v28  ;;  %v3122_v59 = vadd.f32 %v5099_v35, %v7179_v46  ;;  %v3116_v8 = vpop.f32.mrb[25].mxu1  ;;  %3285 = vadd.xlane.f32.xlu0 %v3284_v20  ;;  %v5403_v28 = vld [vmem:[%s5537_s2 + $0xd8] sm:$0xff] }
 0x536   : > { %v3117_v49 = vadd.f32 %v7179_v46, %v3116_v8  ;;  %v7337_v56 = vadd.f32 %v5398_v18, %v3192_v36  ;;  %v5405_v18 = vld [vmem:[%s5537_s2 + $0xe8] sm:$0xff] }
 0x537   : > { %8232 = vst [vmem:[#allocation10_spill] sm:$0xff] %v7329_v13  ;;  %v3195_v34 = vmul.f32 %v7184_v52, %v3122_v59  ;;  %v3299_v21 = vsel %vm635_vm0, %v7329_v13, 0.0  ;;  %v5404_v59 = vld [vmem:[%s5537_s2 + $0xd0] sm:$0xff] }
 0x538   : > { %8233 = vst [vmem:[#allocation11_spill] sm:$0xff] %v7337_v56  ;;  %v3194_v26 = vmul.f32 %v7184_v52, %v3117_v49  ;;  %3300 = vadd.xlane.f32.xlu1 %v3299_v21  ;;  %v5102_v10 = vpop.f32.mrb[26].mxu1  ;;  %v3296_v7 = vsel %vm635_vm0, %v7337_v56, 0.0 }
 0x539   : > { %v7343_v39 = vadd.f32 %v5399_v29, %v3195_v34  ;;  %v3132_v16 = vadd.f32 %v5102_v10, %v7179_v46  ;;  %v3126_v47 = vpop.f32.mrb[27].mxu1  ;;  %3291 = vadd.xlane.f32.xlu0 %v3290_v37 }
 0x53a   : > { %v3127_v45 = vadd.f32 %v7179_v46, %v3126_v47  ;;  %v7351_v61 = vadd.f32 %v5400_v60, %v3194_v26 }
 0x53b   : > { %8234 = vst [vmem:[#allocation12_spill] sm:$0xff] %v7343_v39  ;;  %v3197_v15 = vmul.f32 %v7184_v52, %v3132_v16  ;;  %v3305_v43 = vsel %vm635_vm0, %v7343_v39, 0.0 }
 0x53c   : > { %8235 = vst [vmem:[#allocation13_spill] sm:$0xff] %v7351_v61  ;;  %v3196_v38 = vmul.f32 %v7184_v52, %v3127_v45  ;;  %3306 = vadd.xlane.f32.xlu1 %v3305_v43  ;;  %v5105_v14 = vpop.f32.mrb[28].mxu1  ;;  %v3302_v32 = vsel %vm635_vm0, %v7351_v61, 0.0  ;;  %v5406_v45 = vld [vmem:[%s5537_s2 + $0xe0] sm:$0xff] }
 0x53d   : > { %v7357_v33 = vadd.f32 %v5401_v51, %v3197_v15  ;;  %v3142_v58 = vadd.f32 %v5105_v14, %v7179_v46  ;;  %v3136_v24 = vpop.f32.mrb[29].mxu1  ;;  %3297 = vadd.xlane.f32.xlu0 %v3296_v7  ;;  %v5408_v7 = vld [vmem:[%s5537_s2 + $0xf0] sm:$0xff] }
 0x53e   : > { %v3137_v48 = vadd.f32 %v7179_v46, %v3136_v24  ;;  %v7365_v11 = vadd.f32 %v5402_v4, %v3196_v38  ;;  %v5407_v38 = vld [vmem:[%s5537_s2 + $0xf8] sm:$0xff]  ;;  %v3730_v24 = vld [vmem:[%s8175_s14] sm:$0xff] }
 0x53f   : > { %8236 = vst [vmem:[#allocation14_spill] sm:$0xff] %v7357_v33  ;;  %v3199_v50 = vmul.f32 %v7184_v52, %v3142_v58  ;;  %v3311_v62 = vsel %vm635_vm0, %v7357_v33, 0.0 }
 0x540   : > { %8237 = vst [vmem:[#allocation15_spill] sm:$0xff] %v7365_v11  ;;  %v3198_v5 = vmul.f32 %v7184_v52, %v3137_v48  ;;  %3312 = vadd.xlane.f32.xlu1 %v3311_v62  ;;  %v5108_v31 = vpop.f32.mrb[30].mxu1  ;;  %v3308_v21 = vsel %vm635_vm0, %v7365_v11, 0.0  ;;  %v3731_v48 = vld [vmem:[%s8175_s14 + $0x8] sm:$0xff] }
 0x541   : > { %v7371_v9 = vadd.f32 %v5403_v28, %v3199_v50  ;;  %v3152_v17 = vadd.f32 %v5108_v31, %v7179_v46  ;;  %v3146_v36 = vpop.f32.mrb[31].mxu1  ;;  %3303 = vadd.xlane.f32.xlu0 %v3302_v32  ;;  %v5227_v50 = vpack.c.bf16 %v3731_v48, %v3730_v24 }
 0x542   : > { %v3147_v35 = vadd.f32 %v7179_v46, %v3146_v36  ;;  %v7379_v8 = vadd.f32 %v5404_v59, %v3198_v5 }
 0x543   : > { %8238 = vst [vmem:[#allocation16_spill] sm:$0xff] %v7371_v9  ;;  %v3201_v20 = vmul.f32 %v7184_v52, %v3152_v17  ;;  %v3317_v27 = vsel %vm635_vm0, %v7371_v9, 0.0  ;;  %5228 = vmatprep.subr.bf16.mxu0 %v5227_v50 }
 0x544   : > { %8239 = vst [vmem:[#allocation17_spill] sm:$0xff] %v7379_v8  ;;  %v3200_v49 = vmul.f32 %v7184_v52, %v3147_v35  ;;  %3318 = vadd.xlane.f32.xlu1 %v3317_v27  ;;  %v5111_v34 = vpop.f32.mrb[32].mxu1  ;;  %v3314_v60 = vsel %vm635_vm0, %v7379_v8, 0.0  ;;  %5230 = vmatpush3.bf16.msra.mxu0 %v5227_v50 }
 0x545   : > { %v7385_v26 = vadd.f32 %v5405_v18, %v3201_v20  ;;  %v3162_v10 = vadd.f32 %v5111_v34, %v7179_v46  ;;  %v3156_v37 = vpop.f32.mrb[33].mxu1  ;;  %3309 = vadd.xlane.f32.xlu0 %v3308_v21 }
 0x546   : > { %v3157_v29 = vadd.f32 %v7179_v46, %v3156_v37  ;;  %v7393_v15 = vadd.f32 %v5406_v45, %v3200_v49 }
 0x547   : > { %8240 = vst [vmem:[#allocation18_spill] sm:$0xff] %v7385_v26  ;;  %v3203_v16 = vmul.f32 %v7184_v52, %v3162_v10  ;;  %v3323_v47 = vsel %vm635_vm0, %v7385_v26, 0.0 }
 0x548   : > { %8241 = vst [vmem:[#allocation19_spill] sm:$0xff] %v7393_v15  ;;  %v3202_v43 = vmul.f32 %v7184_v52, %v3157_v29  ;;  %3324 = vadd.xlane.f32.xlu1 %v3323_v47  ;;  %v3320_v58 = vsel %vm635_vm0, %v7393_v15, 0.0 }
 0x549   : > { %v7399_v14 = vadd.f32 %v5407_v38, %v3203_v16  ;;  %3315 = vadd.xlane.f32.xlu0 %v3314_v60 }
 0x54a   : > { %v7404_v51 = vadd.f32 %v5408_v7, %v3202_v43 }
 0x54b   : > { %8242 = vst [vmem:[#allocation20_spill] sm:$0xff] %v7399_v14  ;;  %v3329_v46 = vsel %vm635_vm0, %v7399_v14, 0.0 }
 0x54c   : > { %8243 = vst [vmem:[#allocation21_spill] sm:$0xff] %v7404_v51  ;;  %3330 = vadd.xlane.f32.xlu1 %v3329_v46  ;;  %v3326_v52 = vsel %vm635_vm0, %v7404_v51, 0.0 }
 0x54d   : > { %3321 = vadd.xlane.f32.xlu0 %v3320_v58 }
 0x551   : > { %3327 = vadd.xlane.f32.xlu0 %v3326_v52 }
 0x59d   : > { %v3241_v62 = vpop.xlane.xlu1 %3240 }
 0x59e   : > { %v3333_v4 = vmul.f32 0.0625, %v3241_v62  ;;  %v3238_v5 = vpop.xlane.xlu0 %3237 }
 0x59f   : > { %v3332_v31 = vmul.f32 0.0625, %v3238_v5 }
 0x5a0   : > { %v7417_v32 = vsub.f32 %v7191_v0, %v3333_v4 }
 0x5a1   : > { %v7420_v28 = vsub.f32 %v7195_v25, %v3332_v31 }
 0x5a2   : > { %v3247_v17 = vpop.xlane.xlu0 %3246  ;;  %v3397_v36 = vmul.f32 %v7417_v32, %v7417_v32 }
 0x5a3   : > { %v3335_v35 = vmul.f32 0.0625, %v3247_v17  ;;  %v3396_v20 = vmul.f32 %v7420_v28, %v7420_v28 }
 0x5a4   : > { %v3431_v27 = vsel %vm635_vm0, %v3397_v36, 0.0 }
 0x5a5   : > { %v7428_v59 = vsub.f32 %v7205_v57, %v3335_v35  ;;  %v3253_v49 = vpop.xlane.xlu1 %3252  ;;  %3432 = vadd.xlane.f32.xlu1 %v3431_v27  ;;  %v3428_v34 = vsel %vm635_vm0, %v3396_v20, 0.0 }
 0x5a6   : > { %v3337_v21 = vmul.f32 0.0625, %v3253_v49  ;;  %3429 = vadd.xlane.f32.xlu0 %v3428_v34  ;;  %v3244_v18 = vpop.xlane.xlu0 %3243 }
 0x5a7   : > { %v3334_v10 = vmul.f32 0.0625, %v3244_v18  ;;  %v3399_v37 = vmul.f32 %v7428_v59, %v7428_v59 }
 0x5a8   : > { %v7434_v29 = vsub.f32 %v7217_v19, %v3337_v21 }
 0x5a9   : > { %v7437_v16 = vsub.f32 %v7213_v53, %v3334_v10  ;;  %v3259_v47 = vpop.xlane.xlu1 %3258  ;;  %v3437_v45 = vsel %vm635_vm0, %v3399_v37, 0.0 }
 0x5aa   : > { %v3339_v43 = vmul.f32 0.0625, %v3259_v47  ;;  %3438 = vadd.xlane.f32.xlu1 %v3437_v45  ;;  %v3250_v60 = vpop.xlane.xlu0 %3249  ;;  %v3401_v38 = vmul.f32 %v7434_v29, %v7434_v29 }
 0x5ab   : > { %v3336_v46 = vmul.f32 0.0625, %v3250_v60  ;;  %v3398_v7 = vmul.f32 %v7437_v16, %v7437_v16 }
 0x5ac   : > { %v7445_v58 = vsub.f32 %v7231_v63, %v3339_v43  ;;  %v3443_v52 = vsel %vm635_vm0, %v3401_v38, 0.0 }
 0x5ad   : > { %v7449_v24 = vsub.f32 %v7225_v40, %v3336_v46  ;;  %v3265_v48 = vpop.xlane.xlu1 %3264  ;;  %v3434_v50 = vsel %vm635_vm0, %v3398_v7, 0.0 }
 0x5ae   : > { %v3341_v62 = vmul.f32 0.0625, %v3265_v48  ;;  %3444 = vadd.xlane.f32.xlu1 %v3443_v52  ;;  %3435 = vadd.xlane.f32.xlu0 %v3434_v50  ;;  %v3256_v4 = vpop.xlane.xlu0 %3255  ;;  %v3403_v5 = vmul.f32 %v7445_v58, %v7445_v58 }
 0x5af   : > { %v3338_v31 = vmul.f32 0.0625, %v3256_v4  ;;  %v3400_v17 = vmul.f32 %v7449_v24, %v7449_v24 }
 0x5b0   : > { %v7457_v36 = vsub.f32 %v7245_v1, %v3341_v62  ;;  %v3449_v35 = vsel %vm635_vm0, %v3403_v5, 0.0 }
 0x5b1   : > { %v7461_v20 = vsub.f32 %v7239_v44, %v3338_v31  ;;  %v3271_v27 = vpop.xlane.xlu1 %3270  ;;  %v3440_v49 = vsel %vm635_vm0, %v3400_v17, 0.0 }
 0x5b2   : > { %v3343_v34 = vmul.f32 0.0625, %v3271_v27  ;;  %3450 = vadd.xlane.f32.xlu1 %v3449_v35  ;;  %3441 = vadd.xlane.f32.xlu0 %v3440_v49  ;;  %v3262_v21 = vpop.xlane.xlu0 %3261  ;;  %v3405_v18 = vmul.f32 %v7457_v36, %v7457_v36 }
 0x5b3   : > { %v3340_v10 = vmul.f32 0.0625, %v3262_v21  ;;  %v3402_v37 = vmul.f32 %v7461_v20, %v7461_v20 }
 0x5b4   : > { %v7469_v47 = vsub.f32 %v7259_v2, %v3343_v34  ;;  %v3455_v45 = vsel %vm635_vm0, %v3405_v18, 0.0 }
 0x5b5   : > { %v7473_v43 = vsub.f32 %v7253_v23, %v3340_v10  ;;  %v3277_v60 = vpop.xlane.xlu1 %3276  ;;  %v3446_v38 = vsel %vm635_vm0, %v3402_v37, 0.0 }
 0x5b6   : > { %v3345_v46 = vmul.f32 0.0625, %v3277_v60  ;;  %3456 = vadd.xlane.f32.xlu1 %v3455_v45  ;;  %3447 = vadd.xlane.f32.xlu0 %v3446_v38  ;;  %v3268_v7 = vpop.xlane.xlu0 %3267  ;;  %v3407_v52 = vmul.f32 %v7469_v47, %v7469_v47 }
 0x5b7   : > { %v3342_v48 = vmul.f32 0.0625, %v3268_v7  ;;  %v3404_v50 = vmul.f32 %v7473_v43, %v7473_v43 }
 0x5b8   : > { %v7481_v62 = vsub.f32 %v7273_v22, %v3345_v46  ;;  %v3461_v4 = vsel %vm635_vm0, %v3407_v52, 0.0 }
 0x5b9   : > { %v7485_v5 = vsub.f32 %v7267_v41, %v3342_v48  ;;  %v3283_v31 = vpop.xlane.xlu1 %3282  ;;  %v3452_v17 = vsel %vm635_vm0, %v3404_v50, 0.0 }
 0x5ba   : > { %v3347_v35 = vmul.f32 0.0625, %v3283_v31  ;;  %3462 = vadd.xlane.f32.xlu1 %v3461_v4  ;;  %3453 = vadd.xlane.f32.xlu0 %v3452_v17  ;;  %v3274_v27 = vpop.xlane.xlu0 %3273  ;;  %v3409_v49 = vmul.f32 %v7481_v62, %v7481_v62 }
 0x5bb   : > { %v3344_v34 = vmul.f32 0.0625, %v3274_v27  ;;  %v3406_v21 = vmul.f32 %v7485_v5, %v7485_v5 }
 0x5bc   : > { %v7493_v18 = vsub.f32 %v7287_v6, %v3347_v35  ;;  %v3467_v10 = vsel %vm635_vm0, %v3409_v49, 0.0 }
 0x5bd   : > { %v7497_v37 = vsub.f32 %v7281_v30, %v3344_v34  ;;  %v3289_v45 = vpop.xlane.xlu1 %3288  ;;  %v3458_v60 = vsel %vm635_vm0, %v3406_v21, 0.0 }
 0x5be   : > { %v3349_v38 = vmul.f32 0.0625, %v3289_v45  ;;  %3468 = vadd.xlane.f32.xlu1 %v3467_v10  ;;  %3459 = vadd.xlane.f32.xlu0 %v3458_v60  ;;  %v3280_v46 = vpop.xlane.xlu0 %3279  ;;  %v3411_v7 = vmul.f32 %v7493_v18, %v7493_v18 }
 0x5bf   : > { %v3346_v52 = vmul.f32 0.0625, %v3280_v46  ;;  %v3408_v48 = vmul.f32 %v7497_v37, %v7497_v37 }
 0x5c0   : > { %v7505_v50 = vsub.f32 %v7301_v3, %v3349_v38  ;;  %v3473_v4 = vsel %vm635_vm0, %v3411_v7, 0.0 }
 0x5c1   : > { %v7509_v31 = vsub.f32 %v7295_v12, %v3346_v52  ;;  %v3295_v17 = vpop.xlane.xlu1 %3294  ;;  %v3464_v35 = vsel %vm635_vm0, %v3408_v48, 0.0 }
 0x5c2   : > { %v3351_v27 = vmul.f32 0.0625, %v3295_v17  ;;  %3474 = vadd.xlane.f32.xlu1 %v3473_v4  ;;  %3465 = vadd.xlane.f32.xlu0 %v3464_v35  ;;  %v3286_v49 = vpop.xlane.xlu0 %3285  ;;  %v3413_v34 = vmul.f32 %v7505_v50, %v7505_v50 }
 0x5c3   : > { %v3348_v21 = vmul.f32 0.0625, %v3286_v49  ;;  %v3410_v10 = vmul.f32 %v7509_v31, %v7509_v31 }
 0x5c4   : > { %v7517_v45 = vsub.f32 %v7315_v42, %v3351_v27  ;;  %v3479_v60 = vsel %vm635_vm0, %v3413_v34, 0.0 }
 0x5c5   : > { %v7521_v38 = vsub.f32 %v7309_v55, %v3348_v21  ;;  %v3301_v46 = vpop.xlane.xlu1 %3300  ;;  %v3470_v7 = vsel %vm635_vm0, %v3410_v10, 0.0 }
 0x5c6   : > { %v3353_v52 = vmul.f32 0.0625, %v3301_v46  ;;  %3480 = vadd.xlane.f32.xlu1 %v3479_v60  ;;  %3471 = vadd.xlane.f32.xlu0 %v3470_v7  ;;  %v3292_v48 = vpop.xlane.xlu0 %3291  ;;  %v3415_v4 = vmul.f32 %v7517_v45, %v7517_v45 }
 0x5c7   : > { %v3350_v17 = vmul.f32 0.0625, %v3292_v48  ;;  %v3412_v35 = vmul.f32 %v7521_v38, %v7521_v38 }
 0x5c8   : > { %v7529_v27 = vsub.f32 %v7329_v13, %v3353_v52  ;;  %v3485_v49 = vsel %vm635_vm0, %v3415_v4, 0.0 }
 0x5c9   : > { %v7533_v34 = vsub.f32 %v7323_v54, %v3350_v17  ;;  %v3307_v21 = vpop.xlane.xlu1 %3306  ;;  %v3476_v10 = vsel %vm635_vm0, %v3412_v35, 0.0 }
 0x5ca   : > { %v3355_v60 = vmul.f32 0.0625, %v3307_v21  ;;  %3486 = vadd.xlane.f32.xlu1 %v3485_v49  ;;  %3477 = vadd.xlane.f32.xlu0 %v3476_v10  ;;  %v3298_v46 = vpop.xlane.xlu0 %3297  ;;  %v3417_v7 = vmul.f32 %v7529_v27, %v7529_v27 }
 0x5cb   : > { %v3352_v48 = vmul.f32 0.0625, %v3298_v46  ;;  %v3414_v52 = vmul.f32 %v7533_v34, %v7533_v34 }
 0x5cc   : > { %v7541_v13 = vsub.f32 %v7343_v39, %v3355_v60  ;;  %v3491_v4 = vsel %vm635_vm0, %v3417_v7, 0.0 }
 0x5cd   : > { %v7545_v17 = vsub.f32 %v7337_v56, %v3352_v48  ;;  %v3313_v35 = vpop.xlane.xlu1 %3312  ;;  %v3482_v49 = vsel %vm635_vm0, %v3414_v52, 0.0 }
 0x5ce   : > { %v3357_v21 = vmul.f32 0.0625, %v3313_v35  ;;  %3492 = vadd.xlane.f32.xlu1 %v3491_v4  ;;  %3483 = vadd.xlane.f32.xlu0 %v3482_v49  ;;  %v3304_v10 = vpop.xlane.xlu0 %3303  ;;  %v3419_v46 = vmul.f32 %v7541_v13, %v7541_v13 }
 0x5cf   : > { %v3354_v54 = vmul.f32 0.0625, %v3304_v10  ;;  %v3416_v60 = vmul.f32 %v7545_v17, %v7545_v17 }
 0x5d0   : > { %v7553_v39 = vsub.f32 %v7357_v33, %v3357_v21  ;;  %v3497_v7 = vsel %vm635_vm0, %v3419_v46, 0.0 }
 0x5d1   : > { %v7557_v48 = vsub.f32 %v7351_v61, %v3354_v54  ;;  %v3319_v52 = vpop.xlane.xlu1 %3318  ;;  %v3488_v4 = vsel %vm635_vm0, %v3416_v60, 0.0 }
 0x5d2   : > { %v3359_v35 = vmul.f32 0.0625, %v3319_v52  ;;  %3498 = vadd.xlane.f32.xlu1 %v3497_v7  ;;  %3489 = vadd.xlane.f32.xlu0 %v3488_v4  ;;  %v3310_v49 = vpop.xlane.xlu0 %3309  ;;  %v3421_v10 = vmul.f32 %v7553_v39, %v7553_v39 }
 0x5d3   : > { %v3356_v56 = vmul.f32 0.0625, %v3310_v49  ;;  %v3418_v21 = vmul.f32 %v7557_v48, %v7557_v48 }
 0x5d4   : > { %v7565_v33 = vsub.f32 %v7371_v9, %v3359_v35  ;;  %v3503_v54 = vsel %vm635_vm0, %v3421_v10, 0.0 }
 0x5d5   : > { %v7569_v46 = vsub.f32 %v7365_v11, %v3356_v56  ;;  %v3325_v60 = vpop.xlane.xlu1 %3324  ;;  %v3494_v7 = vsel %vm635_vm0, %v3418_v21, 0.0 }
 0x5d6   : > { %v3361_v52 = vmul.f32 0.0625, %v3325_v60  ;;  %3504 = vadd.xlane.f32.xlu1 %v3503_v54  ;;  %3495 = vadd.xlane.f32.xlu0 %v3494_v7  ;;  %v3316_v4 = vpop.xlane.xlu0 %3315  ;;  %v3423_v49 = vmul.f32 %v7565_v33, %v7565_v33 }
 0x5d7   : > { %v3358_v61 = vmul.f32 0.0625, %v3316_v4  ;;  %v3420_v35 = vmul.f32 %v7569_v46, %v7569_v46 }
 0x5d8   : > { %v7577_v9 = vsub.f32 %v7385_v26, %v3361_v52  ;;  %v3509_v56 = vsel %vm635_vm0, %v3423_v49, 0.0 }
 0x5d9   : > { %v7581_v10 = vsub.f32 %v7379_v8, %v3358_v61  ;;  %v3331_v21 = vpop.xlane.xlu1 %3330  ;;  %v3500_v54 = vsel %vm635_vm0, %v3420_v35, 0.0 }
 0x5da   : > { %v3363_v60 = vmul.f32 0.0625, %v3331_v21  ;;  %3510 = vadd.xlane.f32.xlu1 %v3509_v56  ;;  %3501 = vadd.xlane.f32.xlu0 %v3500_v54  ;;  %v3322_v7 = vpop.xlane.xlu0 %3321  ;;  %v3425_v4 = vmul.f32 %v7577_v9, %v7577_v9 }
 0x5db   : > { %v3360_v11 = vmul.f32 0.0625, %v3322_v7  ;;  %v3422_v52 = vmul.f32 %v7581_v10, %v7581_v10 }
 0x5dc   : > { %v7589_v26 = vsub.f32 %v7399_v14, %v3363_v60  ;;  %v3515_v61 = vsel %vm635_vm0, %v3425_v4, 0.0 }
 0x5dd   : > { %v7593_v49 = vsub.f32 %v7393_v15, %v3360_v11  ;;  %v3506_v35 = vsel %vm635_vm0, %v3422_v52, 0.0 }
 0x5de   : > { %3516 = vadd.xlane.f32.xlu1 %v3515_v61  ;;  %3507 = vadd.xlane.f32.xlu0 %v3506_v35  ;;  %v3328_v56 = vpop.xlane.xlu0 %3327  ;;  %v3427_v21 = vmul.f32 %v7589_v26, %v7589_v26 }
 0x5df   : > { %v3362_v54 = vmul.f32 0.0625, %v3328_v56  ;;  %v3424_v7 = vmul.f32 %v7593_v49, %v7593_v49 }
 0x5e0   : > { %v3521_v60 = vsel %vm635_vm0, %v3427_v21, 0.0 }
 0x5e1   : > { %v7602_v14 = vsub.f32 %v7404_v51, %v3362_v54  ;;  %v3512_v11 = vsel %vm635_vm0, %v3424_v7, 0.0 }
 0x5e2   : > { %3522 = vadd.xlane.f32.xlu1 %v3521_v60  ;;  %3513 = vadd.xlane.f32.xlu0 %v3512_v11 }
 0x5e3   : > { %v3426_v4 = vmul.f32 %v7602_v14, %v7602_v14 }
 0x5e5   : > { %v3518_v52 = vsel %vm635_vm0, %v3426_v4, 0.0 }
 0x5e6   : > { %3519 = vadd.xlane.f32.xlu0 %v3518_v52 }
 0x632   : > { %v3433_v61 = vpop.xlane.xlu1 %3432 }
 0x633   : > { %v3525_v35 = vmul.f32 0.0625, %v3433_v61  ;;  %v3430_v56 = vpop.xlane.xlu0 %3429 }
 0x634   : > { %v3524_v15 = vmul.f32 0.0625, %v3430_v56 }
 0x635   : > { %v3557_v8 = vadd.f32 1e-06, %v3525_v35 }
 0x636   : > { %v3556_v42 = vadd.f32 1e-06, %v3524_v15 }
 0x637   : > { %5311 = vrsqrt.f32 %v3557_v8  ;;  %v3439_v21 = vpop.xlane.xlu1 %3438  ;;  %v7611_v8 = vld [vmem:[%s8173_s12] ss:$0 sm:$0xff] }
 0x638   : > { %5313 = vrsqrt.f32 %v3556_v42  ;;  %v3527_v54 = vmul.f32 0.0625, %v3439_v21 }
 0x63a   : > { %v3559_v51 = vadd.f32 1e-06, %v3527_v54 }
 0x63b   : > { %v3445_v7 = vpop.xlane.xlu1 %3444  ;;  %v3436_v60 = vpop.xlane.xlu0 %3435 }
 0x63c   : > { %5315 = vrsqrt.f32 %v3559_v51  ;;  %v3529_v11 = vmul.f32 0.0625, %v3445_v7  ;;  %v3526_v55 = vmul.f32 0.0625, %v3436_v60 }
 0x63e   : > { %v3561_v3 = vadd.f32 1e-06, %v3529_v11  ;;  %v3558_v12 = vadd.f32 1e-06, %v3526_v55 }
 0x63f   : > { %v3451_v4 = vpop.xlane.xlu1 %3450  ;;  %v3442_v52 = vpop.xlane.xlu0 %3441 }
 0x640   : > { %5317 = vrsqrt.f32 %v3561_v3  ;;  %v3531_v61 = vmul.f32 0.0625, %v3451_v4  ;;  %v3528_v6 = vmul.f32 0.0625, %v3442_v52  ;;  %v7618_v3 = vld [vmem:[%s8174_s13] ss:$0 sm:$0xff] }
 0x641   : > { %v5312_v56 = vpop.eup %5311  ;;  %5319 = vrsqrt.f32 %v3558_v12 }
 0x642   : > { %v5314_v42 = vpop.eup %5313  ;;  %v3621_v15 = vmul.f32 %v5312_v56, %v7417_v32  ;;  %v3563_v51 = vadd.f32 1e-06, %v3531_v61  ;;  %v3560_v35 = vadd.f32 1e-06, %v3528_v6 }
 0x643   : > { %v3457_v21 = vpop.xlane.xlu1 %3456  ;;  %v3448_v54 = vpop.xlane.xlu0 %3447  ;;  %v3620_v55 = vmul.f32 %v5314_v42, %v7420_v28 }
 0x644   : > { %v3660_v7 = vmul.f32 %v7611_v8, %v3621_v15  ;;  %5321 = vrsqrt.f32 %v3563_v51  ;;  %v3533_v60 = vmul.f32 0.0625, %v3457_v21  ;;  %v3530_v11 = vmul.f32 0.0625, %v3448_v54 }
 0x645   : > { %5323 = vrsqrt.f32 %v3560_v35  ;;  %v3659_v12 = vmul.f32 %v7611_v8, %v3620_v55 }
 0x646   : > { %v5316_v32 = vpop.eup %5315  ;;  %v3565_v4 = vadd.f32 1e-06, %v3533_v60  ;;  %v3562_v6 = vadd.f32 1e-06, %v3530_v11  ;;  %v3699_v56 = vadd.f32 %v7618_v3, %v3660_v7 }
 0x647   : > { %v3463_v52 = vpop.xlane.xlu1 %3462  ;;  %v3454_v61 = vpop.xlane.xlu0 %3453  ;;  %v3698_v28 = vadd.f32 %v7618_v3, %v3659_v12  ;;  %v3623_v15 = vmul.f32 %v5316_v32, %v7428_v59 }
 0x648   : > { %5325 = vrsqrt.f32 %v3565_v4  ;;  %v3535_v42 = vmul.f32 0.0625, %v3463_v52  ;;  %v3532_v30 = vmul.f32 0.0625, %v3454_v61 }
 0x649   : > { %5327 = vrsqrt.f32 %v3562_v6  ;;  %5116 = vmatprep.mubr.msk.f32.mxu0 %vm635_vm0, %v3698_v28  ;;  %v3662_v4 = vmul.f32 %v7611_v8, %v3623_v15 }
 0x64a   : > { %v5318_v51 = vpop.eup %5317  ;;  %v3567_v35 = vadd.f32 1e-06, %v3535_v42  ;;  %v3564_v21 = vadd.f32 1e-06, %v3532_v30  ;;  %5117 = vmatmul.mubr.msk.f32.vlgmr.msra.gmra.mrb[32].mxu0 %vm635_vm0, %v3699_v56 }
 0x64b   : > { %v5320_v54 = vpop.eup %5319  ;;  %v3469_v55 = vpop.xlane.xlu1 %3468  ;;  %v3625_v6 = vmul.f32 %v5318_v51, %v7434_v29 }
 0x64c   : > { %v3460_v60 = vpop.xlane.xlu0 %3459  ;;  %5329 = vrsqrt.f32 %v3567_v35  ;;  %v3537_v11 = vmul.f32 0.0625, %v3469_v55  ;;  %v3622_v7 = vmul.f32 %v5320_v54, %v7437_v16  ;;  %v3701_v16 = vadd.f32 %v7618_v3, %v3662_v4 }
 0x64d   : > { %v3534_v12 = vmul.f32 0.0625, %v3460_v60  ;;  %5331 = vrsqrt.f32 %v3564_v21  ;;  %v3664_v29 = vmul.f32 %v7611_v8, %v3625_v6 }
 0x64e   : > { %v5322_v52 = vpop.eup %5321  ;;  %v3569_v59 = vadd.f32 1e-06, %v3537_v11  ;;  %v3661_v30 = vmul.f32 %v7611_v8, %v3622_v7 }
 0x64f   : > { %v3566_v32 = vadd.f32 1e-06, %v3534_v12  ;;  %v5324_v61 = vpop.eup %5323  ;;  %v3475_v28 = vpop.xlane.xlu1 %3474  ;;  %v3627_v60 = vmul.f32 %v5322_v52, %v7445_v58 }
 0x650   : > { %v3466_v56 = vpop.xlane.xlu0 %3465  ;;  %5333 = vrsqrt.f32 %v3569_v59  ;;  %v3539_v42 = vmul.f32 0.0625, %v3475_v28  ;;  %v3700_v55 = vadd.f32 %v7618_v3, %v3661_v30  ;;  %v3624_v15 = vmul.f32 %v5324_v61, %v7449_v24 }
 0x651   : > { %v3536_v35 = vmul.f32 0.0625, %v3466_v56  ;;  %5335 = vrsqrt.f32 %v3566_v32  ;;  %v3703_v30 = vadd.f32 %v7618_v3, %v3664_v29 }
 0x652   : > { %v5326_v51 = vpop.eup %5325  ;;  %v3571_v21 = vadd.f32 1e-06, %v3539_v42  ;;  %5119 = vmatprep.mubr.msk.f32.mxu0 %vm635_vm0, %v3700_v55  ;;  %v3663_v59 = vmul.f32 %v7611_v8, %v3624_v15  ;;  %v3666_v42 = vmul.f32 %v7611_v8, %v3627_v60 }
 0x653   : > { %v3568_v54 = vadd.f32 1e-06, %v3536_v35  ;;  %v5328_v11 = vpop.eup %5327  ;;  %5120 = vmatmul.mubr.msk.f32.gmra.mrb[34].mxu0 %vm635_vm0, %v3701_v16  ;;  %v3481_v12 = vpop.xlane.xlu1 %3480  ;;  %v3629_v61 = vmul.f32 %v5326_v51, %v7457_v36 }
 0x654   : > { %v3472_v7 = vpop.xlane.xlu0 %3471  ;;  %5337 = vrsqrt.f32 %v3571_v21  ;;  %v3541_v4 = vmul.f32 0.0625, %v3481_v12  ;;  %v3626_v24 = vmul.f32 %v5328_v11, %v7461_v20  ;;  %v3702_v6 = vadd.f32 %v7618_v3, %v3663_v59 }
 0x655   : > { %v3538_v32 = vmul.f32 0.0625, %v3472_v7  ;;  %5339 = vrsqrt.f32 %v3568_v54  ;;  %v3668_v51 = vmul.f32 %v7611_v8, %v3629_v61  ;;  %v3705_v11 = vadd.f32 %v7618_v3, %v3666_v42 }
 0x656   : > { %v5330_v58 = vpop.eup %5329  ;;  %v3573_v52 = vadd.f32 1e-06, %v3541_v4  ;;  %v3665_v56 = vmul.f32 %v7611_v8, %v3626_v24  ;;  %5122 = vmatprep.mubr.msk.f32.mxu0 %vm635_vm0, %v3702_v6 }
 0x657   : > { %v3570_v28 = vadd.f32 1e-06, %v3538_v32  ;;  %v5332_v35 = vpop.eup %5331  ;;  %v3487_v55 = vpop.xlane.xlu1 %3486  ;;  %5123 = vmatmul.mubr.msk.f32.gmra.mrb[36].mxu0 %vm635_vm0, %v3703_v30  ;;  %v3631_v12 = vmul.f32 %v5330_v58, %v7469_v47  ;;  %v3707_v61 = vadd.f32 %v7618_v3, %v3668_v51 }
 0x658   : > { %v3478_v16 = vpop.xlane.xlu0 %3477  ;;  %5341 = vrsqrt.f32 %v3573_v52  ;;  %v3543_v20 = vmul.f32 0.0625, %v3487_v55  ;;  %v3704_v29 = vadd.f32 %v7618_v3, %v3665_v56  ;;  %v3628_v36 = vmul.f32 %v5332_v35, %v7473_v43 }
 0x659   : > { %v3540_v15 = vmul.f32 0.0625, %v3478_v16  ;;  %5343 = vrsqrt.f32 %v3570_v28  ;;  %v3670_v42 = vmul.f32 %v7611_v8, %v3631_v12 }
 0x65a   : > { %v5334_v21 = vpop.eup %5333  ;;  %v3575_v54 = vadd.f32 1e-06, %v3543_v20  ;;  %5125 = vmatprep.mubr.msk.f32.mxu0 %vm635_vm0, %v3704_v29  ;;  %v3667_v32 = vmul.f32 %v7611_v8, %v3628_v36 }
 0x65b   : > { %v3572_v60 = vadd.f32 1e-06, %v3540_v15  ;;  %v5336_v7 = vpop.eup %5335  ;;  %v3493_v59 = vpop.xlane.xlu1 %3492  ;;  %5126 = vmatmul.mubr.msk.f32.gmra.mrb[38].mxu0 %vm635_vm0, %v3705_v11  ;;  %v3633_v52 = vmul.f32 %v5334_v21, %v7481_v62 }
 0x65c   : > { %v3484_v4 = vpop.xlane.xlu0 %3483  ;;  %5345 = vrsqrt.f32 %v3575_v54  ;;  %v3545_v43 = vmul.f32 0.0625, %v3493_v59  ;;  %v3630_v6 = vmul.f32 %v5336_v7, %v7485_v5  ;;  %v3706_v30 = vadd.f32 %v7618_v3, %v3667_v32 }
 0x65d   : > { %v3542_v24 = vmul.f32 0.0625, %v3484_v4  ;;  %5347 = vrsqrt.f32 %v3572_v60  ;;  %v3672_v29 = vmul.f32 %v7611_v8, %v3633_v52  ;;  %v3709_v54 = vadd.f32 %v7618_v3, %v3670_v42 }
 0x65e   : > { %v5338_v47 = vpop.eup %5337  ;;  %v3577_v58 = vadd.f32 1e-06, %v3545_v43  ;;  %v3669_v56 = vmul.f32 %v7611_v8, %v3630_v6  ;;  %5128 = vmatprep.mubr.msk.f32.mxu0 %vm635_vm0, %v3706_v30 }
 0x65f   : > { %v3574_v28 = vadd.f32 1e-06, %v3542_v24  ;;  %v5340_v35 = vpop.eup %5339  ;;  %v3499_v55 = vpop.xlane.xlu1 %3498  ;;  %5129 = vmatmul.mubr.msk.f32.gmra.mrb[40].mxu0 %vm635_vm0, %v3707_v61  ;;  %v3635_v60 = vmul.f32 %v5338_v47, %v7493_v18  ;;  %v3711_v24 = vadd.f32 %v7618_v3, %v3672_v29 }
 0x660   : > { %v3490_v16 = vpop.xlane.xlu0 %3489  ;;  %5349 = vrsqrt.f32 %v3577_v58  ;;  %v3547_v5 = vmul.f32 0.0625, %v3499_v55  ;;  %v3708_v15 = vadd.f32 %v7618_v3, %v3669_v56  ;;  %v3632_v62 = vmul.f32 %v5340_v35, %v7497_v37 }
 0x661   : > { %v3544_v20 = vmul.f32 0.0625, %v3490_v16  ;;  %5351 = vrsqrt.f32 %v3574_v28  ;;  %v3674_v47 = vmul.f32 %v7611_v8, %v3635_v60 }
 0x662   : > { %v5342_v36 = vpop.eup %5341  ;;  %v3579_v51 = vadd.f32 1e-06, %v3547_v5  ;;  %5131 = vmatprep.mubr.msk.f32.mxu0 %vm635_vm0, %v3708_v15  ;;  %v3671_v59 = vmul.f32 %v7611_v8, %v3632_v62 }
 0x663   : > { %v3576_v21 = vadd.f32 1e-06, %v3544_v20  ;;  %v5344_v11 = vpop.eup %5343  ;;  %v3505_v12 = vpop.xlane.xlu1 %3504  ;;  %5132 = vmatmul.mubr.msk.f32.gmra.mrb[42].mxu0 %vm635_vm0, %v3709_v54  ;;  %v3637_v6 = vmul.f32 %v5342_v36, %v7505_v50  ;;  %v3713_v15 = vadd.f32 %v7618_v3, %v3674_v47 }
 0x664   : > { %v3496_v7 = vpop.xlane.xlu0 %3495  ;;  %5353 = vrsqrt.f32 %v3579_v51  ;;  %v3549_v37 = vmul.f32 0.0625, %v3505_v12  ;;  %v3634_v32 = vmul.f32 %v5344_v11, %v7509_v31  ;;  %v3710_v43 = vadd.f32 %v7618_v3, %v3671_v59 }
 0x665   : > { %v3546_v4 = vmul.f32 0.0625, %v3496_v7  ;;  %5355 = vrsqrt.f32 %v3576_v21  ;;  %v3676_v55 = vmul.f32 %v7611_v8, %v3637_v6 }
 0x666   : > { %v5346_v18 = vpop.eup %5345  ;;  %v3581_v30 = vadd.f32 1e-06, %v3549_v37  ;;  %v3673_v52 = vmul.f32 %v7611_v8, %v3634_v32  ;;  %5134 = vmatprep.mubr.msk.f32.mxu0 %vm635_vm0, %v3710_v43 }
 0x667   : > { %v3578_v61 = vadd.f32 1e-06, %v3546_v4  ;;  %v5348_v58 = vpop.eup %5347  ;;  %v3511_v28 = vpop.xlane.xlu1 %3510  ;;  %5135 = vmatmul.mubr.msk.f32.gmra.mrb[44].mxu0 %vm635_vm0, %v3711_v24  ;;  %v3639_v62 = vmul.f32 %v5346_v18, %v7517_v45  ;;  %v3715_v12 = vadd.f32 %v7618_v3, %v3676_v55 }
 0x668   : > { %v3502_v56 = vpop.xlane.xlu0 %3501  ;;  %5357 = vrsqrt.f32 %v3581_v30  ;;  %v3551_v31 = vmul.f32 0.0625, %v3511_v28  ;;  %v3712_v35 = vadd.f32 %v7618_v3, %v3673_v52  ;;  %v3636_v50 = vmul.f32 %v5348_v58, %v7521_v38 }
 0x669   : > { %v3548_v42 = vmul.f32 0.0625, %v3502_v56  ;;  %5359 = vrsqrt.f32 %v3578_v61  ;;  %v3678_v32 = vmul.f32 %v7611_v8, %v3639_v62 }
 0x66a   : > { %v5350_v16 = vpop.eup %5349  ;;  %v3583_v5 = vadd.f32 1e-06, %v3551_v31  ;;  %5137 = vmatprep.mubr.msk.f32.mxu0 %vm635_vm0, %v3712_v35  ;;  %v3675_v21 = vmul.f32 %v7611_v8, %v3636_v50 }
 0x66b   : > { %v3580_v20 = vadd.f32 1e-06, %v3548_v42  ;;  %v5352_v29 = vpop.eup %5351  ;;  %v3517_v36 = vpop.xlane.xlu1 %3516  ;;  %5138 = vmatmul.mubr.msk.f32.gmra.mrb[46].mxu0 %vm635_vm0, %v3713_v15  ;;  %v3641_v7 = vmul.f32 %v5350_v16, %v7529_v27  ;;  %v3717_v28 = vadd.f32 %v7618_v3, %v3678_v32 }
 0x66c   : > { %v3508_v51 = vpop.xlane.xlu0 %3507  ;;  %5361 = vrsqrt.f32 %v3583_v5  ;;  %v3553_v38 = vmul.f32 0.0625, %v3517_v36  ;;  %v3638_v60 = vmul.f32 %v5352_v29, %v7533_v34  ;;  %v3714_v11 = vadd.f32 %v7618_v3, %v3675_v21 }
 0x66d   : > { %v3550_v54 = vmul.f32 0.0625, %v3508_v51  ;;  %5363 = vrsqrt.f32 %v3580_v20  ;;  %v3680_v61 = vmul.f32 %v7611_v8, %v3641_v7 }
 0x66e   : > { %v5354_v45 = vpop.eup %5353  ;;  %v3585_v59 = vadd.f32 1e-06, %v3553_v38  ;;  %v3677_v4 = vmul.f32 %v7611_v8, %v3638_v60  ;;  %5140 = vmatprep.mubr.msk.f32.mxu0 %vm635_vm0, %v3714_v11 }
 0x66f   : > { %v3582_v37 = vadd.f32 1e-06, %v3550_v54  ;;  %v5356_v43 = vpop.eup %5355  ;;  %v3523_v24 = vpop.xlane.xlu1 %3522  ;;  %5141 = vmatmul.mubr.msk.f32.gmra.mrb[48].mxu0 %vm635_vm0, %v3715_v12  ;;  %v3643_v56 = vmul.f32 %v5354_v45, %v7541_v13  ;;  %v3719_v16 = vadd.f32 %v7618_v3, %v3680_v61 }
 0x670   : > { %v3514_v6 = vpop.xlane.xlu0 %3513  ;;  %5365 = vrsqrt.f32 %v3585_v59  ;;  %v3555_v34 = vmul.f32 0.0625, %v3523_v24  ;;  %v3716_v30 = vadd.f32 %v7618_v3, %v3677_v4  ;;  %v3640_v27 = vmul.f32 %v5356_v43, %v7545_v17 }
 0x671   : > { %v3552_v18 = vmul.f32 0.0625, %v3514_v6  ;;  %5367 = vrsqrt.f32 %v3582_v37  ;;  %v3682_v13 = vmul.f32 %v7611_v8, %v3643_v56 }
 0x672   : > { %v5358_v52 = vpop.eup %5357  ;;  %v3587_v47 = vadd.f32 1e-06, %v3555_v34  ;;  %5143 = vmatprep.mubr.msk.f32.mxu0 %vm635_vm0, %v3716_v30  ;;  %v3679_v35 = vmul.f32 %v7611_v8, %v3640_v27 }
 0x673   : > { %v3584_v58 = vadd.f32 1e-06, %v3552_v18  ;;  %v5360_v31 = vpop.eup %5359  ;;  %5144 = vmatmul.mubr.msk.f32.gmra.mrb[50].mxu0 %vm635_vm0, %v3717_v28  ;;  %v3645_v62 = vmul.f32 %v5358_v52, %v7553_v39  ;;  %v3721_v21 = vadd.f32 %v7618_v3, %v3682_v13  ;;  %v4221_v52 = vld [vmem:[%s8177_s16 + $0x8] sm:$0xff] }
 0x674   : > { %v3520_v42 = vpop.xlane.xlu0 %3519  ;;  %5369 = vrsqrt.f32 %v3587_v47  ;;  %v3642_v17 = vmul.f32 %v5360_v31, %v7557_v48  ;;  %v3718_v55 = vadd.f32 %v7618_v3, %v3679_v35 }
 0x675   : > { %v3554_v50 = vmul.f32 0.0625, %v3520_v42  ;;  %5371 = vrsqrt.f32 %v3584_v58  ;;  %v3684_v54 = vmul.f32 %v7611_v8, %v3645_v62 }
 0x676   : > { %v5362_v5 = vpop.eup %5361  ;;  %v3681_v15 = vmul.f32 %v7611_v8, %v3642_v17  ;;  %5146 = vmatprep.mubr.msk.f32.mxu0 %vm635_vm0, %v3718_v55 }
 0x677   : > { %v3586_v20 = vadd.f32 1e-06, %v3554_v50  ;;  %v5364_v29 = vpop.eup %5363  ;;  %5147 = vmatmul.mubr.msk.f32.gmra.mrb[52].mxu0 %vm635_vm0, %v3719_v16  ;;  %v3647_v39 = vmul.f32 %v5362_v5, %v7565_v33 }
 0x678   : > { %v3720_v48 = vadd.f32 %v7618_v3, %v3681_v15  ;;  %v3644_v36 = vmul.f32 %v5364_v29, %v7569_v46  ;;  %v3723_v46 = vadd.f32 %v7618_v3, %v3684_v54 }
 0x679   : > { %5373 = vrsqrt.f32 %v3586_v20  ;;  %v3686_v59 = vmul.f32 %v7611_v8, %v3647_v39 }
 0x67a   : > { %v5366_v51 = vpop.eup %5365  ;;  %5149 = vmatprep.mubr.msk.f32.mxu0 %vm635_vm0, %v3720_v48  ;;  %v3683_v38 = vmul.f32 %v7611_v8, %v3644_v36 }
 0x67b   : > { %v5368_v60 = vpop.eup %5367  ;;  %5150 = vmatmul.mubr.msk.f32.gmra.mrb[54].mxu0 %vm635_vm0, %v3721_v21  ;;  %v3649_v37 = vmul.f32 %v5366_v51, %v7577_v9 }
 0x67c   : > { %v3722_v11 = vadd.f32 %v7618_v3, %v3683_v38  ;;  %v3646_v12 = vmul.f32 %v5368_v60, %v7581_v10  ;;  %v3725_v10 = vadd.f32 %v7618_v3, %v3686_v59 }
 0x67d   : > { %v3688_v6 = vmul.f32 %v7611_v8, %v3649_v37 }
 0x67e   : > { %v5370_v7 = vpop.eup %5369  ;;  %5152 = vmatprep.mubr.msk.f32.mxu0 %vm635_vm0, %v3722_v11  ;;  %v3685_v45 = vmul.f32 %v7611_v8, %v3646_v12 }
 0x67f   : > { %v5372_v4 = vpop.eup %5371  ;;  %5153 = vmatmul.mubr.msk.f32.gmra.mrb[56].mxu0 %vm635_vm0, %v3723_v46  ;;  %v3651_v34 = vmul.f32 %v5370_v7, %v7589_v26 }
 0x680   : > { %v3724_v33 = vadd.f32 %v7618_v3, %v3685_v45  ;;  %v3648_v32 = vmul.f32 %v5372_v4, %v7593_v49  ;;  %v3727_v49 = vadd.f32 %v7618_v3, %v3688_v6 }
 0x681   : > { %v3690_v27 = vmul.f32 %v7611_v8, %v3651_v34 }
 0x682   : > { %5155 = vmatprep.mubr.msk.f32.mxu0 %vm635_vm0, %v3724_v33  ;;  %v3687_v24 = vmul.f32 %v7611_v8, %v3648_v32 }
 0x683   : > { %v5374_v43 = vpop.eup %5373  ;;  %5156 = vmatmul.mubr.msk.f32.gmra.mrb[58].mxu0 %vm635_vm0, %v3725_v10  ;;  %v3729_v26 = vadd.f32 %v7618_v3, %v3690_v27 }
 0x684   : > { %v3650_v9 = vmul.f32 %v5374_v43, %v7602_v14  ;;  %v3726_v18 = vadd.f32 %v7618_v3, %v3687_v24  ;;  %v4220_v14 = vld [vmem:[%s8177_s16] sm:$0xff] }
 0x685   : > { %v5231_v47 = vpack.c.bf16 %v4221_v52, %v4220_v14 }
 0x686   : > { %v3689_v30 = vmul.f32 %v7611_v8, %v3650_v9  ;;  %5158 = vmatprep.mubr.msk.f32.mxu0 %vm635_vm0, %v3726_v18  ;;  %v7755_v8 = vld [vmem:[%s8176_s15] ss:$0 sm:$0xff] }
 0x687   : > { %5159 = vmatmul.mubr.msk.f32.gmra.mrb[60].mxu0 %vm635_vm0, %v3727_v49  ;;  %5232 = vmatprep.subr.bf16.mxu1 %v5231_v47 }
 0x688   : > { %v3728_v61 = vadd.f32 %v7618_v3, %v3689_v30  ;;  %5234 = vmatpush3.bf16.msra.mxu1 %v5231_v47 }
 0x68a   : > { %5161 = vmatprep.mubr.msk.f32.mxu0 %vm635_vm0, %v3728_v61 }
 0x68b   : > { %5162 = vmatmul.mubr.msk.f32.gmra.mrb[62].mxu0 %vm635_vm0, %v3729_v26 }
 0x71d   : > { %v5118_v58 = vpop.f32.mrb[32].mxu0 }
 0x71e   : > { %v7758_v3 = vadd.f32 %v5118_v58, %v7755_v8  ;;  %v3901_v28 = vpop.f32.mrb[33].mxu0 }
 0x71f   : > { %v7761_v56 = vadd.f32 %v7755_v8, %v3901_v28 }
 0x720   : > { %4094 = vrot.lane.b32.xlu1 %v7758_v3, %s5418_s1 }
 0x721   : > { %4092 = vrot.lane.b32.xlu0 %v7761_v56, %s5418_s1 }
 0x726   : > { %v5121_v31 = vpop.f32.mrb[34].mxu0 }
 0x727   : > { %v3911_v42 = vpop.f32.mrb[35].mxu0  ;;  %v7773_v17 = vadd.f32 %v5121_v31, %v7755_v8 }
 0x728   : > { %v7768_v35 = vadd.f32 %v7755_v8, %v3911_v42 }
 0x72a   : > { %4096 = vrot.lane.b32.xlu1 %v7768_v35, %s5418_s1  ;;  %v5124_v50 = vpop.f32.mrb[36].mxu0 }
 0x72b   : > { %v3921_v55 = vpop.f32.mrb[37].mxu0  ;;  %v7783_v20 = vadd.f32 %v5124_v50, %v7755_v8 }
 0x72c   : > { %v7776_v16 = vadd.f32 %v7755_v8, %v3921_v55 }
 0x72e   : > { %4098 = vrot.lane.b32.xlu1 %v7773_v17, %s5418_s1  ;;  %4100 = vrot.lane.b32.xlu0 %v7776_v16, %s5418_s1  ;;  %v5127_v5 = vpop.f32.mrb[38].mxu0 }
 0x72f   : > { %v3931_v15 = vpop.f32.mrb[39].mxu0  ;;  %v7793_v29 = vadd.f32 %v5127_v5, %v7755_v8 }
 0x730   : > { %v7786_v13 = vadd.f32 %v7755_v8, %v3931_v15 }
 0x732   : > { %4102 = vrot.lane.b32.xlu1 %v7783_v20, %s5418_s1  ;;  %4104 = vrot.lane.b32.xlu0 %v7786_v13, %s5418_s1  ;;  %v5130_v62 = vpop.f32.mrb[40].mxu0 }
 0x733   : > { %v3941_v48 = vpop.f32.mrb[41].mxu0  ;;  %v7803_v21 = vadd.f32 %v5130_v62, %v7755_v8 }
 0x734   : > { %v7796_v36 = vadd.f32 %v7755_v8, %v3941_v48 }
 0x736   : > { %4106 = vrot.lane.b32.xlu1 %v7793_v29, %s5418_s1  ;;  %4108 = vrot.lane.b32.xlu0 %v7796_v36, %s5418_s1  ;;  %v5133_v51 = vpop.f32.mrb[42].mxu0 }
 0x737   : > { %v3951_v38 = vpop.f32.mrb[43].mxu0  ;;  %v7813_v60 = vadd.f32 %v5133_v51, %v7755_v8 }
 0x738   : > { %v7806_v54 = vadd.f32 %v7755_v8, %v3951_v38 }
 0x73a   : > { %4110 = vrot.lane.b32.xlu1 %v7803_v21, %s5418_s1  ;;  %4112 = vrot.lane.b32.xlu0 %v7806_v54, %s5418_s1  ;;  %v5136_v39 = vpop.f32.mrb[44].mxu0 }
 0x73b   : > { %v3961_v11 = vpop.f32.mrb[45].mxu0  ;;  %v7823_v46 = vadd.f32 %v5136_v39, %v7755_v8 }
 0x73c   : > { %v7816_v12 = vadd.f32 %v7755_v8, %v3961_v11 }
 0x73e   : > { %4114 = vrot.lane.b32.xlu1 %v7813_v60, %s5418_s1  ;;  %4116 = vrot.lane.b32.xlu0 %v7816_v12, %s5418_s1  ;;  %v5139_v7 = vpop.f32.mrb[46].mxu0 }
 0x73f   : > { %v3971_v45 = vpop.f32.mrb[47].mxu0  ;;  %v7833_v4 = vadd.f32 %v5139_v7, %v7755_v8 }
 0x740   : > { %v7826_v59 = vadd.f32 %v7755_v8, %v3971_v45 }
 0x742   : > { %4118 = vrot.lane.b32.xlu1 %v7823_v46, %s5418_s1  ;;  %4120 = vrot.lane.b32.xlu0 %v7826_v59, %s5418_s1  ;;  %v5142_v37 = vpop.f32.mrb[48].mxu0 }
 0x743   : > { %v3981_v33 = vpop.f32.mrb[49].mxu0  ;;  %v7843_v10 = vadd.f32 %v5142_v37, %v7755_v8 }
 0x744   : > { %v7836_v32 = vadd.f32 %v7755_v8, %v3981_v33 }
 0x746   : > { %4122 = vrot.lane.b32.xlu1 %v7833_v4, %s5418_s1  ;;  %4124 = vrot.lane.b32.xlu0 %v7836_v32, %s5418_s1  ;;  %v5145_v43 = vpop.f32.mrb[50].mxu0 }
 0x747   : > { %v3991_v24 = vpop.f32.mrb[51].mxu0  ;;  %v7853_v9 = vadd.f32 %v5145_v43, %v7755_v8 }
 0x748   : > { %v7846_v6 = vadd.f32 %v7755_v8, %v3991_v24 }
 0x74a   : > { %4126 = vrot.lane.b32.xlu1 %v7843_v10, %s5418_s1  ;;  %4128 = vrot.lane.b32.xlu0 %v7846_v6, %s5418_s1  ;;  %v5148_v34 = vpop.f32.mrb[52].mxu0 }
 0x74b   : > { %v4001_v18 = vpop.f32.mrb[53].mxu0  ;;  %v7863_v27 = vadd.f32 %v5148_v34, %v7755_v8 }
 0x74c   : > { %v7856_v30 = vadd.f32 %v7755_v8, %v4001_v18 }
 0x74e   : > { %4130 = vrot.lane.b32.xlu1 %v7853_v9, %s5418_s1  ;;  %4132 = vrot.lane.b32.xlu0 %v7856_v30, %s5418_s1  ;;  %v5151_v49 = vpop.f32.mrb[54].mxu0 }
 0x74f   : > { %v4011_v61 = vpop.f32.mrb[55].mxu0  ;;  %v7873_v52 = vadd.f32 %v5151_v49, %v7755_v8 }
 0x750   : > { %v7866_v26 = vadd.f32 %v7755_v8, %v4011_v61 }
 0x752   : > { %4134 = vrot.lane.b32.xlu1 %v7863_v27, %s5418_s1  ;;  %4136 = vrot.lane.b32.xlu0 %v7866_v26, %s5418_s1  ;;  %v5154_v14 = vpop.f32.mrb[56].mxu0 }
 0x753   : > { %v4021_v47 = vpop.f32.mrb[57].mxu0  ;;  %v7883_v31 = vadd.f32 %v5154_v14, %v7755_v8 }
 0x754   : > { %v7876_v58 = vadd.f32 %v7755_v8, %v4021_v47 }
 0x756   : > { %4138 = vrot.lane.b32.xlu1 %v7873_v52, %s5418_s1  ;;  %4140 = vrot.lane.b32.xlu0 %v7876_v58, %s5418_s1  ;;  %v5157_v28 = vpop.f32.mrb[58].mxu0 }
 0x757   : > { %v4031_v42 = vpop.f32.mrb[59].mxu0  ;;  %v7893_v5 = vadd.f32 %v5157_v28, %v7755_v8 }
 0x758   : > { %v7886_v50 = vadd.f32 %v7755_v8, %v4031_v42 }
 0x75a   : > { %4142 = vrot.lane.b32.xlu1 %v7883_v31, %s5418_s1  ;;  %4144 = vrot.lane.b32.xlu0 %v7886_v50, %s5418_s1  ;;  %v5160_v55 = vpop.f32.mrb[60].mxu0 }
 0x75b   : > { %v4041_v15 = vpop.f32.mrb[61].mxu0  ;;  %v7903_v51 = vadd.f32 %v5160_v55, %v7755_v8 }
 0x75c   : > { %v7896_v62 = vadd.f32 %v7755_v8, %v4041_v15 }
 0x75e   : > { %4146 = vrot.lane.b32.xlu1 %v7893_v5, %s5418_s1  ;;  %4148 = vrot.lane.b32.xlu0 %v7896_v62, %s5418_s1  ;;  %v5163_v48 = vpop.f32.mrb[62].mxu0 }
 0x75f   : > { %v4051_v38 = vpop.f32.mrb[63].mxu0  ;;  %v7913_v11 = vadd.f32 %v5163_v48, %v7755_v8 }
 0x760   : > { %v7906_v39 = vadd.f32 %v7755_v8, %v4051_v38 }
 0x762   : > { %4150 = vrot.lane.b32.xlu1 %v7903_v51, %s5418_s1  ;;  %4152 = vrot.lane.b32.xlu0 %v7906_v39, %s5418_s1 }
 0x766   : > { %4154 = vrot.lane.b32.xlu1 %v7913_v11, %s5418_s1 }
 0x792   : > { %v4095_v7 = vpop.permute.xlu1 %4094 }
 0x793   : > { %v4093_v45 = vpop.permute.xlu0 %4092  ;;  %v4189_v33 = vmul.f32 %v4095_v7, %v7758_v3 }
 0x794   : > { %v4188_v37 = vmul.f32 %v4093_v45, %v7761_v56 }
 0x796   : > { %5168 = vmatprep.mubr.msk.f32.mxu1 %vm635_vm0, %v4188_v37 }
 0x797   : > { %5169 = vmatmul.mubr.msk.f32.vlgmr.msra.gmra.mrb[34].mxu1 %vm635_vm0, %v4189_v33 }
 0x79c   : > { %v4097_v43 = vpop.permute.xlu1 %4096 }
 0x79d   : > { %v4190_v24 = vmul.f32 %v4097_v43, %v7768_v35 }
 0x79f   : > { %5171 = vmatprep.mubr.msk.f32.mxu1 %vm635_vm0, %v4190_v24 }
 0x7a0   : > { %v4099_v8 = vpop.permute.xlu1 %4098  ;;  %v4101_v18 = vpop.permute.xlu0 %4100 }
 0x7a1   : > { %v4191_v34 = vmul.f32 %v4099_v8, %v7773_v17  ;;  %v4192_v49 = vmul.f32 %v4101_v18, %v7776_v16 }
 0x7a3   : > { %5172 = vmatmul.mubr.msk.f32.gmra.mrb[36].mxu1 %vm635_vm0, %v4191_v34 }
 0x7a4   : > { %v4103_v56 = vpop.permute.xlu1 %4102  ;;  %5174 = vmatprep.mubr.msk.f32.mxu1 %vm635_vm0, %v4192_v49  ;;  %v4105_v61 = vpop.permute.xlu0 %4104 }
 0x7a5   : > { %v4193_v3 = vmul.f32 %v4103_v56, %v7783_v20  ;;  %v4194_v14 = vmul.f32 %v4105_v61, %v7786_v13 }
 0x7a7   : > { %5175 = vmatmul.mubr.msk.f32.gmra.mrb[38].mxu1 %vm635_vm0, %v4193_v3 }
 0x7a8   : > { %v4107_v35 = vpop.permute.xlu1 %4106  ;;  %5177 = vmatprep.mubr.msk.f32.mxu1 %vm635_vm0, %v4194_v14  ;;  %v4109_v47 = vpop.permute.xlu0 %4108 }
 0x7a9   : > { %v4195_v17 = vmul.f32 %v4107_v35, %v7793_v29  ;;  %v4196_v16 = vmul.f32 %v4109_v47, %v7796_v36 }
 0x7ab   : > { %5178 = vmatmul.mubr.msk.f32.gmra.mrb[40].mxu1 %vm635_vm0, %v4195_v17 }
 0x7ac   : > { %v4111_v28 = vpop.permute.xlu1 %4110  ;;  %5180 = vmatprep.mubr.msk.f32.mxu1 %vm635_vm0, %v4196_v16  ;;  %v4113_v42 = vpop.permute.xlu0 %4112 }
 0x7ad   : > { %v4197_v20 = vmul.f32 %v4111_v28, %v7803_v21  ;;  %v4198_v13 = vmul.f32 %v4113_v42, %v7806_v54 }
 0x7af   : > { %5181 = vmatmul.mubr.msk.f32.gmra.mrb[42].mxu1 %vm635_vm0, %v4197_v20 }
 0x7b0   : > { %v4115_v55 = vpop.permute.xlu1 %4114  ;;  %5183 = vmatprep.mubr.msk.f32.mxu1 %vm635_vm0, %v4198_v13  ;;  %v4117_v15 = vpop.permute.xlu0 %4116 }
 0x7b1   : > { %v4199_v29 = vmul.f32 %v4115_v55, %v7813_v60  ;;  %v4200_v36 = vmul.f32 %v4117_v15, %v7816_v12 }
 0x7b3   : > { %5184 = vmatmul.mubr.msk.f32.gmra.mrb[44].mxu1 %vm635_vm0, %v4199_v29 }
 0x7b4   : > { %v4119_v48 = vpop.permute.xlu1 %4118  ;;  %5186 = vmatprep.mubr.msk.f32.mxu1 %vm635_vm0, %v4200_v36  ;;  %v4121_v38 = vpop.permute.xlu0 %4120 }
 0x7b5   : > { %v4201_v21 = vmul.f32 %v4119_v48, %v7823_v46  ;;  %v4202_v54 = vmul.f32 %v4121_v38, %v7826_v59 }
 0x7b7   : > { %5187 = vmatmul.mubr.msk.f32.gmra.mrb[46].mxu1 %vm635_vm0, %v4201_v21 }
 0x7b8   : > { %v4123_v7 = vpop.permute.xlu1 %4122  ;;  %5189 = vmatprep.mubr.msk.f32.mxu1 %vm635_vm0, %v4202_v54  ;;  %v4125_v45 = vpop.permute.xlu0 %4124 }
 0x7b9   : > { %v4203_v60 = vmul.f32 %v4123_v7, %v7833_v4  ;;  %v4204_v12 = vmul.f32 %v4125_v45, %v7836_v32 }
 0x7bb   : > { %5190 = vmatmul.mubr.msk.f32.gmra.mrb[48].mxu1 %vm635_vm0, %v4203_v60 }
 0x7bc   : > { %v4127_v37 = vpop.permute.xlu1 %4126  ;;  %5192 = vmatprep.mubr.msk.f32.mxu1 %vm635_vm0, %v4204_v12  ;;  %v4129_v33 = vpop.permute.xlu0 %4128 }
 0x7bd   : > { %v4205_v46 = vmul.f32 %v4127_v37, %v7843_v10  ;;  %v4206_v59 = vmul.f32 %v4129_v33, %v7846_v6 }
 0x7bf   : > { %5193 = vmatmul.mubr.msk.f32.gmra.mrb[50].mxu1 %vm635_vm0, %v4205_v46 }
 0x7c0   : > { %v4131_v43 = vpop.permute.xlu1 %4130  ;;  %5195 = vmatprep.mubr.msk.f32.mxu1 %vm635_vm0, %v4206_v59  ;;  %v4133_v24 = vpop.permute.xlu0 %4132 }
 0x7c1   : > { %v4207_v4 = vmul.f32 %v4131_v43, %v7853_v9  ;;  %v4208_v32 = vmul.f32 %v4133_v24, %v7856_v30 }
 0x7c3   : > { %5196 = vmatmul.mubr.msk.f32.gmra.mrb[52].mxu1 %vm635_vm0, %v4207_v4 }
 0x7c4   : > { %v4135_v8 = vpop.permute.xlu1 %4134  ;;  %5198 = vmatprep.mubr.msk.f32.mxu1 %vm635_vm0, %v4208_v32  ;;  %v4137_v34 = vpop.permute.xlu0 %4136 }
 0x7c5   : > { %v4209_v10 = vmul.f32 %v4135_v8, %v7863_v27  ;;  %v4210_v6 = vmul.f32 %v4137_v34, %v7866_v26 }
 0x7c7   : > { %5199 = vmatmul.mubr.msk.f32.gmra.mrb[54].mxu1 %vm635_vm0, %v4209_v10 }
 0x7c8   : > { %v4139_v18 = vpop.permute.xlu1 %4138  ;;  %5201 = vmatprep.mubr.msk.f32.mxu1 %vm635_vm0, %v4210_v6  ;;  %v4141_v49 = vpop.permute.xlu0 %4140 }
 0x7c9   : > { %v4211_v9 = vmul.f32 %v4139_v18, %v7873_v52  ;;  %v4212_v30 = vmul.f32 %v4141_v49, %v7876_v58 }
 0x7cb   : > { %5202 = vmatmul.mubr.msk.f32.gmra.mrb[56].mxu1 %vm635_vm0, %v4211_v9 }
 0x7cc   : > { %v4143_v56 = vpop.permute.xlu1 %4142  ;;  %5204 = vmatprep.mubr.msk.f32.mxu1 %vm635_vm0, %v4212_v30  ;;  %v4145_v3 = vpop.permute.xlu0 %4144 }
 0x7cd   : > { %v4213_v27 = vmul.f32 %v4143_v56, %v7883_v31  ;;  %v4214_v26 = vmul.f32 %v4145_v3, %v7886_v50 }
 0x7cf   : > { %5205 = vmatmul.mubr.msk.f32.gmra.mrb[58].mxu1 %vm635_vm0, %v4213_v27 }
 0x7d0   : > { %v4147_v61 = vpop.permute.xlu1 %4146  ;;  %5207 = vmatprep.mubr.msk.f32.mxu1 %vm635_vm0, %v4214_v26  ;;  %v4149_v14 = vpop.permute.xlu0 %4148 }
 0x7d1   : > { %v4215_v52 = vmul.f32 %v4147_v61, %v7893_v5  ;;  %v4216_v58 = vmul.f32 %v4149_v14, %v7896_v62  ;;  %v7984_v62 = vld [vmem:[%s8178_s17] ss:$0 sm:$0xff] }
 0x7d3   : > { %5208 = vmatmul.mubr.msk.f32.gmra.mrb[60].mxu1 %vm635_vm0, %v4215_v52 }
 0x7d4   : > { %v4151_v35 = vpop.permute.xlu1 %4150  ;;  %5210 = vmatprep.mubr.msk.f32.mxu1 %vm635_vm0, %v4216_v58  ;;  %v4153_v17 = vpop.permute.xlu0 %4152 }
 0x7d5   : > { %v4217_v31 = vmul.f32 %v4151_v35, %v7903_v51  ;;  %v4218_v50 = vmul.f32 %v4153_v17, %v7906_v39  ;;  %v7989_v51 = vld [vmem:[%s8179_s18] ss:$0 sm:$0xff] }
 0x7d7   : > { %5211 = vmatmul.mubr.msk.f32.gmra.mrb[62].mxu1 %vm635_vm0, %v4217_v31 }
 0x7d8   : > { %v4155_v47 = vpop.permute.xlu1 %4154  ;;  %5213 = vmatprep.mubr.msk.f32.mxu1 %vm635_vm0, %v4218_v50 }
 0x7d9   : > { %v4219_v5 = vmul.f32 %v4155_v47, %v7913_v11  ;;  %v8244_v47 = vld [vmem:[#allocation4_spill] sm:$0xff] }
 0x7db   : > { %5214 = vmatmul.mubr.msk.f32.gmra.mrb[64].mxu1 %vm635_vm0, %v4219_v5 }
 0x86a   : > { %v5170_v16 = vpop.f32.mrb[34].mxu1 }
 0x86b   : > { %v4397_v39 = vadd.f32 %v5170_v16, %v7984_v62  ;;  %v4391_v28 = vpop.f32.mrb[35].mxu1 }
 0x86c   : > { %v4392_v20 = vadd.f32 %v7984_v62, %v4391_v28 }
 0x86d   : > { %v4558_v11 = vmul.f32 %v7989_v51, %v4397_v39 }
 0x86e   : > { %v4557_v42 = vmul.f32 %v7989_v51, %v4392_v20  ;;  %v8245_v20 = vld [vmem:[#allocation5_spill] sm:$0xff] }
 0x86f   : > { %v4590_v13 = vadd.f32 %v4558_v11, %v7191_v0 }
 0x870   : > { %v4589_v55 = vadd.f32 %v4557_v42, %v7195_v25 }
 0x871   : > { %4622 = vst.msk [vmem:[%s7999_s21 + $0x8] sm:$0xff] %vm635_vm0, %v4590_v13  ;;  %v8246_v13 = vld [vmem:[#allocation6_spill] sm:$0xff] }
 0x872   : > { %4621 = vst.msk [vmem:[%s7999_s21] sm:$0xff] %vm635_vm0, %v4589_v55 }
 0x876   : > { %v5173_v29 = vpop.f32.mrb[36].mxu1 }
 0x877   : > { %v4407_v15 = vadd.f32 %v5173_v29, %v7984_v62  ;;  %v4401_v36 = vpop.f32.mrb[37].mxu1 }
 0x878   : > { %v4402_v48 = vadd.f32 %v7984_v62, %v4401_v36 }
 0x879   : > { %v4560_v21 = vmul.f32 %v7989_v51, %v4407_v15 }
 0x87a   : > { %v4559_v38 = vmul.f32 %v7989_v51, %v4402_v48  ;;  %v5176_v54 = vpop.f32.mrb[38].mxu1 }
 0x87b   : > { %v4592_v0 = vadd.f32 %v4560_v21, %v7205_v57  ;;  %v4417_v25 = vadd.f32 %v5176_v54, %v7984_v62  ;;  %v4411_v7 = vpop.f32.mrb[39].mxu1  ;;  %v8247_v21 = vld [vmem:[#allocation3_spill] sm:$0xff] }
 0x87c   : > { %v4591_v60 = vadd.f32 %v4559_v38, %v7213_v53  ;;  %v4412_v45 = vadd.f32 %v7984_v62, %v4411_v7 }
 0x87d   : > { %4624 = vst.msk [vmem:[%s7999_s21 + $0x18] sm:$0xff] %vm635_vm0, %v4592_v0  ;;  %v4562_v12 = vmul.f32 %v7989_v51, %v4417_v25  ;;  %v8248_v25 = vld [vmem:[#allocation7_spill] sm:$0xff] }
 0x87e   : > { %4623 = vst.msk [vmem:[%s7999_s21 + $0x10] sm:$0xff] %vm635_vm0, %v4591_v60  ;;  %v4561_v37 = vmul.f32 %v7989_v51, %v4412_v45  ;;  %v5179_v46 = vpop.f32.mrb[40].mxu1 }
 0x87f   : > { %v4594_v57 = vadd.f32 %v4562_v12, %v7217_v19  ;;  %v4427_v33 = vadd.f32 %v5179_v46, %v7984_v62  ;;  %v4421_v59 = vpop.f32.mrb[41].mxu1  ;;  %v8249_v46 = vld [vmem:[#allocation8_spill] sm:$0xff] }
 0x880   : > { %v4593_v53 = vadd.f32 %v4561_v37, %v7225_v40  ;;  %v4422_v43 = vadd.f32 %v7984_v62, %v4421_v59 }
 0x881   : > { %4626 = vst.msk [vmem:[%s7999_s21 + $0x28] sm:$0xff] %vm635_vm0, %v4594_v57  ;;  %v4564_v4 = vmul.f32 %v7989_v51, %v4427_v33 }
 0x882   : > { %4625 = vst.msk [vmem:[%s7999_s21 + $0x20] sm:$0xff] %vm635_vm0, %v4593_v53  ;;  %v4563_v24 = vmul.f32 %v7989_v51, %v4422_v43  ;;  %v5182_v32 = vpop.f32.mrb[42].mxu1  ;;  %v8250_v53 = vld [vmem:[#allocation9_spill] sm:$0xff] }
 0x883   : > { %v4596_v19 = vadd.f32 %v4564_v4, %v7231_v63  ;;  %v4437_v8 = vadd.f32 %v5182_v32, %v7984_v62  ;;  %v4431_v10 = vpop.f32.mrb[43].mxu1 }
 0x884   : > { %v4595_v40 = vadd.f32 %v4563_v24, %v7239_v44  ;;  %v4432_v34 = vadd.f32 %v7984_v62, %v4431_v10 }
 0x885   : > { %4628 = vst.msk [vmem:[%s7999_s21 + $0x38] sm:$0xff] %vm635_vm0, %v4596_v19  ;;  %v4566_v6 = vmul.f32 %v7989_v51, %v4437_v8  ;;  %v8251_v8 = vld [vmem:[#allocation10_spill] sm:$0xff] }
 0x886   : > { %4627 = vst.msk [vmem:[%s7999_s21 + $0x30] sm:$0xff] %vm635_vm0, %v4595_v40  ;;  %v4565_v18 = vmul.f32 %v7989_v51, %v4432_v34  ;;  %v5185_v9 = vpop.f32.mrb[44].mxu1 }
 0x887   : > { %v4598_v63 = vadd.f32 %v4566_v6, %v7245_v1  ;;  %v4447_v49 = vadd.f32 %v5185_v9, %v7984_v62  ;;  %v4441_v30 = vpop.f32.mrb[45].mxu1  ;;  %v8252_v6 = vld [vmem:[#allocation11_spill] sm:$0xff] }
 0x888   : > { %v4597_v44 = vadd.f32 %v4565_v18, %v7253_v23  ;;  %v4442_v56 = vadd.f32 %v7984_v62, %v4441_v30 }
 0x889   : > { %4630 = vst.msk [vmem:[%s7999_s21 + $0x48] sm:$0xff] %vm635_vm0, %v4598_v63  ;;  %v4568_v27 = vmul.f32 %v7989_v51, %v4447_v49 }
 0x88a   : > { %4629 = vst.msk [vmem:[%s7999_s21 + $0x40] sm:$0xff] %vm635_vm0, %v4597_v44  ;;  %v4567_v3 = vmul.f32 %v7989_v51, %v4442_v56  ;;  %v5188_v26 = vpop.f32.mrb[46].mxu1  ;;  %v8253_v44 = vld [vmem:[#allocation12_spill] sm:$0xff] }
 0x88b   : > { %v4600_v1 = vadd.f32 %v4568_v27, %v7259_v2  ;;  %v4457_v61 = vadd.f32 %v5188_v26, %v7984_v62  ;;  %v4451_v52 = vpop.f32.mrb[47].mxu1  ;;  %v8254_v26 = vld [vmem:[#allocation13_spill] sm:$0xff] }
 0x88c   : > { %v4599_v23 = vadd.f32 %v4567_v3, %v7267_v41  ;;  %v4452_v14 = vadd.f32 %v7984_v62, %v4451_v52 }
 0x88d   : > { %4632 = vst.msk [vmem:[%s7999_s21 + $0x58] sm:$0xff] %vm635_vm0, %v4600_v1  ;;  %v4570_v58 = vmul.f32 %v7989_v51, %v4457_v61 }
 0x88e   : > { %4631 = vst.msk [vmem:[%s7999_s21 + $0x50] sm:$0xff] %vm635_vm0, %v4599_v23  ;;  %v4569_v35 = vmul.f32 %v7989_v51, %v4452_v14  ;;  %v5191_v31 = vpop.f32.mrb[48].mxu1 }
 0x88f   : > { %v4602_v2 = vadd.f32 %v4570_v58, %v7273_v22  ;;  %v4467_v17 = vadd.f32 %v5191_v31, %v7984_v62  ;;  %v4461_v50 = vpop.f32.mrb[49].mxu1  ;;  %v8255_v58 = vld [vmem:[#allocation14_spill] sm:$0xff] }
 0x890   : > { %v4601_v41 = vadd.f32 %v4569_v35, %v8244_v47  ;;  %v4462_v5 = vadd.f32 %v7984_v62, %v4461_v50 }
 0x891   : > { %4634 = vst.msk [vmem:[%s7999_s21 + $0x68] sm:$0xff] %vm635_vm0, %v4602_v2  ;;  %v4572_v16 = vmul.f32 %v7989_v51, %v4467_v17  ;;  %v8256_v17 = vld [vmem:[#allocation15_spill] sm:$0xff] }
 0x892   : > { %4633 = vst.msk [vmem:[%s7999_s21 + $0x60] sm:$0xff] %vm635_vm0, %v4601_v41  ;;  %v4571_v39 = vmul.f32 %v7989_v51, %v4462_v5  ;;  %v5194_v28 = vpop.f32.mrb[50].mxu1 }
 0x893   : > { %v4604_v22 = vadd.f32 %v4572_v16, %v8245_v20  ;;  %v4477_v11 = vadd.f32 %v5194_v28, %v7984_v62  ;;  %v4471_v42 = vpop.f32.mrb[51].mxu1 }
 0x894   : > { %v4603_v55 = vadd.f32 %v4571_v39, %v8246_v13  ;;  %v4472_v29 = vadd.f32 %v7984_v62, %v4471_v42  ;;  %v8257_v39 = vld [vmem:[#allocation16_spill] sm:$0xff] }
 0x895   : > { %4636 = vst.msk [vmem:[%s7999_s21 + $0x78] sm:$0xff] %vm635_vm0, %v4604_v22  ;;  %v4574_v15 = vmul.f32 %v7989_v51, %v4477_v11  ;;  %v8258_v11 = vld [vmem:[#allocation17_spill] sm:$0xff] }
 0x896   : > { %4635 = vst.msk [vmem:[%s7999_s21 + $0x70] sm:$0xff] %vm635_vm0, %v4603_v55  ;;  %v4573_v36 = vmul.f32 %v7989_v51, %v4472_v29  ;;  %v5197_v48 = vpop.f32.mrb[52].mxu1 }
 0x897   : > { %v4606_v38 = vadd.f32 %v4574_v15, %v8247_v21  ;;  %v4487_v54 = vadd.f32 %v5197_v48, %v7984_v62  ;;  %v4481_v0 = vpop.f32.mrb[53].mxu1 }
 0x898   : > { %v4605_v7 = vadd.f32 %v4573_v36, %v8248_v25  ;;  %v4482_v60 = vadd.f32 %v7984_v62, %v4481_v0  ;;  %v8259_v36 = vld [vmem:[#allocation18_spill] sm:$0xff] }
 0x899   : > { %4638 = vst.msk [vmem:[%s7999_s21 + $0x88] sm:$0xff] %vm635_vm0, %v4606_v38  ;;  %v4576_v45 = vmul.f32 %v7989_v51, %v4487_v54  ;;  %v8260_v54 = vld [vmem:[#allocation19_spill] sm:$0xff] }
 0x89a   : > { %4637 = vst.msk [vmem:[%s7999_s21 + $0x80] sm:$0xff] %vm635_vm0, %v4605_v7  ;;  %v4575_v12 = vmul.f32 %v7989_v51, %v4482_v60  ;;  %v5200_v37 = vpop.f32.mrb[54].mxu1 }
 0x89b   : > { %v4608_v57 = vadd.f32 %v4576_v45, %v8249_v46  ;;  %v4497_v33 = vadd.f32 %v5200_v37, %v7984_v62  ;;  %v4491_v59 = vpop.f32.mrb[55].mxu1  ;;  %v8261_v45 = vld [vmem:[#allocation20_spill] sm:$0xff]  ;;  %v8262_v37 = vld [vmem:[#allocation21_spill] sm:$0xff] }
 0x89c   : > { %v4607_v43 = vadd.f32 %v4575_v12, %v8250_v53  ;;  %v4492_v4 = vadd.f32 %v7984_v62, %v4491_v59 }
 0x89d   : > { %4640 = vst.msk [vmem:[%s7999_s21 + $0x98] sm:$0xff] %vm635_vm0, %v4608_v57  ;;  %v4578_v24 = vmul.f32 %v7989_v51, %v4497_v33 }
 0x89e   : > { %4639 = vst.msk [vmem:[%s7999_s21 + $0x90] sm:$0xff] %vm635_vm0, %v4607_v43  ;;  %v4577_v32 = vmul.f32 %v7989_v51, %v4492_v4  ;;  %v5203_v19 = vpop.f32.mrb[56].mxu1 }
 0x89f   : > { %v4610_v10 = vadd.f32 %v4578_v24, %v8251_v8  ;;  %v4507_v40 = vadd.f32 %v5203_v19, %v7984_v62  ;;  %v4501_v34 = vpop.f32.mrb[57].mxu1 }
 0x8a0   : > { %v4609_v18 = vadd.f32 %v4577_v32, %v8252_v6  ;;  %v4502_v9 = vadd.f32 %v7984_v62, %v4501_v34 }
 0x8a1   : > { %4642 = vst.msk [vmem:[%s7999_s21 + $0xa8] sm:$0xff] %vm635_vm0, %v4610_v10  ;;  %v4580_v63 = vmul.f32 %v7989_v51, %v4507_v40 }
 0x8a2   : > { %4641 = vst.msk [vmem:[%s7999_s21 + $0xa0] sm:$0xff] %vm635_vm0, %v4609_v18  ;;  %v4579_v49 = vmul.f32 %v7989_v51, %v4502_v9  ;;  %v5206_v30 = vpop.f32.mrb[58].mxu1 }
 0x8a3   : > { %v4612_v56 = vadd.f32 %v4580_v63, %v8253_v44  ;;  %v4517_v27 = vadd.f32 %v5206_v30, %v7984_v62  ;;  %v4511_v3 = vpop.f32.mrb[59].mxu1 }
 0x8a4   : > { %v4611_v1 = vadd.f32 %v4579_v49, %v8254_v26  ;;  %v4512_v61 = vadd.f32 %v7984_v62, %v4511_v3 }
 0x8a5   : > { %4644 = vst.msk [vmem:[%s7999_s21 + $0xb8] sm:$0xff] %vm635_vm0, %v4612_v56  ;;  %v4582_v52 = vmul.f32 %v7989_v51, %v4517_v27 }
 0x8a6   : > { %4643 = vst.msk [vmem:[%s7999_s21 + $0xb0] sm:$0xff] %vm635_vm0, %v4611_v1  ;;  %v4581_v23 = vmul.f32 %v7989_v51, %v4512_v61  ;;  %v5209_v14 = vpop.f32.mrb[60].mxu1 }
 0x8a7   : > { %v4614_v35 = vadd.f32 %v4582_v52, %v8255_v58  ;;  %v4527_v31 = vadd.f32 %v5209_v14, %v7984_v62  ;;  %v4521_v2 = vpop.f32.mrb[61].mxu1 }
 0x8a8   : > { %v4613_v50 = vadd.f32 %v4581_v23, %v8256_v17  ;;  %v4522_v47 = vadd.f32 %v7984_v62, %v4521_v2 }
 0x8a9   : > { %4646 = vst.msk [vmem:[%s7999_s21 + $0xc8] sm:$0xff] %vm635_vm0, %v4614_v35  ;;  %v4584_v41 = vmul.f32 %v7989_v51, %v4527_v31 }
 0x8aa   : > { %4645 = vst.msk [vmem:[%s7999_s21 + $0xc0] sm:$0xff] %vm635_vm0, %v4613_v50  ;;  %v4583_v5 = vmul.f32 %v7989_v51, %v4522_v47  ;;  %v5212_v16 = vpop.f32.mrb[62].mxu1 }
 0x8ab   : > { %v4616_v28 = vadd.f32 %v4584_v41, %v8257_v39  ;;  %v4537_v20 = vadd.f32 %v5212_v16, %v7984_v62  ;;  %v4531_v22 = vpop.f32.mrb[63].mxu1 }
 0x8ac   : > { %v4615_v42 = vadd.f32 %v4583_v5, %v8258_v11  ;;  %v4532_v13 = vadd.f32 %v7984_v62, %v4531_v22 }
 0x8ad   : > { %4648 = vst.msk [vmem:[%s7999_s21 + $0xd8] sm:$0xff] %vm635_vm0, %v4616_v28  ;;  %v4586_v55 = vmul.f32 %v7989_v51, %v4537_v20 }
 0x8ae   : > { %4647 = vst.msk [vmem:[%s7999_s21 + $0xd0] sm:$0xff] %vm635_vm0, %v4615_v42  ;;  %v4585_v29 = vmul.f32 %v7989_v51, %v4532_v13  ;;  %v5215_v15 = vpop.f32.mrb[64].mxu1 }
 0x8af   : > { %v4618_v48 = vadd.f32 %v4586_v55, %v8259_v36  ;;  %v4547_v21 = vadd.f32 %v5215_v15, %v7984_v62  ;;  %v4541_v38 = vpop.f32.mrb[65].mxu1 }
 0x8b0   : > { %v4617_v0 = vadd.f32 %v4585_v29, %v8260_v54  ;;  %v4542_v25 = vadd.f32 %v7984_v62, %v4541_v38 }
 0x8b1   : > { %4650 = vst.msk [vmem:[%s7999_s21 + $0xe8] sm:$0xff] %vm635_vm0, %v4618_v48  ;;  %v4588_v7 = vmul.f32 %v7989_v51, %v4547_v21 }
 0x8b2   : > { %4649 = vst.msk [vmem:[%s7999_s21 + $0xe0] sm:$0xff] %vm635_vm0, %v4617_v0  ;;  %v4587_v60 = vmul.f32 %v7989_v51, %v4542_v25 }
 0x8b3   : > { %v4620_v12 = vadd.f32 %v4588_v7, %v8261_v45 }
 0x8b4   : > { %v4619_v46 = vadd.f32 %v4587_v60, %v8262_v37 }
 0x8b5   : > { %4652 = vst.msk [vmem:[%s7999_s21 + $0xf8] sm:$0xff] %vm635_vm0, %v4620_v12 }
 0x8b6   : > { %4651 = vst.msk [vmem:[%s7999_s21 + $0xf0] sm:$0xff] %vm635_vm0, %v4619_v46 }
 0x8b7 PF: > { %s29_s0 = sadd.s32 1, %s5415_s0  }
 0x8b8   : > { %p26_p4 = scmp.ge.s32.totalorder %s29_s0, 4  }
 0x8ba   :  { %28 = sbr.rel (!%p26_p4) target bundleno = 5 (0x5), region = 128 }

</bundles_post_ra>
